<compile_context>
chip_gen: v7x
topology: tpu7x:2x2x1
jax: 0.10.0
libtpu: 0.0.40
codegen_flags: <defaults>
</compile_context>

<pallas_src>
import math
import functools

import jax
import jax.numpy as jnp
from jax import lax
from jax.experimental import pallas as pl
from jax.experimental.pallas import tpu as pltpu

# ----------------------------- configuration (small, synthetic) --------------
CFG = dict(
    d_model=32, heads=4, d_ff=64, n_experts=2, n_layers=2,
    capacity_factor=1.0, drop_tokens=False, is_scale_prob=True,
    dropout=0.0, dropout_ffn=0.0, d_out=768, vocab_size=100,
)
LN_EPS = 1e-5
NEG_BIG = 1e30     # magnitude of the additive mask for cross-batch score entries

_VMEM = pl.BlockSpec(memory_space=pltpu.MemorySpace.VMEM)


def _layernorm(x, g, b):
    mu = jnp.mean(x, axis=-1, keepdims=True)
    var = jnp.mean((x - mu) ** 2, axis=-1, keepdims=True)
    return (x - mu) * lax.rsqrt(var + LN_EPS) * g + b


def _dot_nt(a, b):
    # a: [M, D], b: [K, D]  ->  [M, K]   (contract last dims: "A @ B^T" without transpose)
    return lax.dot_general(a, b, (((1,), (1,)), ((), ())),
                           preferred_element_type=jnp.float32)


# ----------------------------- the single fused kernel -----------------------
def fused_forward_kernel(
    x_ref,
    ln1_g_ref, ln1_b_ref,
    wq_ref, bq_ref, wk_ref, bk_ref, wv_ref, bv_ref, wo_ref, bo_ref,
    ln2_g_ref, ln2_b_ref, wr_ref, br_ref, w1_ref, b1_ref, w2_ref, b2_ref,
    lnf_g_ref, lnf_b_ref, wout_ref, bout_ref,
    xn_ref, logits_ref, attn_ref, values_ref, stats_ref,
    *, S, B,
):
    D = CFG['d_model']; H = CFG['heads']; E = CFG['n_experts']; F = CFG['d_ff']
    L = CFG['n_layers']
    dk = D // H
    N = S * B

    x = x_ref[...]                       # [N, D] activation, resident for the whole forward

    # ---------------- hoisted layer-invariant masks (computed once) ----------------
    # per-head lane masks [1, D]: head h owns lanes [h*dk, (h+1)*dk)
    lane = lax.broadcasted_iota(jnp.int32, (1, D), 1)
    head_masks = [((lane >= h * dk) & (lane < (h + 1) * dk)).astype(jnp.float32)
                  for h in range(H)]
    # additive cross-batch bias [N, N]: row n of the flat activation is token
    # (s = n // B, b = n % B); same-batch pairs get 0, cross-batch pairs -NEG_BIG.
    # Built from iota + floor arithmetic (exact for these integer magnitudes).
    ri = lax.broadcasted_iota(jnp.int32, (N, 1), 0).astype(jnp.float32)
    ci = lax.broadcasted_iota(jnp.int32, (1, N), 1).astype(jnp.float32)
    rb = ri - B * jnp.floor(ri / B)                     # batch id of query row
    cb = ci - B * jnp.floor(ci / B)                     # batch id of key column
    attn_bias = jnp.where(rb == cb, 0.0, -NEG_BIG)      # [N, N]
    # router / expert iotas
    eidx = lax.broadcasted_iota(jnp.int32, (N, E), 1)        # [N, E]
    ef_idx = lax.broadcasted_iota(jnp.int32, (N, E * F), 1)  # [N, E*F]

    for li in range(L):                  # static unroll: weights + activation stay on-chip
        # ---------------- pre-LN multi-head self-attention + residual --------
        z = _layernorm(x, ln1_g_ref[li], ln1_b_ref[li])                       # [N, D]
        # NOTE: 1/sqrt(dk) is pre-folded into wq/bq (init_params).
        q = jnp.dot(z, wq_ref[li], preferred_element_type=jnp.float32) + bq_ref[li]
        k = jnp.dot(z, wk_ref[li], preferred_element_type=jnp.float32) + bk_ref[li]
        v = jnp.dot(z, wv_ref[li], preferred_element_type=jnp.float32) + bv_ref[li]
        values_ref[li] = v                                                    # [N, D]

        o = jnp.zeros((N, D), jnp.float32)
        for h in range(H):               # static unroll over heads; no lane slicing
            s = _dot_nt(q * head_masks[h], k) + attn_bias                     # [N, N]
            s = s - jnp.max(s, axis=-1, keepdims=True)
            es = jnp.exp(s)
            p = es * pl.reciprocal(jnp.sum(es, axis=-1, keepdims=True), approx=True)
            attn_ref[li, h] = p                                               # [N, N]
            # head outputs live in disjoint lanes -> merging heads is a plain add
            o = o + jnp.dot(p, v * head_masks[h], preferred_element_type=jnp.float32)

        proj = jnp.dot(o, wo_ref[li], preferred_element_type=jnp.float32) + bo_ref[li]
        x = x + proj                                   # residual (dropout = identity, p=0)

        # ---------------- pre-LN Switch feed-forward (top-1 routing) + residual
        z2 = _layernorm(x, ln2_g_ref[li], ln2_b_ref[li])                      # [N, D]
        rl = jnp.dot(z2, wr_ref[li], preferred_element_type=jnp.float32) + br_ref[li]
        rl = rl - jnp.max(rl, axis=-1, keepdims=True)
        er = jnp.exp(rl)
        rp = er / jnp.sum(er, axis=-1, keepdims=True)   # exact (feeds stats + FFN scaling)
        rp_max = jnp.max(rp, axis=-1, keepdims=True)                          # [N, 1]
        first_max = jnp.min(jnp.where(rp >= rp_max, eidx, E),
                            axis=-1, keepdims=True)                           # lowest arg-max
        onehot = (eidx == first_max).astype(jnp.float32)                      # [N, E]

        # fused expert FFN: [N,D]x[D,E*F] -> ReLU -> iota-based per-expert mask
        # -> [N,E*F]x[E*F,D]; identical to compute-then-mask when nothing is dropped.
        h1 = jnp.dot(z2, w1_ref[li], preferred_element_type=jnp.float32) + b1_ref[li]
        h1 = jnp.maximum(h1, 0.0)                                             # ReLU
        lo = first_max * F                                                    # [N, 1] int32
        emask = ((ef_idx >= lo) & (ef_idx < lo + F)).astype(jnp.float32)      # [N, E*F]
        ff = jnp.dot(h1 * emask, w2_ref[li], preferred_element_type=jnp.float32)
        ff = ff + jnp.dot(onehot, b2_ref[li], preferred_element_type=jnp.float32)
        # TODO(synk): expert-capacity token dropping not implemented (drop_tokens=False only).
        if CFG['is_scale_prob']:
            ff = ff * rp_max
        # else: rp_max / rp_max.detach() == 1 numerically in the forward pass
        x = x + ff                                                            # residual

        # routing stats packed into ONE store per layer: [counts | sum(route_prob)]
        stats_ref[li] = jnp.concatenate(
            [jnp.sum(onehot, axis=0, keepdims=True),
             jnp.sum(rp, axis=0, keepdims=True)], axis=-1)                    # [1, 2E]

    # ---------------- final LayerNorm + projection to d_out=768 ---------------
    xn = _layernorm(x, lnf_g_ref[...], lnf_b_ref[...])
    xn_ref[...] = xn
    logits_ref[...] = jnp.dot(xn, wout_ref[...],
                              preferred_element_type=jnp.float32) + bout_ref[...]


# ----------------------------- parameter init ---------------------------------
def init_params(key, cfg):
    """Synthetic weights, stored in the fused [in, out] layouts used by the kernel.

    The attention scale 1/sqrt(d_k) is pre-folded into wq (and would be folded into
    bq if it were nonzero) as a one-time parameter transform.  w1/w2/b1 hold the E
    experts' first/second Linear weights stacked along the E*F hidden dim.
    """
    D, H, F, E, L = cfg['d_model'], cfg['heads'], cfg['d_ff'], cfg['n_experts'], cfg['n_layers']
    V, DO = cfg['vocab_size'], cfg['d_out']
    dk = D // H
    scale = 1.0 / math.sqrt(dk)
    keys = iter(jax.random.split(key, 16))

    def w(shape, s=0.02):
        return (s * jax.random.normal(next(keys), shape)).astype(jnp.float32)

    return dict(
        embedding=w((V, D)),
        ln1_g=jnp.ones((L, 1, D), jnp.float32), ln1_b=jnp.zeros((L, 1, D), jnp.float32),
        wq=(w((L, D, D)) * scale), bq=jnp.zeros((L, 1, D), jnp.float32),   # scale pre-folded
        wk=w((L, D, D)), bk=jnp.zeros((L, 1, D), jnp.float32),
        wv=w((L, D, D)), bv=jnp.zeros((L, 1, D), jnp.float32),
        wo=w((L, D, D)), bo=jnp.zeros((L, 1, D), jnp.float32),
        ln2_g=jnp.ones((L, 1, D), jnp.float32), ln2_b=jnp.zeros((L, 1, D), jnp.float32),
        wr=w((L, D, E)), br=jnp.zeros((L, 1, E), jnp.float32),
        w1=w((L, D, E * F)), b1=jnp.zeros((L, 1, E * F), jnp.float32),
        w2=w((L, E * F, D)), b2=jnp.zeros((L, E, D), jnp.float32),
        lnf_g=jnp.ones((1, D), jnp.float32), lnf_b=jnp.zeros((1, D), jnp.float32),
        w_out=w((D, DO)), b_out=jnp.zeros((1, DO), jnp.float32),
    )


# ----------------------------- forward wrapper ---------------------------------
def labse_switch_forward(params, input_ids, token_type_ids=None, attention_mask=None):
    # word embeddings (glue) — [batch, seq, D]
    emb = jnp.take(params['embedding'], input_ids, axis=0)
    batch, seq, d = emb.shape
    S, B, D = seq, batch, d
    H, E, L, DO = CFG['heads'], CFG['n_experts'], CFG['n_layers'], CFG['d_out']
    dk = D // H
    N = S * B

    # torch does a RESHAPE (not transpose) [batch,seq,D] -> [seq,batch,D]; flattening
    # either layout to [seq*batch, D] yields the identical row order, so the kernel
    # works on the flat [N, D] activation and row n <-> (s = n // B, b = n % B).
    x_flat = emb.reshape(N, D)

    kernel = functools.partial(fused_forward_kernel, S=S, B=B)
    out_shapes = (
        jax.ShapeDtypeStruct((N, D), jnp.float32),            # final normalized x
        jax.ShapeDtypeStruct((N, DO), jnp.float32),           # distillation logits
        jax.ShapeDtypeStruct((L, H, N, N), jnp.float32),      # per-head attn probs (flat tokens)
        jax.ShapeDtypeStruct((L, N, D), jnp.float32),         # value tensors
        jax.ShapeDtypeStruct((L, 1, 2 * E), jnp.float32),     # [counts | route_prob sums]
    )
    xn, logits, attn_all, values_all, stats = pl.pallas_call(
        kernel,
        out_shape=out_shapes,
        in_specs=[_VMEM] * 23,
        out_specs=(_VMEM,) * 5,
    )(x_flat,
      params['ln1_g'], params['ln1_b'],
      params['wq'], params['bq'], params['wk'], params['bk'],
      params['wv'], params['bv'], params['wo'], params['bo'],
      params['ln2_g'], params['ln2_b'], params['wr'], params['br'],
      params['w1'], params['b1'], params['w2'], params['b2'],
      params['lnf_g'], params['lnf_b'], params['w_out'], params['b_out'])

    # torch (labml) layouts: attention [S_q, S_k, B, H], values [S, B, H, dk].
    # Cross-batch entries of the flat [N, N] prob matrices are exact zeros and are
    # discarded here by taking the same-batch (diagonal) blocks — free wrapper plumbing.
    attn_list = []
    for li in range(L):
        a = attn_all[li].reshape(H, S, B, S, B)
        a = jnp.diagonal(a, axis1=2, axis2=4)          # [H, S_q, S_k, B]
        attn_list.append(jnp.transpose(a, (1, 2, 3, 0)))
    val_list = [values_all[li].reshape(S, B, H, dk) for li in range(L)]

    return dict(
        x=xn.reshape(S, B, D),            # [S, B, D]
        counts=stats[:, 0, :E],           # [n_layers, n_experts]
        route_prob=stats[:, 0, E:],       # [n_layers, n_experts]
        n_dropped=[0] * L,                # drop_tokens=False → nothing dropped
        logits=logits.reshape(S, B, DO),  # [S, B, 768]
        attention=attn_list,              # per-layer [S, S, B, H]
        values=val_list,                  # per-layer [S, B, H, dk]
    )


# ----------------------------- main --------------------------------------------
if __name__ == "__main__":
    key = jax.random.PRNGKey(0)
    pkey, dkey = jax.random.split(key)
    params = init_params(pkey, CFG)

    batch, seq = 2, 8
    input_ids = jax.random.randint(dkey, (batch, seq), 0, CFG['vocab_size'])

    out = labse_switch_forward(params, input_ids, attention_mask=None)
    jax.block_until_ready(out['x'])
    jax.block_until_ready(out['logits'])
    jax.block_until_ready(out['counts'])
    for a in out['attention']:
        jax.block_until_ready(a)
    for v in out['values']:
        jax.block_until_ready(v)
    print("KERNEL_OK")
</pallas_src>

<mosaic_0001>
module attributes {stable_mosaic.version = 11 : i64} {
  func.func @fused_forward_kernel(%arg0: memref<16x32xf32, #tpu.memory_space<vmem>>, %arg1: memref<2x1x32xf32, #tpu.memory_space<vmem>>, %arg2: memref<2x1x32xf32, #tpu.memory_space<vmem>>, %arg3: memref<2x32x32xf32, #tpu.memory_space<vmem>>, %arg4: memref<2x1x32xf32, #tpu.memory_space<vmem>>, %arg5: memref<2x32x32xf32, #tpu.memory_space<vmem>>, %arg6: memref<2x1x32xf32, #tpu.memory_space<vmem>>, %arg7: memref<2x32x32xf32, #tpu.memory_space<vmem>>, %arg8: memref<2x1x32xf32, #tpu.memory_space<vmem>>, %arg9: memref<2x32x32xf32, #tpu.memory_space<vmem>>, %arg10: memref<2x1x32xf32, #tpu.memory_space<vmem>>, %arg11: memref<2x1x32xf32, #tpu.memory_space<vmem>>, %arg12: memref<2x1x32xf32, #tpu.memory_space<vmem>>, %arg13: memref<2x32x2xf32, #tpu.memory_space<vmem>>, %arg14: memref<2x1x2xf32, #tpu.memory_space<vmem>>, %arg15: memref<2x32x128xf32, #tpu.memory_space<vmem>>, %arg16: memref<2x1x128xf32, #tpu.memory_space<vmem>>, %arg17: memref<2x128x32xf32, #tpu.memory_space<vmem>>, %arg18: memref<2x2x32xf32, #tpu.memory_space<vmem>>, %arg19: memref<1x32xf32, #tpu.memory_space<vmem>>, %arg20: memref<1x32xf32, #tpu.memory_space<vmem>>, %arg21: memref<32x768xf32, #tpu.memory_space<vmem>>, %arg22: memref<1x768xf32, #tpu.memory_space<vmem>>, %arg23: memref<16x32xf32, #tpu.memory_space<vmem>>, %arg24: memref<16x768xf32, #tpu.memory_space<vmem>>, %arg25: memref<2x4x16x16xf32, #tpu.memory_space<vmem>>, %arg26: memref<2x16x32xf32, #tpu.memory_space<vmem>>, %arg27: memref<2x1x4xf32, #tpu.memory_space<vmem>>) attributes {dimension_semantics = [], scalar_prefetch = 0 : i64, scratch_operands = 0 : i64, tpu.core_type = #tpu.core_type<tc>} {
    %c0 = arith.constant 0 : index
    %c0_0 = arith.constant 0 : index
    %0 = vector.load %arg0[%c0, %c0_0] : memref<16x32xf32, #tpu.memory_space<vmem>>, vector<16x32xf32>
    %1 = tpu.iota {dimensions = array<i32: 1>} : vector<1x32xi32>
    %c0_i32 = arith.constant 0 : i32
    %2 = vector.broadcast %c0_i32 : i32 to vector<1x32xi32>
    %3 = arith.cmpi sge, %1, %2 : vector<1x32xi32>
    %c8_i32 = arith.constant 8 : i32
    %4 = vector.broadcast %c8_i32 : i32 to vector<1x32xi32>
    %5 = arith.cmpi slt, %1, %4 : vector<1x32xi32>
    %6 = arith.andi %3, %5 : vector<1x32xi1>
    %7 = arith.extui %6 : vector<1x32xi1> to vector<1x32xi32>
    %8 = arith.sitofp %7 : vector<1x32xi32> to vector<1x32xf32>
    %c8_i32_1 = arith.constant 8 : i32
    %9 = vector.broadcast %c8_i32_1 : i32 to vector<1x32xi32>
    %10 = arith.cmpi sge, %1, %9 : vector<1x32xi32>
    %c16_i32 = arith.constant 16 : i32
    %11 = vector.broadcast %c16_i32 : i32 to vector<1x32xi32>
    %12 = arith.cmpi slt, %1, %11 : vector<1x32xi32>
    %13 = arith.andi %10, %12 : vector<1x32xi1>
    %14 = arith.extui %13 : vector<1x32xi1> to vector<1x32xi32>
    %15 = arith.sitofp %14 : vector<1x32xi32> to vector<1x32xf32>
    %c16_i32_2 = arith.constant 16 : i32
    %16 = vector.broadcast %c16_i32_2 : i32 to vector<1x32xi32>
    %17 = arith.cmpi sge, %1, %16 : vector<1x32xi32>
    %c24_i32 = arith.constant 24 : i32
    %18 = vector.broadcast %c24_i32 : i32 to vector<1x32xi32>
    %19 = arith.cmpi slt, %1, %18 : vector<1x32xi32>
    %20 = arith.andi %17, %19 : vector<1x32xi1>
    %21 = arith.extui %20 : vector<1x32xi1> to vector<1x32xi32>
    %22 = arith.sitofp %21 : vector<1x32xi32> to vector<1x32xf32>
    %c24_i32_3 = arith.constant 24 : i32
    %23 = vector.broadcast %c24_i32_3 : i32 to vector<1x32xi32>
    %24 = arith.cmpi sge, %1, %23 : vector<1x32xi32>
    %c32_i32 = arith.constant 32 : i32
    %25 = vector.broadcast %c32_i32 : i32 to vector<1x32xi32>
    %26 = arith.cmpi slt, %1, %25 : vector<1x32xi32>
    %27 = arith.andi %24, %26 : vector<1x32xi1>
    %28 = arith.extui %27 : vector<1x32xi1> to vector<1x32xi32>
    %29 = arith.sitofp %28 : vector<1x32xi32> to vector<1x32xf32>
    %30 = tpu.iota {dimensions = array<i32: 0>} : vector<16x1xi32>
    %31 = arith.sitofp %30 : vector<16x1xi32> to vector<16x1xf32>
    %32 = tpu.iota {dimensions = array<i32: 1>} : vector<1x16xi32>
    %33 = arith.sitofp %32 : vector<1x16xi32> to vector<1x16xf32>
    %cst = arith.constant 2.000000e+00 : f32
    %34 = vector.broadcast %cst : f32 to vector<16x1xf32>
    %35 = arith.divf %31, %34 : vector<16x1xf32>
    %36 = math.floor %35 : vector<16x1xf32>
    %cst_4 = arith.constant 2.000000e+00 : f32
    %37 = vector.broadcast %cst_4 : f32 to vector<16x1xf32>
    %38 = arith.mulf %37, %36 : vector<16x1xf32>
    %39 = arith.subf %31, %38 : vector<16x1xf32>
    %cst_5 = arith.constant 2.000000e+00 : f32
    %40 = vector.broadcast %cst_5 : f32 to vector<1x16xf32>
    %41 = arith.divf %33, %40 : vector<1x16xf32>
    %42 = math.floor %41 : vector<1x16xf32>
    %cst_6 = arith.constant 2.000000e+00 : f32
    %43 = vector.broadcast %cst_6 : f32 to vector<1x16xf32>
    %44 = arith.mulf %43, %42 : vector<1x16xf32>
    %45 = arith.subf %33, %44 : vector<1x16xf32>
    %46 = vector.broadcast %39 : vector<16x1xf32> to vector<16x16xf32>
    %47 = vector.broadcast %45 : vector<1x16xf32> to vector<16x16xf32>
    %48 = arith.cmpf oeq, %46, %47 : vector<16x16xf32>
    %cst_7 = arith.constant 0.000000e+00 : f32
    %cst_8 = arith.constant -1.000000e+30 : f32
    %49 = vector.broadcast %cst_7 : f32 to vector<16x16xf32>
    %50 = vector.broadcast %cst_8 : f32 to vector<16x16xf32>
    %51 = arith.select %48, %49, %50 : vector<16x16xi1>, vector<16x16xf32>
    %52 = tpu.iota {dimensions = array<i32: 1>} : vector<16x2xi32>
    %53 = tpu.iota {dimensions = array<i32: 1>} : vector<16x128xi32>
    %c0_9 = arith.constant 0 : index
    %c0_10 = arith.constant 0 : index
    %c0_11 = arith.constant 0 : index
    %54 = vector.load %arg1[%c0_9, %c0_10, %c0_11] : memref<2x1x32xf32, #tpu.memory_space<vmem>>, vector<1x1x32xf32>
    %55 = vector.shape_cast %54 : vector<1x1x32xf32> to vector<1x32xf32>
    %c0_12 = arith.constant 0 : index
    %c0_13 = arith.constant 0 : index
    %c0_14 = arith.constant 0 : index
    %56 = vector.load %arg2[%c0_12, %c0_13, %c0_14] : memref<2x1x32xf32, #tpu.memory_space<vmem>>, vector<1x1x32xf32>
    %57 = vector.shape_cast %56 : vector<1x1x32xf32> to vector<1x32xf32>
    %cst_15 = arith.constant dense<0.000000e+00> : vector<16xf32>
    %58 = vector.multi_reduction <add>, %0, %cst_15 [1] : vector<16x32xf32> to vector<16xf32>
    %59 = vector.shape_cast %58 : vector<16xf32> to vector<16x1xf32>
    %cst_16 = arith.constant 3.200000e+01 : f32
    %60 = vector.broadcast %cst_16 : f32 to vector<16x1xf32>
    %61 = arith.divf %59, %60 : vector<16x1xf32>
    %62 = vector.broadcast %61 : vector<16x1xf32> to vector<16x32xf32>
    %63 = arith.subf %0, %62 : vector<16x32xf32>
    %64 = arith.mulf %63, %63 : vector<16x32xf32>
    %cst_17 = arith.constant dense<0.000000e+00> : vector<16xf32>
    %65 = vector.multi_reduction <add>, %64, %cst_17 [1] : vector<16x32xf32> to vector<16xf32>
    %66 = vector.shape_cast %65 : vector<16xf32> to vector<16x1xf32>
    %cst_18 = arith.constant 3.200000e+01 : f32
    %67 = vector.broadcast %cst_18 : f32 to vector<16x1xf32>
    %68 = arith.divf %66, %67 : vector<16x1xf32>
    %69 = vector.broadcast %61 : vector<16x1xf32> to vector<16x32xf32>
    %70 = arith.subf %0, %69 : vector<16x32xf32>
    %cst_19 = arith.constant 9.99999974E-6 : f32
    %71 = vector.broadcast %cst_19 : f32 to vector<16x1xf32>
    %72 = arith.addf %68, %71 : vector<16x1xf32>
    %73 = math.rsqrt %72 : vector<16x1xf32>
    %74 = vector.broadcast %73 : vector<16x1xf32> to vector<16x32xf32>
    %75 = arith.mulf %70, %74 : vector<16x32xf32>
    %76 = vector.broadcast %55 : vector<1x32xf32> to vector<16x32xf32>
    %77 = arith.mulf %75, %76 : vector<16x32xf32>
    %78 = vector.broadcast %57 : vector<1x32xf32> to vector<16x32xf32>
    %79 = arith.addf %77, %78 : vector<16x32xf32>
    %c0_20 = arith.constant 0 : index
    %c0_21 = arith.constant 0 : index
    %c0_22 = arith.constant 0 : index
    %80 = vector.load %arg3[%c0_20, %c0_21, %c0_22] : memref<2x32x32xf32, #tpu.memory_space<vmem>>, vector<1x32x32xf32>
    %81 = vector.shape_cast %80 : vector<1x32x32xf32> to vector<32x32xf32>
    %cst_23 = arith.constant dense<0.000000e+00> : vector<16x32xf32>
    %82 = tpu.matmul %79, %81, %cst_23 {dimension_numbers = #tpu.dot_dimension_numbers<[1], [0], [0], [1], [0, 0, 1, 1], [], []>} : vector<16x32xf32>, vector<32x32xf32>, vector<16x32xf32> -> vector<16x32xf32>
    %c0_24 = arith.constant 0 : index
    %c0_25 = arith.constant 0 : index
    %c0_26 = arith.constant 0 : index
    %83 = vector.load %arg4[%c0_24, %c0_25, %c0_26] : memref<2x1x32xf32, #tpu.memory_space<vmem>>, vector<1x1x32xf32>
    %84 = vector.shape_cast %83 : vector<1x1x32xf32> to vector<1x32xf32>
    %85 = vector.broadcast %84 : vector<1x32xf32> to vector<16x32xf32>
    %86 = arith.addf %82, %85 : vector<16x32xf32>
    %c0_27 = arith.constant 0 : index
    %c0_28 = arith.constant 0 : index
    %c0_29 = arith.constant 0 : index
    %87 = vector.load %arg5[%c0_27, %c0_28, %c0_29] : memref<2x32x32xf32, #tpu.memory_space<vmem>>, vector<1x32x32xf32>
    %88 = vector.shape_cast %87 : vector<1x32x32xf32> to vector<32x32xf32>
    %cst_30 = arith.constant dense<0.000000e+00> : vector<16x32xf32>
    %89 = tpu.matmul %79, %88, %cst_30 {dimension_numbers = #tpu.dot_dimension_numbers<[1], [0], [0], [1], [0, 0, 1, 1], [], []>} : vector<16x32xf32>, vector<32x32xf32>, vector<16x32xf32> -> vector<16x32xf32>
    %c0_31 = arith.constant 0 : index
    %c0_32 = arith.constant 0 : index
    %c0_33 = arith.constant 0 : index
    %90 = vector.load %arg6[%c0_31, %c0_32, %c0_33] : memref<2x1x32xf32, #tpu.memory_space<vmem>>, vector<1x1x32xf32>
    %91 = vector.shape_cast %90 : vector<1x1x32xf32> to vector<1x32xf32>
    %92 = vector.broadcast %91 : vector<1x32xf32> to vector<16x32xf32>
    %93 = arith.addf %89, %92 : vector<16x32xf32>
    %c0_34 = arith.constant 0 : index
    %c0_35 = arith.constant 0 : index
    %c0_36 = arith.constant 0 : index
    %94 = vector.load %arg7[%c0_34, %c0_35, %c0_36] : memref<2x32x32xf32, #tpu.memory_space<vmem>>, vector<1x32x32xf32>
    %95 = vector.shape_cast %94 : vector<1x32x32xf32> to vector<32x32xf32>
    %cst_37 = arith.constant dense<0.000000e+00> : vector<16x32xf32>
    %96 = tpu.matmul %79, %95, %cst_37 {dimension_numbers = #tpu.dot_dimension_numbers<[1], [0], [0], [1], [0, 0, 1, 1], [], []>} : vector<16x32xf32>, vector<32x32xf32>, vector<16x32xf32> -> vector<16x32xf32>
    %c0_38 = arith.constant 0 : index
    %c0_39 = arith.constant 0 : index
    %c0_40 = arith.constant 0 : index
    %97 = vector.load %arg8[%c0_38, %c0_39, %c0_40] : memref<2x1x32xf32, #tpu.memory_space<vmem>>, vector<1x1x32xf32>
    %98 = vector.shape_cast %97 : vector<1x1x32xf32> to vector<1x32xf32>
    %99 = vector.broadcast %98 : vector<1x32xf32> to vector<16x32xf32>
    %100 = arith.addf %96, %99 : vector<16x32xf32>
    %c0_41 = arith.constant 0 : index
    %c0_42 = arith.constant 0 : index
    %c0_43 = arith.constant 0 : index
    %101 = vector.load %arg26[%c0_41, %c0_42, %c0_43] : memref<2x16x32xf32, #tpu.memory_space<vmem>>, vector<1x16x32xf32>
    %102 = vector.shape_cast %101 : vector<1x16x32xf32> to vector<16x32xf32>
    %103 = vector.shape_cast %100 : vector<16x32xf32> to vector<1x16x32xf32>
    tpu.vector_store %arg26[%c0_41, %c0_42, %c0_43], %103 {strides = array<i32>} : memref<2x16x32xf32, #tpu.memory_space<vmem>>, vector<1x16x32xf32>,
    %cst_44 = arith.constant 0.000000e+00 : f32
    %104 = vector.broadcast %cst_44 : f32 to vector<16x32xf32>
    %105 = vector.broadcast %8 : vector<1x32xf32> to vector<16x32xf32>
    %106 = arith.mulf %86, %105 : vector<16x32xf32>
    %cst_45 = arith.constant dense<0.000000e+00> : vector<16x16xf32>
    %107 = tpu.matmul %106, %93, %cst_45 {dimension_numbers = #tpu.dot_dimension_numbers<[1], [1], [0], [0], [0, 0, 1, 0], [], []>} : vector<16x32xf32>, vector<16x32xf32>, vector<16x16xf32> -> vector<16x16xf32>
    %108 = arith.addf %107, %51 : vector<16x16xf32>
    %cst_46 = arith.constant dense<0xFF800000> : vector<16xf32>
    %109 = vector.multi_reduction <maximumf>, %108, %cst_46 [1] : vector<16x16xf32> to vector<16xf32>
    %110 = vector.shape_cast %109 : vector<16xf32> to vector<16x1xf32>
    %111 = vector.broadcast %110 : vector<16x1xf32> to vector<16x16xf32>
    %112 = arith.subf %108, %111 : vector<16x16xf32>
    %113 = math.exp %112 : vector<16x16xf32>
    %cst_47 = arith.constant dense<0.000000e+00> : vector<16xf32>
    %114 = vector.multi_reduction <add>, %113, %cst_47 [1] : vector<16x16xf32> to vector<16xf32>
    %115 = vector.shape_cast %114 : vector<16xf32> to vector<16x1xf32>
    %116 = tpu.reciprocal %115 {approx = true} : vector<16x1xf32> -> vector<16x1xf32>
    %117 = vector.broadcast %116 : vector<16x1xf32> to vector<16x16xf32>
    %118 = arith.mulf %113, %117 : vector<16x16xf32>
    %c0_48 = arith.constant 0 : index
    %c0_49 = arith.constant 0 : index
    %c0_50 = arith.constant 0 : index
    %c0_51 = arith.constant 0 : index
    %119 = vector.load %arg25[%c0_48, %c0_49, %c0_50, %c0_51] : memref<2x4x16x16xf32, #tpu.memory_space<vmem>>, vector<1x1x16x16xf32>
    %120 = vector.shape_cast %119 : vector<1x1x16x16xf32> to vector<16x16xf32>
    %121 = vector.shape_cast %118 : vector<16x16xf32> to vector<1x1x16x16xf32>
    tpu.vector_store %arg25[%c0_48, %c0_49, %c0_50, %c0_51], %121 {strides = array<i32>} : memref<2x4x16x16xf32, #tpu.memory_space<vmem>>, vector<1x1x16x16xf32>,
    %122 = vector.broadcast %8 : vector<1x32xf32> to vector<16x32xf32>
    %123 = arith.mulf %100, %122 : vector<16x32xf32>
    %cst_52 = arith.constant dense<0.000000e+00> : vector<16x32xf32>
    %124 = tpu.matmul %118, %123, %cst_52 {dimension_numbers = #tpu.dot_dimension_numbers<[1], [0], [0], [1], [0, 0, 1, 1], [], []>} : vector<16x16xf32>, vector<16x32xf32>, vector<16x32xf32> -> vector<16x32xf32>
    %125 = arith.addf %104, %124 : vector<16x32xf32>
    %126 = vector.broadcast %15 : vector<1x32xf32> to vector<16x32xf32>
    %127 = arith.mulf %86, %126 : vector<16x32xf32>
    %cst_53 = arith.constant dense<0.000000e+00> : vector<16x16xf32>
    %128 = tpu.matmul %127, %93, %cst_53 {dimension_numbers = #tpu.dot_dimension_numbers<[1], [1], [0], [0], [0, 0, 1, 0], [], []>} : vector<16x32xf32>, vector<16x32xf32>, vector<16x16xf32> -> vector<16x16xf32>
    %129 = arith.addf %128, %51 : vector<16x16xf32>
    %cst_54 = arith.constant dense<0xFF800000> : vector<16xf32>
    %130 = vector.multi_reduction <maximumf>, %129, %cst_54 [1] : vector<16x16xf32> to vector<16xf32>
    %131 = vector.shape_cast %130 : vector<16xf32> to vector<16x1xf32>
    %132 = vector.broadcast %131 : vector<16x1xf32> to vector<16x16xf32>
    %133 = arith.subf %129, %132 : vector<16x16xf32>
    %134 = math.exp %133 : vector<16x16xf32>
    %cst_55 = arith.constant dense<0.000000e+00> : vector<16xf32>
    %135 = vector.multi_reduction <add>, %134, %cst_55 [1] : vector<16x16xf32> to vector<16xf32>
    %136 = vector.shape_cast %135 : vector<16xf32> to vector<16x1xf32>
    %137 = tpu.reciprocal %136 {approx = true} : vector<16x1xf32> -> vector<16x1xf32>
    %138 = vector.broadcast %137 : vector<16x1xf32> to vector<16x16xf32>
    %139 = arith.mulf %134, %138 : vector<16x16xf32>
    %c0_56 = arith.constant 0 : index
    %c1 = arith.constant 1 : index
    %c0_57 = arith.constant 0 : index
    %c0_58 = arith.constant 0 : index
    %140 = vector.load %arg25[%c0_56, %c1, %c0_57, %c0_58] : memref<2x4x16x16xf32, #tpu.memory_space<vmem>>, vector<1x1x16x16xf32>
    %141 = vector.shape_cast %140 : vector<1x1x16x16xf32> to vector<16x16xf32>
    %142 = vector.shape_cast %139 : vector<16x16xf32> to vector<1x1x16x16xf32>
    tpu.vector_store %arg25[%c0_56, %c1, %c0_57, %c0_58], %142 {strides = array<i32>} : memref<2x4x16x16xf32, #tpu.memory_space<vmem>>, vector<1x1x16x16xf32>,
    %143 = vector.broadcast %15 : vector<1x32xf32> to vector<16x32xf32>
    %144 = arith.mulf %100, %143 : vector<16x32xf32>
    %cst_59 = arith.constant dense<0.000000e+00> : vector<16x32xf32>
    %145 = tpu.matmul %139, %144, %cst_59 {dimension_numbers = #tpu.dot_dimension_numbers<[1], [0], [0], [1], [0, 0, 1, 1], [], []>} : vector<16x16xf32>, vector<16x32xf32>, vector<16x32xf32> -> vector<16x32xf32>
    %146 = arith.addf %125, %145 : vector<16x32xf32>
    %147 = vector.broadcast %22 : vector<1x32xf32> to vector<16x32xf32>
    %148 = arith.mulf %86, %147 : vector<16x32xf32>
    %cst_60 = arith.constant dense<0.000000e+00> : vector<16x16xf32>
    %149 = tpu.matmul %148, %93, %cst_60 {dimension_numbers = #tpu.dot_dimension_numbers<[1], [1], [0], [0], [0, 0, 1, 0], [], []>} : vector<16x32xf32>, vector<16x32xf32>, vector<16x16xf32> -> vector<16x16xf32>
    %150 = arith.addf %149, %51 : vector<16x16xf32>
    %cst_61 = arith.constant dense<0xFF800000> : vector<16xf32>
    %151 = vector.multi_reduction <maximumf>, %150, %cst_61 [1] : vector<16x16xf32> to vector<16xf32>
    %152 = vector.shape_cast %151 : vector<16xf32> to vector<16x1xf32>
    %153 = vector.broadcast %152 : vector<16x1xf32> to vector<16x16xf32>
    %154 = arith.subf %150, %153 : vector<16x16xf32>
    %155 = math.exp %154 : vector<16x16xf32>
    %cst_62 = arith.constant dense<0.000000e+00> : vector<16xf32>
    %156 = vector.multi_reduction <add>, %155, %cst_62 [1] : vector<16x16xf32> to vector<16xf32>
    %157 = vector.shape_cast %156 : vector<16xf32> to vector<16x1xf32>
    %158 = tpu.reciprocal %157 {approx = true} : vector<16x1xf32> -> vector<16x1xf32>
    %159 = vector.broadcast %158 : vector<16x1xf32> to vector<16x16xf32>
    %160 = arith.mulf %155, %159 : vector<16x16xf32>
    %c0_63 = arith.constant 0 : index
    %c2 = arith.constant 2 : index
    %c0_64 = arith.constant 0 : index
    %c0_65 = arith.constant 0 : index
    %161 = vector.load %arg25[%c0_63, %c2, %c0_64, %c0_65] : memref<2x4x16x16xf32, #tpu.memory_space<vmem>>, vector<1x1x16x16xf32>
    %162 = vector.shape_cast %161 : vector<1x1x16x16xf32> to vector<16x16xf32>
    %163 = vector.shape_cast %160 : vector<16x16xf32> to vector<1x1x16x16xf32>
    tpu.vector_store %arg25[%c0_63, %c2, %c0_64, %c0_65], %163 {strides = array<i32>} : memref<2x4x16x16xf32, #tpu.memory_space<vmem>>, vector<1x1x16x16xf32>,
    %164 = vector.broadcast %22 : vector<1x32xf32> to vector<16x32xf32>
    %165 = arith.mulf %100, %164 : vector<16x32xf32>
    %cst_66 = arith.constant dense<0.000000e+00> : vector<16x32xf32>
    %166 = tpu.matmul %160, %165, %cst_66 {dimension_numbers = #tpu.dot_dimension_numbers<[1], [0], [0], [1], [0, 0, 1, 1], [], []>} : vector<16x16xf32>, vector<16x32xf32>, vector<16x32xf32> -> vector<16x32xf32>
    %167 = arith.addf %146, %166 : vector<16x32xf32>
    %168 = vector.broadcast %29 : vector<1x32xf32> to vector<16x32xf32>
    %169 = arith.mulf %86, %168 : vector<16x32xf32>
    %cst_67 = arith.constant dense<0.000000e+00> : vector<16x16xf32>
    %170 = tpu.matmul %169, %93, %cst_67 {dimension_numbers = #tpu.dot_dimension_numbers<[1], [1], [0], [0], [0, 0, 1, 0], [], []>} : vector<16x32xf32>, vector<16x32xf32>, vector<16x16xf32> -> vector<16x16xf32>
    %171 = arith.addf %170, %51 : vector<16x16xf32>
    %cst_68 = arith.constant dense<0xFF800000> : vector<16xf32>
    %172 = vector.multi_reduction <maximumf>, %171, %cst_68 [1] : vector<16x16xf32> to vector<16xf32>
    %173 = vector.shape_cast %172 : vector<16xf32> to vector<16x1xf32>
    %174 = vector.broadcast %173 : vector<16x1xf32> to vector<16x16xf32>
    %175 = arith.subf %171, %174 : vector<16x16xf32>
    %176 = math.exp %175 : vector<16x16xf32>
    %cst_69 = arith.constant dense<0.000000e+00> : vector<16xf32>
    %177 = vector.multi_reduction <add>, %176, %cst_69 [1] : vector<16x16xf32> to vector<16xf32>
    %178 = vector.shape_cast %177 : vector<16xf32> to vector<16x1xf32>
    %179 = tpu.reciprocal %178 {approx = true} : vector<16x1xf32> -> vector<16x1xf32>
    %180 = vector.broadcast %179 : vector<16x1xf32> to vector<16x16xf32>
    %181 = arith.mulf %176, %180 : vector<16x16xf32>
    %c0_70 = arith.constant 0 : index
    %c3 = arith.constant 3 : index
    %c0_71 = arith.constant 0 : index
    %c0_72 = arith.constant 0 : index
    %182 = vector.load %arg25[%c0_70, %c3, %c0_71, %c0_72] : memref<2x4x16x16xf32, #tpu.memory_space<vmem>>, vector<1x1x16x16xf32>
    %183 = vector.shape_cast %182 : vector<1x1x16x16xf32> to vector<16x16xf32>
    %184 = vector.shape_cast %181 : vector<16x16xf32> to vector<1x1x16x16xf32>
    tpu.vector_store %arg25[%c0_70, %c3, %c0_71, %c0_72], %184 {strides = array<i32>} : memref<2x4x16x16xf32, #tpu.memory_space<vmem>>, vector<1x1x16x16xf32>,
    %185 = vector.broadcast %29 : vector<1x32xf32> to vector<16x32xf32>
    %186 = arith.mulf %100, %185 : vector<16x32xf32>
    %cst_73 = arith.constant dense<0.000000e+00> : vector<16x32xf32>
    %187 = tpu.matmul %181, %186, %cst_73 {dimension_numbers = #tpu.dot_dimension_numbers<[1], [0], [0], [1], [0, 0, 1, 1], [], []>} : vector<16x16xf32>, vector<16x32xf32>, vector<16x32xf32> -> vector<16x32xf32>
    %188 = arith.addf %167, %187 : vector<16x32xf32>
    %c0_74 = arith.constant 0 : index
    %c0_75 = arith.constant 0 : index
    %c0_76 = arith.constant 0 : index
    %189 = vector.load %arg9[%c0_74, %c0_75, %c0_76] : memref<2x32x32xf32, #tpu.memory_space<vmem>>, vector<1x32x32xf32>
    %190 = vector.shape_cast %189 : vector<1x32x32xf32> to vector<32x32xf32>
    %cst_77 = arith.constant dense<0.000000e+00> : vector<16x32xf32>
    %191 = tpu.matmul %188, %190, %cst_77 {dimension_numbers = #tpu.dot_dimension_numbers<[1], [0], [0], [1], [0, 0, 1, 1], [], []>} : vector<16x32xf32>, vector<32x32xf32>, vector<16x32xf32> -> vector<16x32xf32>
    %c0_78 = arith.constant 0 : index
    %c0_79 = arith.constant 0 : index
    %c0_80 = arith.constant 0 : index
    %192 = vector.load %arg10[%c0_78, %c0_79, %c0_80] : memref<2x1x32xf32, #tpu.memory_space<vmem>>, vector<1x1x32xf32>
    %193 = vector.shape_cast %192 : vector<1x1x32xf32> to vector<1x32xf32>
    %194 = vector.broadcast %193 : vector<1x32xf32> to vector<16x32xf32>
    %195 = arith.addf %191, %194 : vector<16x32xf32>
    %196 = arith.addf %0, %195 : vector<16x32xf32>
    %c0_81 = arith.constant 0 : index
    %c0_82 = arith.constant 0 : index
    %c0_83 = arith.constant 0 : index
    %197 = vector.load %arg11[%c0_81, %c0_82, %c0_83] : memref<2x1x32xf32, #tpu.memory_space<vmem>>, vector<1x1x32xf32>
    %198 = vector.shape_cast %197 : vector<1x1x32xf32> to vector<1x32xf32>
    %c0_84 = arith.constant 0 : index
    %c0_85 = arith.constant 0 : index
    %c0_86 = arith.constant 0 : index
    %199 = vector.load %arg12[%c0_84, %c0_85, %c0_86] : memref<2x1x32xf32, #tpu.memory_space<vmem>>, vector<1x1x32xf32>
    %200 = vector.shape_cast %199 : vector<1x1x32xf32> to vector<1x32xf32>
    %cst_87 = arith.constant dense<0.000000e+00> : vector<16xf32>
    %201 = vector.multi_reduction <add>, %196, %cst_87 [1] : vector<16x32xf32> to vector<16xf32>
    %202 = vector.shape_cast %201 : vector<16xf32> to vector<16x1xf32>
    %cst_88 = arith.constant 3.200000e+01 : f32
    %203 = vector.broadcast %cst_88 : f32 to vector<16x1xf32>
    %204 = arith.divf %202, %203 : vector<16x1xf32>
    %205 = vector.broadcast %204 : vector<16x1xf32> to vector<16x32xf32>
    %206 = arith.subf %196, %205 : vector<16x32xf32>
    %207 = arith.mulf %206, %206 : vector<16x32xf32>
    %cst_89 = arith.constant dense<0.000000e+00> : vector<16xf32>
    %208 = vector.multi_reduction <add>, %207, %cst_89 [1] : vector<16x32xf32> to vector<16xf32>
    %209 = vector.shape_cast %208 : vector<16xf32> to vector<16x1xf32>
    %cst_90 = arith.constant 3.200000e+01 : f32
    %210 = vector.broadcast %cst_90 : f32 to vector<16x1xf32>
    %211 = arith.divf %209, %210 : vector<16x1xf32>
    %212 = vector.broadcast %204 : vector<16x1xf32> to vector<16x32xf32>
    %213 = arith.subf %196, %212 : vector<16x32xf32>
    %cst_91 = arith.constant 9.99999974E-6 : f32
    %214 = vector.broadcast %cst_91 : f32 to vector<16x1xf32>
    %215 = arith.addf %211, %214 : vector<16x1xf32>
    %216 = math.rsqrt %215 : vector<16x1xf32>
    %217 = vector.broadcast %216 : vector<16x1xf32> to vector<16x32xf32>
    %218 = arith.mulf %213, %217 : vector<16x32xf32>
    %219 = vector.broadcast %198 : vector<1x32xf32> to vector<16x32xf32>
    %220 = arith.mulf %218, %219 : vector<16x32xf32>
    %221 = vector.broadcast %200 : vector<1x32xf32> to vector<16x32xf32>
    %222 = arith.addf %220, %221 : vector<16x32xf32>
    %c0_92 = arith.constant 0 : index
    %c0_93 = arith.constant 0 : index
    %c0_94 = arith.constant 0 : index
    %223 = vector.load %arg13[%c0_92, %c0_93, %c0_94] : memref<2x32x2xf32, #tpu.memory_space<vmem>>, vector<1x32x2xf32>
    %224 = vector.shape_cast %223 : vector<1x32x2xf32> to vector<32x2xf32>
    %cst_95 = arith.constant dense<0.000000e+00> : vector<16x2xf32>
    %225 = tpu.matmul %222, %224, %cst_95 {dimension_numbers = #tpu.dot_dimension_numbers<[1], [0], [0], [1], [0, 0, 1, 1], [], []>} : vector<16x32xf32>, vector<32x2xf32>, vector<16x2xf32> -> vector<16x2xf32>
    %c0_96 = arith.constant 0 : index
    %c0_97 = arith.constant 0 : index
    %c0_98 = arith.constant 0 : index
    %226 = vector.load %arg14[%c0_96, %c0_97, %c0_98] : memref<2x1x2xf32, #tpu.memory_space<vmem>>, vector<1x1x2xf32>
    %227 = vector.shape_cast %226 : vector<1x1x2xf32> to vector<1x2xf32>
    %228 = vector.broadcast %227 : vector<1x2xf32> to vector<16x2xf32>
    %229 = arith.addf %225, %228 : vector<16x2xf32>
    %cst_99 = arith.constant dense<0xFF800000> : vector<16xf32>
    %230 = vector.multi_reduction <maximumf>, %229, %cst_99 [1] : vector<16x2xf32> to vector<16xf32>
    %231 = vector.shape_cast %230 : vector<16xf32> to vector<16x1xf32>
    %232 = vector.broadcast %231 : vector<16x1xf32> to vector<16x2xf32>
    %233 = arith.subf %229, %232 : vector<16x2xf32>
    %234 = math.exp %233 : vector<16x2xf32>
    %cst_100 = arith.constant dense<0.000000e+00> : vector<16xf32>
    %235 = vector.multi_reduction <add>, %234, %cst_100 [1] : vector<16x2xf32> to vector<16xf32>
    %236 = vector.shape_cast %235 : vector<16xf32> to vector<16x1xf32>
    %237 = vector.broadcast %236 : vector<16x1xf32> to vector<16x2xf32>
    %238 = arith.divf %234, %237 : vector<16x2xf32>
    %cst_101 = arith.constant dense<0xFF800000> : vector<16xf32>
    %239 = vector.multi_reduction <maximumf>, %238, %cst_101 [1] : vector<16x2xf32> to vector<16xf32>
    %240 = vector.shape_cast %239 : vector<16xf32> to vector<16x1xf32>
    %241 = vector.broadcast %240 : vector<16x1xf32> to vector<16x2xf32>
    %242 = arith.cmpf oge, %238, %241 : vector<16x2xf32>
    %c2_i32 = arith.constant 2 : i32
    %243 = vector.broadcast %c2_i32 : i32 to vector<16x2xi32>
    %244 = arith.select %242, %52, %243 : vector<16x2xi1>, vector<16x2xi32>
    %cst_102 = arith.constant dense<2147483647> : vector<16xi32>
    %245 = vector.multi_reduction <minsi>, %244, %cst_102 [1] : vector<16x2xi32> to vector<16xi32>
    %246 = vector.shape_cast %245 : vector<16xi32> to vector<16x1xi32>
    %247 = vector.broadcast %246 : vector<16x1xi32> to vector<16x2xi32>
    %248 = arith.cmpi eq, %52, %247 : vector<16x2xi32>
    %249 = arith.extui %248 : vector<16x2xi1> to vector<16x2xi32>
    %250 = arith.sitofp %249 : vector<16x2xi32> to vector<16x2xf32>
    %c0_103 = arith.constant 0 : index
    %c0_104 = arith.constant 0 : index
    %c0_105 = arith.constant 0 : index
    %251 = vector.load %arg15[%c0_103, %c0_104, %c0_105] : memref<2x32x128xf32, #tpu.memory_space<vmem>>, vector<1x32x128xf32>
    %252 = vector.shape_cast %251 : vector<1x32x128xf32> to vector<32x128xf32>
    %cst_106 = arith.constant dense<0.000000e+00> : vector<16x128xf32>
    %253 = tpu.matmul %222, %252, %cst_106 {dimension_numbers = #tpu.dot_dimension_numbers<[1], [0], [0], [1], [0, 0, 1, 1], [], []>} : vector<16x32xf32>, vector<32x128xf32>, vector<16x128xf32> -> vector<16x128xf32>
    %c0_107 = arith.constant 0 : index
    %c0_108 = arith.constant 0 : index
    %c0_109 = arith.constant 0 : index
    %254 = vector.load %arg16[%c0_107, %c0_108, %c0_109] : memref<2x1x128xf32, #tpu.memory_space<vmem>>, vector<1x1x128xf32>
    %255 = vector.shape_cast %254 : vector<1x1x128xf32> to vector<1x128xf32>
    %256 = vector.broadcast %255 : vector<1x128xf32> to vector<16x128xf32>
    %257 = arith.addf %253, %256 : vector<16x128xf32>
    %cst_110 = arith.constant 0.000000e+00 : f32
    %258 = vector.broadcast %cst_110 : f32 to vector<16x128xf32>
    %259 = arith.maximumf %257, %258 : vector<16x128xf32>
    %c64_i32 = arith.constant 64 : i32
    %260 = vector.broadcast %c64_i32 : i32 to vector<16x1xi32>
    %261 = arith.muli %246, %260 : vector<16x1xi32>
    %262 = vector.broadcast %261 : vector<16x1xi32> to vector<16x128xi32>
    %263 = arith.cmpi sge, %53, %262 : vector<16x128xi32>
    %c64_i32_111 = arith.constant 64 : i32
    %264 = vector.broadcast %c64_i32_111 : i32 to vector<16x1xi32>
    %265 = arith.addi %261, %264 : vector<16x1xi32>
    %266 = vector.broadcast %265 : vector<16x1xi32> to vector<16x128xi32>
    %267 = arith.cmpi slt, %53, %266 : vector<16x128xi32>
    %268 = arith.andi %263, %267 : vector<16x128xi1>
    %269 = arith.extui %268 : vector<16x128xi1> to vector<16x128xi32>
    %270 = arith.sitofp %269 : vector<16x128xi32> to vector<16x128xf32>
    %271 = arith.mulf %259, %270 : vector<16x128xf32>
    %c0_112 = arith.constant 0 : index
    %c0_113 = arith.constant 0 : index
    %c0_114 = arith.constant 0 : index
    %272 = vector.load %arg17[%c0_112, %c0_113, %c0_114] : memref<2x128x32xf32, #tpu.memory_space<vmem>>, vector<1x128x32xf32>
    %273 = vector.shape_cast %272 : vector<1x128x32xf32> to vector<128x32xf32>
    %cst_115 = arith.constant dense<0.000000e+00> : vector<16x32xf32>
    %274 = tpu.matmul %271, %273, %cst_115 {dimension_numbers = #tpu.dot_dimension_numbers<[1], [0], [0], [1], [0, 0, 1, 1], [], []>} : vector<16x128xf32>, vector<128x32xf32>, vector<16x32xf32> -> vector<16x32xf32>
    %c0_116 = arith.constant 0 : index
    %c0_117 = arith.constant 0 : index
    %c0_118 = arith.constant 0 : index
    %275 = vector.load %arg18[%c0_116, %c0_117, %c0_118] : memref<2x2x32xf32, #tpu.memory_space<vmem>>, vector<1x2x32xf32>
    %276 = vector.shape_cast %275 : vector<1x2x32xf32> to vector<2x32xf32>
    %cst_119 = arith.constant dense<0.000000e+00> : vector<16x32xf32>
    %277 = tpu.matmul %250, %276, %cst_119 {dimension_numbers = #tpu.dot_dimension_numbers<[1], [0], [0], [1], [0, 0, 1, 1], [], []>} : vector<16x2xf32>, vector<2x32xf32>, vector<16x32xf32> -> vector<16x32xf32>
    %278 = arith.addf %274, %277 : vector<16x32xf32>
    %279 = vector.broadcast %240 : vector<16x1xf32> to vector<16x32xf32>
    %280 = arith.mulf %278, %279 : vector<16x32xf32>
    %281 = arith.addf %196, %280 : vector<16x32xf32>
    %cst_120 = arith.constant dense<0.000000e+00> : vector<2xf32>
    %282 = vector.multi_reduction <add>, %250, %cst_120 [0] : vector<16x2xf32> to vector<2xf32>
    %283 = vector.shape_cast %282 : vector<2xf32> to vector<1x2xf32>
    %cst_121 = arith.constant dense<0.000000e+00> : vector<2xf32>
    %284 = vector.multi_reduction <add>, %238, %cst_121 [0] : vector<16x2xf32> to vector<2xf32>
    %285 = vector.shape_cast %284 : vector<2xf32> to vector<1x2xf32>
    %286 = tpu.concatenate %283, %285 in 1 : vector<1x2xf32>, vector<1x2xf32> -> vector<1x4xf32>
    %c0_122 = arith.constant 0 : index
    %c0_123 = arith.constant 0 : index
    %c0_124 = arith.constant 0 : index
    %287 = vector.load %arg27[%c0_122, %c0_123, %c0_124] : memref<2x1x4xf32, #tpu.memory_space<vmem>>, vector<1x1x4xf32>
    %288 = vector.shape_cast %287 : vector<1x1x4xf32> to vector<1x4xf32>
    %289 = vector.shape_cast %286 : vector<1x4xf32> to vector<1x1x4xf32>
    tpu.vector_store %arg27[%c0_122, %c0_123, %c0_124], %289 {strides = array<i32>} : memref<2x1x4xf32, #tpu.memory_space<vmem>>, vector<1x1x4xf32>,
    %c1_125 = arith.constant 1 : index
    %c0_126 = arith.constant 0 : index
    %c0_127 = arith.constant 0 : index
    %290 = vector.load %arg1[%c1_125, %c0_126, %c0_127] : memref<2x1x32xf32, #tpu.memory_space<vmem>>, vector<1x1x32xf32>
    %291 = vector.shape_cast %290 : vector<1x1x32xf32> to vector<1x32xf32>
    %c1_128 = arith.constant 1 : index
    %c0_129 = arith.constant 0 : index
    %c0_130 = arith.constant 0 : index
    %292 = vector.load %arg2[%c1_128, %c0_129, %c0_130] : memref<2x1x32xf32, #tpu.memory_space<vmem>>, vector<1x1x32xf32>
    %293 = vector.shape_cast %292 : vector<1x1x32xf32> to vector<1x32xf32>
    %cst_131 = arith.constant dense<0.000000e+00> : vector<16xf32>
    %294 = vector.multi_reduction <add>, %281, %cst_131 [1] : vector<16x32xf32> to vector<16xf32>
    %295 = vector.shape_cast %294 : vector<16xf32> to vector<16x1xf32>
    %cst_132 = arith.constant 3.200000e+01 : f32
    %296 = vector.broadcast %cst_132 : f32 to vector<16x1xf32>
    %297 = arith.divf %295, %296 : vector<16x1xf32>
    %298 = vector.broadcast %297 : vector<16x1xf32> to vector<16x32xf32>
    %299 = arith.subf %281, %298 : vector<16x32xf32>
    %300 = arith.mulf %299, %299 : vector<16x32xf32>
    %cst_133 = arith.constant dense<0.000000e+00> : vector<16xf32>
    %301 = vector.multi_reduction <add>, %300, %cst_133 [1] : vector<16x32xf32> to vector<16xf32>
    %302 = vector.shape_cast %301 : vector<16xf32> to vector<16x1xf32>
    %cst_134 = arith.constant 3.200000e+01 : f32
    %303 = vector.broadcast %cst_134 : f32 to vector<16x1xf32>
    %304 = arith.divf %302, %303 : vector<16x1xf32>
    %305 = vector.broadcast %297 : vector<16x1xf32> to vector<16x32xf32>
    %306 = arith.subf %281, %305 : vector<16x32xf32>
    %cst_135 = arith.constant 9.99999974E-6 : f32
    %307 = vector.broadcast %cst_135 : f32 to vector<16x1xf32>
    %308 = arith.addf %304, %307 : vector<16x1xf32>
    %309 = math.rsqrt %308 : vector<16x1xf32>
    %310 = vector.broadcast %309 : vector<16x1xf32> to vector<16x32xf32>
    %311 = arith.mulf %306, %310 : vector<16x32xf32>
    %312 = vector.broadcast %291 : vector<1x32xf32> to vector<16x32xf32>
    %313 = arith.mulf %311, %312 : vector<16x32xf32>
    %314 = vector.broadcast %293 : vector<1x32xf32> to vector<16x32xf32>
    %315 = arith.addf %313, %314 : vector<16x32xf32>
    %c1_136 = arith.constant 1 : index
    %c0_137 = arith.constant 0 : index
    %c0_138 = arith.constant 0 : index
    %316 = vector.load %arg3[%c1_136, %c0_137, %c0_138] : memref<2x32x32xf32, #tpu.memory_space<vmem>>, vector<1x32x32xf32>
    %317 = vector.shape_cast %316 : vector<1x32x32xf32> to vector<32x32xf32>
    %cst_139 = arith.constant dense<0.000000e+00> : vector<16x32xf32>
    %318 = tpu.matmul %315, %317, %cst_139 {dimension_numbers = #tpu.dot_dimension_numbers<[1], [0], [0], [1], [0, 0, 1, 1], [], []>} : vector<16x32xf32>, vector<32x32xf32>, vector<16x32xf32> -> vector<16x32xf32>
    %c1_140 = arith.constant 1 : index
    %c0_141 = arith.constant 0 : index
    %c0_142 = arith.constant 0 : index
    %319 = vector.load %arg4[%c1_140, %c0_141, %c0_142] : memref<2x1x32xf32, #tpu.memory_space<vmem>>, vector<1x1x32xf32>
    %320 = vector.shape_cast %319 : vector<1x1x32xf32> to vector<1x32xf32>
    %321 = vector.broadcast %320 : vector<1x32xf32> to vector<16x32xf32>
    %322 = arith.addf %318, %321 : vector<16x32xf32>
    %c1_143 = arith.constant 1 : index
    %c0_144 = arith.constant 0 : index
    %c0_145 = arith.constant 0 : index
    %323 = vector.load %arg5[%c1_143, %c0_144, %c0_145] : memref<2x32x32xf32, #tpu.memory_space<vmem>>, vector<1x32x32xf32>
    %324 = vector.shape_cast %323 : vector<1x32x32xf32> to vector<32x32xf32>
    %cst_146 = arith.constant dense<0.000000e+00> : vector<16x32xf32>
    %325 = tpu.matmul %315, %324, %cst_146 {dimension_numbers = #tpu.dot_dimension_numbers<[1], [0], [0], [1], [0, 0, 1, 1], [], []>} : vector<16x32xf32>, vector<32x32xf32>, vector<16x32xf32> -> vector<16x32xf32>
    %c1_147 = arith.constant 1 : index
    %c0_148 = arith.constant 0 : index
    %c0_149 = arith.constant 0 : index
    %326 = vector.load %arg6[%c1_147, %c0_148, %c0_149] : memref<2x1x32xf32, #tpu.memory_space<vmem>>, vector<1x1x32xf32>
    %327 = vector.shape_cast %326 : vector<1x1x32xf32> to vector<1x32xf32>
    %328 = vector.broadcast %327 : vector<1x32xf32> to vector<16x32xf32>
    %329 = arith.addf %325, %328 : vector<16x32xf32>
    %c1_150 = arith.constant 1 : index
    %c0_151 = arith.constant 0 : index
    %c0_152 = arith.constant 0 : index
    %330 = vector.load %arg7[%c1_150, %c0_151, %c0_152] : memref<2x32x32xf32, #tpu.memory_space<vmem>>, vector<1x32x32xf32>
    %331 = vector.shape_cast %330 : vector<1x32x32xf32> to vector<32x32xf32>
    %cst_153 = arith.constant dense<0.000000e+00> : vector<16x32xf32>
    %332 = tpu.matmul %315, %331, %cst_153 {dimension_numbers = #tpu.dot_dimension_numbers<[1], [0], [0], [1], [0, 0, 1, 1], [], []>} : vector<16x32xf32>, vector<32x32xf32>, vector<16x32xf32> -> vector<16x32xf32>
    %c1_154 = arith.constant 1 : index
    %c0_155 = arith.constant 0 : index
    %c0_156 = arith.constant 0 : index
    %333 = vector.load %arg8[%c1_154, %c0_155, %c0_156] : memref<2x1x32xf32, #tpu.memory_space<vmem>>, vector<1x1x32xf32>
    %334 = vector.shape_cast %333 : vector<1x1x32xf32> to vector<1x32xf32>
    %335 = vector.broadcast %334 : vector<1x32xf32> to vector<16x32xf32>
    %336 = arith.addf %332, %335 : vector<16x32xf32>
    %c1_157 = arith.constant 1 : index
    %c0_158 = arith.constant 0 : index
    %c0_159 = arith.constant 0 : index
    %337 = vector.load %arg26[%c1_157, %c0_158, %c0_159] : memref<2x16x32xf32, #tpu.memory_space<vmem>>, vector<1x16x32xf32>
    %338 = vector.shape_cast %337 : vector<1x16x32xf32> to vector<16x32xf32>
    %339 = vector.shape_cast %336 : vector<16x32xf32> to vector<1x16x32xf32>
    tpu.vector_store %arg26[%c1_157, %c0_158, %c0_159], %339 {strides = array<i32>} : memref<2x16x32xf32, #tpu.memory_space<vmem>>, vector<1x16x32xf32>,
    %cst_160 = arith.constant 0.000000e+00 : f32
    %340 = vector.broadcast %cst_160 : f32 to vector<16x32xf32>
    %341 = vector.broadcast %8 : vector<1x32xf32> to vector<16x32xf32>
    %342 = arith.mulf %322, %341 : vector<16x32xf32>
    %cst_161 = arith.constant dense<0.000000e+00> : vector<16x16xf32>
    %343 = tpu.matmul %342, %329, %cst_161 {dimension_numbers = #tpu.dot_dimension_numbers<[1], [1], [0], [0], [0, 0, 1, 0], [], []>} : vector<16x32xf32>, vector<16x32xf32>, vector<16x16xf32> -> vector<16x16xf32>
    %344 = arith.addf %343, %51 : vector<16x16xf32>
    %cst_162 = arith.constant dense<0xFF800000> : vector<16xf32>
    %345 = vector.multi_reduction <maximumf>, %344, %cst_162 [1] : vector<16x16xf32> to vector<16xf32>
    %346 = vector.shape_cast %345 : vector<16xf32> to vector<16x1xf32>
    %347 = vector.broadcast %346 : vector<16x1xf32> to vector<16x16xf32>
    %348 = arith.subf %344, %347 : vector<16x16xf32>
    %349 = math.exp %348 : vector<16x16xf32>
    %cst_163 = arith.constant dense<0.000000e+00> : vector<16xf32>
    %350 = vector.multi_reduction <add>, %349, %cst_163 [1] : vector<16x16xf32> to vector<16xf32>
    %351 = vector.shape_cast %350 : vector<16xf32> to vector<16x1xf32>
    %352 = tpu.reciprocal %351 {approx = true} : vector<16x1xf32> -> vector<16x1xf32>
    %353 = vector.broadcast %352 : vector<16x1xf32> to vector<16x16xf32>
    %354 = arith.mulf %349, %353 : vector<16x16xf32>
    %c1_164 = arith.constant 1 : index
    %c0_165 = arith.constant 0 : index
    %c0_166 = arith.constant 0 : index
    %c0_167 = arith.constant 0 : index
    %355 = vector.load %arg25[%c1_164, %c0_165, %c0_166, %c0_167] : memref<2x4x16x16xf32, #tpu.memory_space<vmem>>, vector<1x1x16x16xf32>
    %356 = vector.shape_cast %355 : vector<1x1x16x16xf32> to vector<16x16xf32>
    %357 = vector.shape_cast %354 : vector<16x16xf32> to vector<1x1x16x16xf32>
    tpu.vector_store %arg25[%c1_164, %c0_165, %c0_166, %c0_167], %357 {strides = array<i32>} : memref<2x4x16x16xf32, #tpu.memory_space<vmem>>, vector<1x1x16x16xf32>,
    %358 = vector.broadcast %8 : vector<1x32xf32> to vector<16x32xf32>
    %359 = arith.mulf %336, %358 : vector<16x32xf32>
    %cst_168 = arith.constant dense<0.000000e+00> : vector<16x32xf32>
    %360 = tpu.matmul %354, %359, %cst_168 {dimension_numbers = #tpu.dot_dimension_numbers<[1], [0], [0], [1], [0, 0, 1, 1], [], []>} : vector<16x16xf32>, vector<16x32xf32>, vector<16x32xf32> -> vector<16x32xf32>
    %361 = arith.addf %340, %360 : vector<16x32xf32>
    %362 = vector.broadcast %15 : vector<1x32xf32> to vector<16x32xf32>
    %363 = arith.mulf %322, %362 : vector<16x32xf32>
    %cst_169 = arith.constant dense<0.000000e+00> : vector<16x16xf32>
    %364 = tpu.matmul %363, %329, %cst_169 {dimension_numbers = #tpu.dot_dimension_numbers<[1], [1], [0], [0], [0, 0, 1, 0], [], []>} : vector<16x32xf32>, vector<16x32xf32>, vector<16x16xf32> -> vector<16x16xf32>
    %365 = arith.addf %364, %51 : vector<16x16xf32>
    %cst_170 = arith.constant dense<0xFF800000> : vector<16xf32>
    %366 = vector.multi_reduction <maximumf>, %365, %cst_170 [1] : vector<16x16xf32> to vector<16xf32>
    %367 = vector.shape_cast %366 : vector<16xf32> to vector<16x1xf32>
    %368 = vector.broadcast %367 : vector<16x1xf32> to vector<16x16xf32>
    %369 = arith.subf %365, %368 : vector<16x16xf32>
    %370 = math.exp %369 : vector<16x16xf32>
    %cst_171 = arith.constant dense<0.000000e+00> : vector<16xf32>
    %371 = vector.multi_reduction <add>, %370, %cst_171 [1] : vector<16x16xf32> to vector<16xf32>
    %372 = vector.shape_cast %371 : vector<16xf32> to vector<16x1xf32>
    %373 = tpu.reciprocal %372 {approx = true} : vector<16x1xf32> -> vector<16x1xf32>
    %374 = vector.broadcast %373 : vector<16x1xf32> to vector<16x16xf32>
    %375 = arith.mulf %370, %374 : vector<16x16xf32>
    %c1_172 = arith.constant 1 : index
    %c1_173 = arith.constant 1 : index
    %c0_174 = arith.constant 0 : index
    %c0_175 = arith.constant 0 : index
    %376 = vector.load %arg25[%c1_172, %c1_173, %c0_174, %c0_175] : memref<2x4x16x16xf32, #tpu.memory_space<vmem>>, vector<1x1x16x16xf32>
    %377 = vector.shape_cast %376 : vector<1x1x16x16xf32> to vector<16x16xf32>
    %378 = vector.shape_cast %375 : vector<16x16xf32> to vector<1x1x16x16xf32>
    tpu.vector_store %arg25[%c1_172, %c1_173, %c0_174, %c0_175], %378 {strides = array<i32>} : memref<2x4x16x16xf32, #tpu.memory_space<vmem>>, vector<1x1x16x16xf32>,
    %379 = vector.broadcast %15 : vector<1x32xf32> to vector<16x32xf32>
    %380 = arith.mulf %336, %379 : vector<16x32xf32>
    %cst_176 = arith.constant dense<0.000000e+00> : vector<16x32xf32>
    %381 = tpu.matmul %375, %380, %cst_176 {dimension_numbers = #tpu.dot_dimension_numbers<[1], [0], [0], [1], [0, 0, 1, 1], [], []>} : vector<16x16xf32>, vector<16x32xf32>, vector<16x32xf32> -> vector<16x32xf32>
    %382 = arith.addf %361, %381 : vector<16x32xf32>
    %383 = vector.broadcast %22 : vector<1x32xf32> to vector<16x32xf32>
    %384 = arith.mulf %322, %383 : vector<16x32xf32>
    %cst_177 = arith.constant dense<0.000000e+00> : vector<16x16xf32>
    %385 = tpu.matmul %384, %329, %cst_177 {dimension_numbers = #tpu.dot_dimension_numbers<[1], [1], [0], [0], [0, 0, 1, 0], [], []>} : vector<16x32xf32>, vector<16x32xf32>, vector<16x16xf32> -> vector<16x16xf32>
    %386 = arith.addf %385, %51 : vector<16x16xf32>
    %cst_178 = arith.constant dense<0xFF800000> : vector<16xf32>
    %387 = vector.multi_reduction <maximumf>, %386, %cst_178 [1] : vector<16x16xf32> to vector<16xf32>
    %388 = vector.shape_cast %387 : vector<16xf32> to vector<16x1xf32>
    %389 = vector.broadcast %388 : vector<16x1xf32> to vector<16x16xf32>
    %390 = arith.subf %386, %389 : vector<16x16xf32>
    %391 = math.exp %390 : vector<16x16xf32>
    %cst_179 = arith.constant dense<0.000000e+00> : vector<16xf32>
    %392 = vector.multi_reduction <add>, %391, %cst_179 [1] : vector<16x16xf32> to vector<16xf32>
    %393 = vector.shape_cast %392 : vector<16xf32> to vector<16x1xf32>
    %394 = tpu.reciprocal %393 {approx = true} : vector<16x1xf32> -> vector<16x1xf32>
    %395 = vector.broadcast %394 : vector<16x1xf32> to vector<16x16xf32>
    %396 = arith.mulf %391, %395 : vector<16x16xf32>
    %c1_180 = arith.constant 1 : index
    %c2_181 = arith.constant 2 : index
    %c0_182 = arith.constant 0 : index
    %c0_183 = arith.constant 0 : index
    %397 = vector.load %arg25[%c1_180, %c2_181, %c0_182, %c0_183] : memref<2x4x16x16xf32, #tpu.memory_space<vmem>>, vector<1x1x16x16xf32>
    %398 = vector.shape_cast %397 : vector<1x1x16x16xf32> to vector<16x16xf32>
    %399 = vector.shape_cast %396 : vector<16x16xf32> to vector<1x1x16x16xf32>
    tpu.vector_store %arg25[%c1_180, %c2_181, %c0_182, %c0_183], %399 {strides = array<i32>} : memref<2x4x16x16xf32, #tpu.memory_space<vmem>>, vector<1x1x16x16xf32>,
    %400 = vector.broadcast %22 : vector<1x32xf32> to vector<16x32xf32>
    %401 = arith.mulf %336, %400 : vector<16x32xf32>
    %cst_184 = arith.constant dense<0.000000e+00> : vector<16x32xf32>
    %402 = tpu.matmul %396, %401, %cst_184 {dimension_numbers = #tpu.dot_dimension_numbers<[1], [0], [0], [1], [0, 0, 1, 1], [], []>} : vector<16x16xf32>, vector<16x32xf32>, vector<16x32xf32> -> vector<16x32xf32>
    %403 = arith.addf %382, %402 : vector<16x32xf32>
    %404 = vector.broadcast %29 : vector<1x32xf32> to vector<16x32xf32>
    %405 = arith.mulf %322, %404 : vector<16x32xf32>
    %cst_185 = arith.constant dense<0.000000e+00> : vector<16x16xf32>
    %406 = tpu.matmul %405, %329, %cst_185 {dimension_numbers = #tpu.dot_dimension_numbers<[1], [1], [0], [0], [0, 0, 1, 0], [], []>} : vector<16x32xf32>, vector<16x32xf32>, vector<16x16xf32> -> vector<16x16xf32>
    %407 = arith.addf %406, %51 : vector<16x16xf32>
    %cst_186 = arith.constant dense<0xFF800000> : vector<16xf32>
    %408 = vector.multi_reduction <maximumf>, %407, %cst_186 [1] : vector<16x16xf32> to vector<16xf32>
    %409 = vector.shape_cast %408 : vector<16xf32> to vector<16x1xf32>
    %410 = vector.broadcast %409 : vector<16x1xf32> to vector<16x16xf32>
    %411 = arith.subf %407, %410 : vector<16x16xf32>
    %412 = math.exp %411 : vector<16x16xf32>
    %cst_187 = arith.constant dense<0.000000e+00> : vector<16xf32>
    %413 = vector.multi_reduction <add>, %412, %cst_187 [1] : vector<16x16xf32> to vector<16xf32>
    %414 = vector.shape_cast %413 : vector<16xf32> to vector<16x1xf32>
    %415 = tpu.reciprocal %414 {approx = true} : vector<16x1xf32> -> vector<16x1xf32>
    %416 = vector.broadcast %415 : vector<16x1xf32> to vector<16x16xf32>
    %417 = arith.mulf %412, %416 : vector<16x16xf32>
    %c1_188 = arith.constant 1 : index
    %c3_189 = arith.constant 3 : index
    %c0_190 = arith.constant 0 : index
    %c0_191 = arith.constant 0 : index
    %418 = vector.load %arg25[%c1_188, %c3_189, %c0_190, %c0_191] : memref<2x4x16x16xf32, #tpu.memory_space<vmem>>, vector<1x1x16x16xf32>
    %419 = vector.shape_cast %418 : vector<1x1x16x16xf32> to vector<16x16xf32>
    %420 = vector.shape_cast %417 : vector<16x16xf32> to vector<1x1x16x16xf32>
    tpu.vector_store %arg25[%c1_188, %c3_189, %c0_190, %c0_191], %420 {strides = array<i32>} : memref<2x4x16x16xf32, #tpu.memory_space<vmem>>, vector<1x1x16x16xf32>,
    %421 = vector.broadcast %29 : vector<1x32xf32> to vector<16x32xf32>
    %422 = arith.mulf %336, %421 : vector<16x32xf32>
    %cst_192 = arith.constant dense<0.000000e+00> : vector<16x32xf32>
    %423 = tpu.matmul %417, %422, %cst_192 {dimension_numbers = #tpu.dot_dimension_numbers<[1], [0], [0], [1], [0, 0, 1, 1], [], []>} : vector<16x16xf32>, vector<16x32xf32>, vector<16x32xf32> -> vector<16x32xf32>
    %424 = arith.addf %403, %423 : vector<16x32xf32>
    %c1_193 = arith.constant 1 : index
    %c0_194 = arith.constant 0 : index
    %c0_195 = arith.constant 0 : index
    %425 = vector.load %arg9[%c1_193, %c0_194, %c0_195] : memref<2x32x32xf32, #tpu.memory_space<vmem>>, vector<1x32x32xf32>
    %426 = vector.shape_cast %425 : vector<1x32x32xf32> to vector<32x32xf32>
    %cst_196 = arith.constant dense<0.000000e+00> : vector<16x32xf32>
    %427 = tpu.matmul %424, %426, %cst_196 {dimension_numbers = #tpu.dot_dimension_numbers<[1], [0], [0], [1], [0, 0, 1, 1], [], []>} : vector<16x32xf32>, vector<32x32xf32>, vector<16x32xf32> -> vector<16x32xf32>
    %c1_197 = arith.constant 1 : index
    %c0_198 = arith.constant 0 : index
    %c0_199 = arith.constant 0 : index
    %428 = vector.load %arg10[%c1_197, %c0_198, %c0_199] : memref<2x1x32xf32, #tpu.memory_space<vmem>>, vector<1x1x32xf32>
    %429 = vector.shape_cast %428 : vector<1x1x32xf32> to vector<1x32xf32>
    %430 = vector.broadcast %429 : vector<1x32xf32> to vector<16x32xf32>
    %431 = arith.addf %427, %430 : vector<16x32xf32>
    %432 = arith.addf %281, %431 : vector<16x32xf32>
    %c1_200 = arith.constant 1 : index
    %c0_201 = arith.constant 0 : index
    %c0_202 = arith.constant 0 : index
    %433 = vector.load %arg11[%c1_200, %c0_201, %c0_202] : memref<2x1x32xf32, #tpu.memory_space<vmem>>, vector<1x1x32xf32>
    %434 = vector.shape_cast %433 : vector<1x1x32xf32> to vector<1x32xf32>
    %c1_203 = arith.constant 1 : index
    %c0_204 = arith.constant 0 : index
    %c0_205 = arith.constant 0 : index
    %435 = vector.load %arg12[%c1_203, %c0_204, %c0_205] : memref<2x1x32xf32, #tpu.memory_space<vmem>>, vector<1x1x32xf32>
    %436 = vector.shape_cast %435 : vector<1x1x32xf32> to vector<1x32xf32>
    %cst_206 = arith.constant dense<0.000000e+00> : vector<16xf32>
    %437 = vector.multi_reduction <add>, %432, %cst_206 [1] : vector<16x32xf32> to vector<16xf32>
    %438 = vector.shape_cast %437 : vector<16xf32> to vector<16x1xf32>
    %cst_207 = arith.constant 3.200000e+01 : f32
    %439 = vector.broadcast %cst_207 : f32 to vector<16x1xf32>
    %440 = arith.divf %438, %439 : vector<16x1xf32>
    %441 = vector.broadcast %440 : vector<16x1xf32> to vector<16x32xf32>
    %442 = arith.subf %432, %441 : vector<16x32xf32>
    %443 = arith.mulf %442, %442 : vector<16x32xf32>
    %cst_208 = arith.constant dense<0.000000e+00> : vector<16xf32>
    %444 = vector.multi_reduction <add>, %443, %cst_208 [1] : vector<16x32xf32> to vector<16xf32>
    %445 = vector.shape_cast %444 : vector<16xf32> to vector<16x1xf32>
    %cst_209 = arith.constant 3.200000e+01 : f32
    %446 = vector.broadcast %cst_209 : f32 to vector<16x1xf32>
    %447 = arith.divf %445, %446 : vector<16x1xf32>
    %448 = vector.broadcast %440 : vector<16x1xf32> to vector<16x32xf32>
    %449 = arith.subf %432, %448 : vector<16x32xf32>
    %cst_210 = arith.constant 9.99999974E-6 : f32
    %450 = vector.broadcast %cst_210 : f32 to vector<16x1xf32>
    %451 = arith.addf %447, %450 : vector<16x1xf32>
    %452 = math.rsqrt %451 : vector<16x1xf32>
    %453 = vector.broadcast %452 : vector<16x1xf32> to vector<16x32xf32>
    %454 = arith.mulf %449, %453 : vector<16x32xf32>
    %455 = vector.broadcast %434 : vector<1x32xf32> to vector<16x32xf32>
    %456 = arith.mulf %454, %455 : vector<16x32xf32>
    %457 = vector.broadcast %436 : vector<1x32xf32> to vector<16x32xf32>
    %458 = arith.addf %456, %457 : vector<16x32xf32>
    %c1_211 = arith.constant 1 : index
    %c0_212 = arith.constant 0 : index
    %c0_213 = arith.constant 0 : index
    %459 = vector.load %arg13[%c1_211, %c0_212, %c0_213] : memref<2x32x2xf32, #tpu.memory_space<vmem>>, vector<1x32x2xf32>
    %460 = vector.shape_cast %459 : vector<1x32x2xf32> to vector<32x2xf32>
    %cst_214 = arith.constant dense<0.000000e+00> : vector<16x2xf32>
    %461 = tpu.matmul %458, %460, %cst_214 {dimension_numbers = #tpu.dot_dimension_numbers<[1], [0], [0], [1], [0, 0, 1, 1], [], []>} : vector<16x32xf32>, vector<32x2xf32>, vector<16x2xf32> -> vector<16x2xf32>
    %c1_215 = arith.constant 1 : index
    %c0_216 = arith.constant 0 : index
    %c0_217 = arith.constant 0 : index
    %462 = vector.load %arg14[%c1_215, %c0_216, %c0_217] : memref<2x1x2xf32, #tpu.memory_space<vmem>>, vector<1x1x2xf32>
    %463 = vector.shape_cast %462 : vector<1x1x2xf32> to vector<1x2xf32>
    %464 = vector.broadcast %463 : vector<1x2xf32> to vector<16x2xf32>
    %465 = arith.addf %461, %464 : vector<16x2xf32>
    %cst_218 = arith.constant dense<0xFF800000> : vector<16xf32>
    %466 = vector.multi_reduction <maximumf>, %465, %cst_218 [1] : vector<16x2xf32> to vector<16xf32>
    %467 = vector.shape_cast %466 : vector<16xf32> to vector<16x1xf32>
    %468 = vector.broadcast %467 : vector<16x1xf32> to vector<16x2xf32>
    %469 = arith.subf %465, %468 : vector<16x2xf32>
    %470 = math.exp %469 : vector<16x2xf32>
    %cst_219 = arith.constant dense<0.000000e+00> : vector<16xf32>
    %471 = vector.multi_reduction <add>, %470, %cst_219 [1] : vector<16x2xf32> to vector<16xf32>
    %472 = vector.shape_cast %471 : vector<16xf32> to vector<16x1xf32>
    %473 = vector.broadcast %472 : vector<16x1xf32> to vector<16x2xf32>
    %474 = arith.divf %470, %473 : vector<16x2xf32>
    %cst_220 = arith.constant dense<0xFF800000> : vector<16xf32>
    %475 = vector.multi_reduction <maximumf>, %474, %cst_220 [1] : vector<16x2xf32> to vector<16xf32>
    %476 = vector.shape_cast %475 : vector<16xf32> to vector<16x1xf32>
    %477 = vector.broadcast %476 : vector<16x1xf32> to vector<16x2xf32>
    %478 = arith.cmpf oge, %474, %477 : vector<16x2xf32>
    %c2_i32_221 = arith.constant 2 : i32
    %479 = vector.broadcast %c2_i32_221 : i32 to vector<16x2xi32>
    %480 = arith.select %478, %52, %479 : vector<16x2xi1>, vector<16x2xi32>
    %cst_222 = arith.constant dense<2147483647> : vector<16xi32>
    %481 = vector.multi_reduction <minsi>, %480, %cst_222 [1] : vector<16x2xi32> to vector<16xi32>
    %482 = vector.shape_cast %481 : vector<16xi32> to vector<16x1xi32>
    %483 = vector.broadcast %482 : vector<16x1xi32> to vector<16x2xi32>
    %484 = arith.cmpi eq, %52, %483 : vector<16x2xi32>
    %485 = arith.extui %484 : vector<16x2xi1> to vector<16x2xi32>
    %486 = arith.sitofp %485 : vector<16x2xi32> to vector<16x2xf32>
    %c1_223 = arith.constant 1 : index
    %c0_224 = arith.constant 0 : index
    %c0_225 = arith.constant 0 : index
    %487 = vector.load %arg15[%c1_223, %c0_224, %c0_225] : memref<2x32x128xf32, #tpu.memory_space<vmem>>, vector<1x32x128xf32>
    %488 = vector.shape_cast %487 : vector<1x32x128xf32> to vector<32x128xf32>
    %cst_226 = arith.constant dense<0.000000e+00> : vector<16x128xf32>
    %489 = tpu.matmul %458, %488, %cst_226 {dimension_numbers = #tpu.dot_dimension_numbers<[1], [0], [0], [1], [0, 0, 1, 1], [], []>} : vector<16x32xf32>, vector<32x128xf32>, vector<16x128xf32> -> vector<16x128xf32>
    %c1_227 = arith.constant 1 : index
    %c0_228 = arith.constant 0 : index
    %c0_229 = arith.constant 0 : index
    %490 = vector.load %arg16[%c1_227, %c0_228, %c0_229] : memref<2x1x128xf32, #tpu.memory_space<vmem>>, vector<1x1x128xf32>
    %491 = vector.shape_cast %490 : vector<1x1x128xf32> to vector<1x128xf32>
    %492 = vector.broadcast %491 : vector<1x128xf32> to vector<16x128xf32>
    %493 = arith.addf %489, %492 : vector<16x128xf32>
    %cst_230 = arith.constant 0.000000e+00 : f32
    %494 = vector.broadcast %cst_230 : f32 to vector<16x128xf32>
    %495 = arith.maximumf %493, %494 : vector<16x128xf32>
    %c64_i32_231 = arith.constant 64 : i32
    %496 = vector.broadcast %c64_i32_231 : i32 to vector<16x1xi32>
    %497 = arith.muli %482, %496 : vector<16x1xi32>
    %498 = vector.broadcast %497 : vector<16x1xi32> to vector<16x128xi32>
    %499 = arith.cmpi sge, %53, %498 : vector<16x128xi32>
    %c64_i32_232 = arith.constant 64 : i32
    %500 = vector.broadcast %c64_i32_232 : i32 to vector<16x1xi32>
    %501 = arith.addi %497, %500 : vector<16x1xi32>
    %502 = vector.broadcast %501 : vector<16x1xi32> to vector<16x128xi32>
    %503 = arith.cmpi slt, %53, %502 : vector<16x128xi32>
    %504 = arith.andi %499, %503 : vector<16x128xi1>
    %505 = arith.extui %504 : vector<16x128xi1> to vector<16x128xi32>
    %506 = arith.sitofp %505 : vector<16x128xi32> to vector<16x128xf32>
    %507 = arith.mulf %495, %506 : vector<16x128xf32>
    %c1_233 = arith.constant 1 : index
    %c0_234 = arith.constant 0 : index
    %c0_235 = arith.constant 0 : index
    %508 = vector.load %arg17[%c1_233, %c0_234, %c0_235] : memref<2x128x32xf32, #tpu.memory_space<vmem>>, vector<1x128x32xf32>
    %509 = vector.shape_cast %508 : vector<1x128x32xf32> to vector<128x32xf32>
    %cst_236 = arith.constant dense<0.000000e+00> : vector<16x32xf32>
    %510 = tpu.matmul %507, %509, %cst_236 {dimension_numbers = #tpu.dot_dimension_numbers<[1], [0], [0], [1], [0, 0, 1, 1], [], []>} : vector<16x128xf32>, vector<128x32xf32>, vector<16x32xf32> -> vector<16x32xf32>
    %c1_237 = arith.constant 1 : index
    %c0_238 = arith.constant 0 : index
    %c0_239 = arith.constant 0 : index
    %511 = vector.load %arg18[%c1_237, %c0_238, %c0_239] : memref<2x2x32xf32, #tpu.memory_space<vmem>>, vector<1x2x32xf32>
    %512 = vector.shape_cast %511 : vector<1x2x32xf32> to vector<2x32xf32>
    %cst_240 = arith.constant dense<0.000000e+00> : vector<16x32xf32>
    %513 = tpu.matmul %486, %512, %cst_240 {dimension_numbers = #tpu.dot_dimension_numbers<[1], [0], [0], [1], [0, 0, 1, 1], [], []>} : vector<16x2xf32>, vector<2x32xf32>, vector<16x32xf32> -> vector<16x32xf32>
    %514 = arith.addf %510, %513 : vector<16x32xf32>
    %515 = vector.broadcast %476 : vector<16x1xf32> to vector<16x32xf32>
    %516 = arith.mulf %514, %515 : vector<16x32xf32>
    %517 = arith.addf %432, %516 : vector<16x32xf32>
    %cst_241 = arith.constant dense<0.000000e+00> : vector<2xf32>
    %518 = vector.multi_reduction <add>, %486, %cst_241 [0] : vector<16x2xf32> to vector<2xf32>
    %519 = vector.shape_cast %518 : vector<2xf32> to vector<1x2xf32>
    %cst_242 = arith.constant dense<0.000000e+00> : vector<2xf32>
    %520 = vector.multi_reduction <add>, %474, %cst_242 [0] : vector<16x2xf32> to vector<2xf32>
    %521 = vector.shape_cast %520 : vector<2xf32> to vector<1x2xf32>
    %522 = tpu.concatenate %519, %521 in 1 : vector<1x2xf32>, vector<1x2xf32> -> vector<1x4xf32>
    %c1_243 = arith.constant 1 : index
    %c0_244 = arith.constant 0 : index
    %c0_245 = arith.constant 0 : index
    %523 = vector.load %arg27[%c1_243, %c0_244, %c0_245] : memref<2x1x4xf32, #tpu.memory_space<vmem>>, vector<1x1x4xf32>
    %524 = vector.shape_cast %523 : vector<1x1x4xf32> to vector<1x4xf32>
    %525 = vector.shape_cast %522 : vector<1x4xf32> to vector<1x1x4xf32>
    tpu.vector_store %arg27[%c1_243, %c0_244, %c0_245], %525 {strides = array<i32>} : memref<2x1x4xf32, #tpu.memory_space<vmem>>, vector<1x1x4xf32>,
    %c0_246 = arith.constant 0 : index
    %c0_247 = arith.constant 0 : index
    %526 = vector.load %arg19[%c0_246, %c0_247] : memref<1x32xf32, #tpu.memory_space<vmem>>, vector<1x32xf32>
    %c0_248 = arith.constant 0 : index
    %c0_249 = arith.constant 0 : index
    %527 = vector.load %arg20[%c0_248, %c0_249] : memref<1x32xf32, #tpu.memory_space<vmem>>, vector<1x32xf32>
    %cst_250 = arith.constant dense<0.000000e+00> : vector<16xf32>
    %528 = vector.multi_reduction <add>, %517, %cst_250 [1] : vector<16x32xf32> to vector<16xf32>
    %529 = vector.shape_cast %528 : vector<16xf32> to vector<16x1xf32>
    %cst_251 = arith.constant 3.200000e+01 : f32
    %530 = vector.broadcast %cst_251 : f32 to vector<16x1xf32>
    %531 = arith.divf %529, %530 : vector<16x1xf32>
    %532 = vector.broadcast %531 : vector<16x1xf32> to vector<16x32xf32>
    %533 = arith.subf %517, %532 : vector<16x32xf32>
    %534 = arith.mulf %533, %533 : vector<16x32xf32>
    %cst_252 = arith.constant dense<0.000000e+00> : vector<16xf32>
    %535 = vector.multi_reduction <add>, %534, %cst_252 [1] : vector<16x32xf32> to vector<16xf32>
    %536 = vector.shape_cast %535 : vector<16xf32> to vector<16x1xf32>
    %cst_253 = arith.constant 3.200000e+01 : f32
    %537 = vector.broadcast %cst_253 : f32 to vector<16x1xf32>
    %538 = arith.divf %536, %537 : vector<16x1xf32>
    %539 = vector.broadcast %531 : vector<16x1xf32> to vector<16x32xf32>
    %540 = arith.subf %517, %539 : vector<16x32xf32>
    %cst_254 = arith.constant 9.99999974E-6 : f32
    %541 = vector.broadcast %cst_254 : f32 to vector<16x1xf32>
    %542 = arith.addf %538, %541 : vector<16x1xf32>
    %543 = math.rsqrt %542 : vector<16x1xf32>
    %544 = vector.broadcast %543 : vector<16x1xf32> to vector<16x32xf32>
    %545 = arith.mulf %540, %544 : vector<16x32xf32>
    %546 = vector.broadcast %526 : vector<1x32xf32> to vector<16x32xf32>
    %547 = arith.mulf %545, %546 : vector<16x32xf32>
    %548 = vector.broadcast %527 : vector<1x32xf32> to vector<16x32xf32>
    %549 = arith.addf %547, %548 : vector<16x32xf32>
    %c0_255 = arith.constant 0 : index
    %c0_256 = arith.constant 0 : index
    %550 = vector.load %arg23[%c0_255, %c0_256] : memref<16x32xf32, #tpu.memory_space<vmem>>, vector<16x32xf32>
    tpu.vector_store %arg23[%c0_255, %c0_256], %549 {strides = array<i32>} : memref<16x32xf32, #tpu.memory_space<vmem>>, vector<16x32xf32>,
    %c0_257 = arith.constant 0 : index
    %c0_258 = arith.constant 0 : index
    %551 = vector.load %arg21[%c0_257, %c0_258] : memref<32x768xf32, #tpu.memory_space<vmem>>, vector<32x768xf32>
    %cst_259 = arith.constant dense<0.000000e+00> : vector<16x768xf32>
    %552 = tpu.matmul %549, %551, %cst_259 {dimension_numbers = #tpu.dot_dimension_numbers<[1], [0], [0], [1], [0, 0, 1, 1], [], []>} : vector<16x32xf32>, vector<32x768xf32>, vector<16x768xf32> -> vector<16x768xf32>
    %c0_260 = arith.constant 0 : index
    %c0_261 = arith.constant 0 : index
    %553 = vector.load %arg22[%c0_260, %c0_261] : memref<1x768xf32, #tpu.memory_space<vmem>>, vector<1x768xf32>
    %554 = vector.broadcast %553 : vector<1x768xf32> to vector<16x768xf32>
    %555 = arith.addf %552, %554 : vector<16x768xf32>
    %c0_262 = arith.constant 0 : index
    %c0_263 = arith.constant 0 : index
    %556 = vector.load %arg24[%c0_262, %c0_263] : memref<16x768xf32, #tpu.memory_space<vmem>>, vector<16x768xf32>
    tpu.vector_store %arg24[%c0_262, %c0_263], %555 {strides = array<i32>} : memref<16x768xf32, #tpu.memory_space<vmem>>, vector<16x768xf32>,
    return
  }
}

</mosaic_0001>

<bundles_post_ra>
// kernel: tpu_custom_call.1
= control target key start
LH: loop header
LB: loop body
LE: loop exit
PB: predicated region body
PF: predicated region fallthrough
CT: control target
= control target key end

     0   :  { %s6891_s0 = inlined_call_operand.hbm [shape: f32[16,32], index: 0, kind: input, shape index: {}]   ;;  %s6892_s1 = inlined_call_operand.hbm [shape: f32[2,1,32], index: 1, kind: input, shape index: {}]   ;;  %s6893_s2 = inlined_call_operand.hbm [shape: f32[2,1,32], index: 2, kind: input, shape index: {}]   ;;  %s6894_s3 = inlined_call_operand.vmem [shape: f32[2,32,32], index: 3, kind: input, shape index: {}]   ;;  %s6895_s4 = inlined_call_operand.hbm [shape: f32[2,1,32], index: 4, kind: input, shape index: {}]   ;;  %s6896_s5 = inlined_call_operand.vmem [shape: f32[2,32,32], index: 5, kind: input, shape index: {}]   ;;  %s6897_s6 = inlined_call_operand.hbm [shape: f32[2,1,32], index: 6, kind: input, shape index: {}]   ;;  %s6898_s7 = inlined_call_operand.vmem [shape: f32[2,32,32], index: 7, kind: input, shape index: {}]   ;;  %s6899_s8 = inlined_call_operand.hbm [shape: f32[2,1,32], index: 8, kind: input, shape index: {}]   ;;  %s6900_s9 = inlined_call_operand.hbm [shape: f32[2,32,32], index: 9, kind: input, shape index: {}]   ;;  %s6901_s10 = inlined_call_operand.hbm [shape: f32[2,1,32], index: 10, kind: input, shape index: {}]   ;;  %s6902_s11 = inlined_call_operand.hbm [shape: f32[2,1,32], index: 11, kind: input, shape index: {}]   ;;  %s6903_s12 = inlined_call_operand.hbm [shape: f32[2,1,32], index: 12, kind: input, shape index: {}]   ;;  %s6904_s13 = inlined_call_operand.vmem [shape: f32[2,32,2], index: 13, kind: input, shape index: {}]   ;;  %s6905_s14 = inlined_call_operand.hbm [shape: f32[2,1,2], index: 14, kind: input, shape index: {}]   ;;  %s6906_s15 = inlined_call_operand.hbm [shape: f32[2,32,128], index: 15, kind: input, shape index: {}]   ;;  %s6907_s16 = inlined_call_operand.hbm [shape: f32[2,1,128], index: 16, kind: input, shape index: {}]   ;;  %s6908_s17 = inlined_call_operand.vmem [shape: f32[2,128,32], index: 17, kind: input, shape index: {}]   ;;  %s6909_s18 = inlined_call_operand.hbm [shape: f32[2,2,32], index: 18, kind: input, shape index: {}]   ;;  %s6910_s19 = inlined_call_operand.vmem [shape: f32[1,32], index: 19, kind: input, shape index: {}]   ;;  %s6911_s20 = inlined_call_operand.vmem [shape: f32[1,32], index: 20, kind: input, shape index: {}]   ;;  %s6912_s21 = inlined_call_operand.vmem [shape: f32[32,768], index: 21, kind: input, shape index: {}]   ;;  %s6913_s22 = inlined_call_operand.vmem [shape: f32[1,768], index: 22, kind: input, shape index: {}]   ;;  %s6914_s23 = inlined_call_operand.hbm [shape: f32[16,32], index: 23, kind: output, shape index: {0}]   ;;  %s6915_s24 = inlined_call_operand.hbm [shape: f32[16,768], index: 24, kind: output, shape index: {1}]   ;;  %s6916_s25 = inlined_call_operand.hbm [shape: f32[2,4,16,16], index: 25, kind: output, shape index: {2}]   ;;  %s6917_s26 = inlined_call_operand.hbm [shape: f32[2,16,32], index: 26, kind: output, shape index: {3}]   ;;  %s6918_s27 = inlined_call_operand.hbm [shape: f32[2,1,4], index: 27, kind: output, shape index: {4}]  }
   0x1   :  { %6933 = sst [smem:[#allocation43_spill]] %s6891_s0 }
   0x2   :  { %6934 = sst [smem:[#allocation44_spill]] %s6892_s1 }
   0x3   :  { %6935 = sst [smem:[#allocation45_spill]] %s6893_s2 }
   0x4   :  { %6936 = sst [smem:[#allocation46_spill]] %s6894_s3 }
   0x5   :  { %6937 = sst [smem:[#allocation47_spill]] %s6895_s4 }
   0x6   :  { %6938 = sst [smem:[#allocation48_spill]] %s6896_s5 }
   0x7   :  { %6939 = sst [smem:[#allocation49_spill]] %s6897_s6 }
   0x8   :  { %6940 = sst [smem:[#allocation50_spill]] %s6898_s7 }
   0x9   :  { %6941 = sst [smem:[#allocation51_spill]] %s6899_s8 }
   0xa   :  { %6942 = sst [smem:[#allocation52_spill]] %s6900_s9 }
   0xb   :  { %6943 = sst [smem:[#allocation53_spill]] %s6901_s10 }
   0xc   :  { %6944 = sst [smem:[#allocation54_spill]] %s6902_s11 }
   0xd   :  { %6945 = sst [smem:[#allocation55_spill]] %s6913_s22 }
   0xe   :  { %6946 = sst [smem:[#allocation56_spill]] %s6915_s24 }
   0xf   :  { %6947 = sst [smem:[#allocation57_spill]] %s6916_s25 }
  0x10   :  { %33 = vsyncpa [#allocation3], 0 }
  0x11   :  { %34 = vsyncpa [#allocation6], 0 }
  0x12   :  { %35 = vsyncpa [#allocation9], 0 }
  0x13   :  { %36 = vsyncpa [#allocation12], 0 }
  0x14   :  { %37 = vsyncpa [#allocation15], 0 }
  0x15   :  { %38 = vsyncpa [#allocation18], 0 }
  0x16   :  { %39 = vsyncpa [#allocation21], 0 }
  0x17   :  { %40 = vsyncpa [#allocation24], 0 }
  0x18   :  { %41 = vsyncpa [#allocation4], 0 }
  0x19   :  { %42 = vsyncpa [#allocation27], 0 }
  0x1a   :  { %43 = vsyncpa [#allocation30], 0  ;;  %s5662_s7 = smov [#allocation5]   ;;  %s6948_s9 = sld [smem:[#allocation44_spill]] }
  0x1b   :  { %s61_s4 = sshll.u32 %s5662_s7, 4  ;;  %s62_s4 = int_to_ptr.vmem [resolvable:$true] %s61_s4 }
  0x20   :  { %s5222_s5 = scalar_lea.hbm %s6948_s9, 32 }
  0x21   :  { %p5223_p0 = scmp.ne.s32.totalorder %s6948_s9, %s5222_s5  ;;  %p5226_p1 = scmp.lt.u32.totalorder %s5222_s5, %s6948_s9 }
  0x23   :  { %p5228_p2 = pnand %p5226_p1, %p5223_p0 }
  0x25   :  { %5231 = shalt.err (!%p5228_p2)
}
  0x26   :  { %s5232_s1 = scalar_lea.vmem %s62_s4, 32  ;;  %p5237_p4 = scmp.lt.s32.totalorder %s62_s4, %s62_s4 }
  0x27   :  { %p5233_p3 = scmp.ne.s32.totalorder %s62_s4, %s5232_s1  ;;  %p5238_p5 = scmp.lt.s32.totalorder %s5232_s1, %s5232_s1 }
  0x29   :  { %p5239_p6 = por %p5238_p5, %p5237_p4 }
  0x2b   :  { %p5240_p7 = pnand %p5239_p6, %p5233_p3 }
  0x2d   :  { %5243 = shalt.err (!%p5240_p7)
}
  0x2e   :  { %s5663_s6 = smov 16   ;;  %s5664_s11 = smov 1  }
  0x2f   :  { %67 = dma.hbm_to_vmem [thread:$0]  %s6948_s9, 32, %s62_s4, [#allocation6], %s5663_s6, %s5663_s6, %s5664_s11  }
  0x30   :  { %s5665_s7 = smov [#allocation8]   ;;  %s5666_s30 = smov [#allocation11]  }
  0x31   :  { %s87_s8 = sshll.u32 %s5665_s7, 4  ;;  %s115_s5 = sshll.u32 %s5666_s30, 4  ;;  %s88_s8 = int_to_ptr.vmem [resolvable:$true] %s87_s8  ;;  %s116_s5 = int_to_ptr.vmem [resolvable:$true] %s115_s5 }
  0x32   :  { %s6949_s10 = sld [smem:[#allocation47_spill]] }
  0x38   :  { %s5244_s29 = scalar_lea.hbm %s6949_s10, 32 }
  0x39   :  { %p5245_p8 = scmp.ne.s32.totalorder %s6949_s10, %s5244_s29  ;;  %p5248_p9 = scmp.lt.u32.totalorder %s5244_s29, %s6949_s10 }
  0x3b   :  { %p5250_p10 = pnand %p5248_p9, %p5245_p8 }
  0x3d   :  { %5253 = shalt.err (!%p5250_p10)
}
  0x3e   :  { %s5254_s4 = scalar_lea.vmem %s88_s8, 32  ;;  %p5259_p12 = scmp.lt.s32.totalorder %s88_s8, %s88_s8 }
  0x3f   :  { %p5255_p11 = scmp.ne.s32.totalorder %s88_s8, %s5254_s4  ;;  %p5260_p13 = scmp.lt.s32.totalorder %s5254_s4, %s5254_s4 }
  0x41   :  { %p5261_p0 = por %p5260_p13, %p5259_p12 }
  0x43   :  { %p5262_p1 = pnand %p5261_p0, %p5255_p11 }
  0x45   :  { %5265 = shalt.err (!%p5262_p1)
}
  0x46   :  { %93 = dma.hbm_to_vmem [thread:$0]  %s6949_s10, 32, %s88_s8, [#allocation9], %s5663_s6, %s5663_s6, %s5664_s11  }
  0x47   :  { %s6950_s24 = sld [smem:[#allocation51_spill]] }
  0x4d   :  { %s5266_s3 = scalar_lea.hbm %s6950_s24, 32 }
  0x4e   :  { %p5267_p2 = scmp.ne.s32.totalorder %s6950_s24, %s5266_s3  ;;  %p5270_p3 = scmp.lt.u32.totalorder %s5266_s3, %s6950_s24 }
  0x50   :  { %p5272_p4 = pnand %p5270_p3, %p5267_p2 }
  0x52   :  { %5275 = shalt.err (!%p5272_p4)
}
  0x53   :  { %s5276_s29 = scalar_lea.vmem %s116_s5, 32  ;;  %p5281_p6 = scmp.lt.s32.totalorder %s116_s5, %s116_s5 }
  0x54   :  { %p5277_p5 = scmp.ne.s32.totalorder %s116_s5, %s5276_s29  ;;  %p5282_p7 = scmp.lt.s32.totalorder %s5276_s29, %s5276_s29 }
  0x56   :  { %p5283_p8 = por %p5282_p7, %p5281_p6 }
  0x58   :  { %p5284_p9 = pnand %p5283_p8, %p5277_p5 }
  0x5a   :  { %5287 = shalt.err (!%p5284_p9)
}
  0x5b   :  { %121 = dma.hbm_to_vmem [thread:$0]  %s6950_s24, 32, %s116_s5, [#allocation12], %s5663_s6, %s5663_s6, %s5664_s11  }
  0x5c   :  { %s5667_s1 = smov [#allocation14]   ;;  %s5668_s9 = smov [#allocation17]  }
  0x5d   :  { %s139_s4 = sshll.u32 %s5667_s1, 4  ;;  %s163_s2 = sshll.u32 %s5668_s9, 4  ;;  %s140_s4 = int_to_ptr.vmem [resolvable:$true] %s139_s4  ;;  %s164_s2 = int_to_ptr.vmem [resolvable:$true] %s163_s2 }
  0x5e   :  { %s6951_s3 = sld [smem:[#allocation53_spill]] }
  0x64   :  { %s5288_s7 = scalar_lea.hbm %s6951_s3, 32 }
  0x65   :  { %p5289_p10 = scmp.ne.s32.totalorder %s6951_s3, %s5288_s7  ;;  %p5292_p11 = scmp.lt.u32.totalorder %s5288_s7, %s6951_s3 }
  0x67   :  { %p5294_p12 = pnand %p5292_p11, %p5289_p10 }
  0x69   :  { %5297 = shalt.err (!%p5294_p12)
}
  0x6a   :  { %s5298_s5 = scalar_lea.vmem %s140_s4, 32  ;;  %p5303_p0 = scmp.lt.s32.totalorder %s140_s4, %s140_s4 }
  0x6b   :  { %p5299_p13 = scmp.ne.s32.totalorder %s140_s4, %s5298_s5  ;;  %p5304_p1 = scmp.lt.s32.totalorder %s5298_s5, %s5298_s5 }
  0x6d   :  { %p5305_p2 = por %p5304_p1, %p5303_p0 }
  0x6f   :  { %p5306_p3 = pnand %p5305_p2, %p5299_p13 }
  0x71   :  { %5309 = shalt.err (!%p5306_p3)
}
  0x72   :  { %145 = dma.hbm_to_vmem [thread:$0]  %s6951_s3, 32, %s140_s4, [#allocation15], %s5663_s6, %s5663_s6, %s5664_s11  }
  0x73   :  { %s5310_s9 = scalar_lea.hbm %s6903_s12, 32 }
  0x74   :  { %p5311_p4 = scmp.ne.s32.totalorder %s6903_s12, %s5310_s9  ;;  %p5314_p5 = scmp.lt.u32.totalorder %s5310_s9, %s6903_s12 }
  0x76   :  { %p5316_p6 = pnand %p5314_p5, %p5311_p4 }
  0x78   :  { %5319 = shalt.err (!%p5316_p6)
}
  0x79   :  { %s5320_s28 = scalar_lea.vmem %s164_s2, 32  ;;  %p5325_p8 = scmp.lt.s32.totalorder %s164_s2, %s164_s2 }
  0x7a   :  { %p5321_p7 = scmp.ne.s32.totalorder %s164_s2, %s5320_s28  ;;  %p5326_p9 = scmp.lt.s32.totalorder %s5320_s28, %s5320_s28 }
  0x7c   :  { %p5327_p10 = por %p5326_p9, %p5325_p8 }
  0x7e   :  { %p5328_p11 = pnand %p5327_p10, %p5321_p7 }
  0x80   :  { %5331 = shalt.err (!%p5328_p11)
}
  0x81   :  { %169 = dma.hbm_to_vmem [thread:$0]  %s6903_s12, 32, %s164_s2, [#allocation18], %s5663_s6, %s5663_s6, %s5664_s11  }
  0x82   :  { %s5669_s0 = smov [#allocation20]   ;;  %s5670_s5 = smov [#allocation2]  }
  0x83   :  { %s189_s29 = sshll.u32 %s5669_s0, 4  ;;  %s49_s24 = sshll.u32 %s5670_s5, 4  ;;  %s190_s29 = int_to_ptr.vmem [resolvable:$true] %s189_s29  ;;  %s50_s24 = int_to_ptr.vmem [resolvable:$true] %s49_s24 }
  0x84   :  { %s5332_s1 = scalar_lea.hbm %s6906_s15, 1024 }
  0x85   :  { %p5333_p12 = scmp.ne.s32.totalorder %s6906_s15, %s5332_s1  ;;  %p5336_p13 = scmp.lt.u32.totalorder %s5332_s1, %s6906_s15 }
  0x87   :  { %p5338_p0 = pnand %p5336_p13, %p5333_p12 }
  0x89   :  { %5341 = shalt.err (!%p5338_p0)
}
  0x8a   :  { %s5342_s12 = scalar_lea.vmem %s190_s29, 1024  ;;  %p5347_p2 = scmp.lt.s32.totalorder %s190_s29, %s190_s29 }
  0x8b   :  { %p5343_p1 = scmp.ne.s32.totalorder %s190_s29, %s5342_s12  ;;  %p5348_p3 = scmp.lt.s32.totalorder %s5342_s12, %s5342_s12 }
  0x8d   :  { %p5349_p4 = por %p5348_p3, %p5347_p2 }
  0x8f   :  { %p5350_p5 = pnand %p5349_p4, %p5343_p1 }
  0x91   :  { %5353 = shalt.err (!%p5350_p5)
}
  0x92   :  { %s5671_s2 = smov 128   ;;  %s5672_s30 = smov 8  }
  0x93   :  { %195 = dma.hbm_to_vmem [thread:$0]  %s6906_s15, 1024, %s190_s29, [#allocation21], %s5671_s2, %s5671_s2, %s5672_s30  }
  0x94   :  { %s6952_s5 = sld [smem:[#allocation43_spill]] }
  0x9a   :  { %s5354_s8 = scalar_lea.hbm %s6952_s5, 256 }
  0x9b   :  { %p5355_p6 = scmp.ne.s32.totalorder %s6952_s5, %s5354_s8  ;;  %p5358_p7 = scmp.lt.u32.totalorder %s5354_s8, %s6952_s5 }
  0x9d   :  { %p5360_p8 = pnand %p5358_p7, %p5355_p6 }
  0x9f   :  { %5363 = shalt.err (!%p5360_p8)
}
  0xa0   :  { %s5364_s22 = scalar_lea.vmem %s50_s24, 256  ;;  %p5369_p10 = scmp.lt.s32.totalorder %s50_s24, %s50_s24 }
  0xa1   :  { %p5365_p9 = scmp.ne.s32.totalorder %s50_s24, %s5364_s22  ;;  %p5370_p11 = scmp.lt.s32.totalorder %s5364_s22, %s5364_s22 }
  0xa3   :  { %p5371_p12 = por %p5370_p11, %p5369_p10 }
  0xa5   :  { %p5372_p13 = pnand %p5371_p12, %p5365_p9 }
  0xa7   :  { %5375 = shalt.err (!%p5372_p13)
}
  0xa8   :  { %55 = dma.hbm_to_vmem [thread:$0]  %s6952_s5, 256, %s50_s24, [#allocation3], %s5671_s2, %s5671_s2, %s5672_s30  }
  0xa9   :  { %s5673_s7 = smov [#allocation7]   ;;  %s5674_s28 = smov [#allocation10]  }
  0xaa   :  { %s73_s12 = sshll.u32 %s5673_s7, 4  ;;  %s101_s4 = sshll.u32 %s5674_s28, 4  ;;  %s74_s12 = int_to_ptr.vmem [resolvable:$true] %s73_s12  ;;  %s102_s4 = int_to_ptr.vmem [resolvable:$true] %s101_s4 }
  0xab   :  { %s6953_s8 = sld [smem:[#allocation45_spill]] }
  0xb1   :  { %s5376_s10 = scalar_lea.hbm %s6953_s8, 32 }
  0xb2   :  { %p5377_p0 = scmp.ne.s32.totalorder %s6953_s8, %s5376_s10  ;;  %p5380_p1 = scmp.lt.u32.totalorder %s5376_s10, %s6953_s8 }
  0xb4   :  { %p5382_p2 = pnand %p5380_p1, %p5377_p0 }
  0xb6   :  { %5385 = shalt.err (!%p5382_p2)
}
  0xb7   :  { %s5386_s24 = scalar_lea.vmem %s74_s12, 32  ;;  %p5391_p4 = scmp.lt.s32.totalorder %s74_s12, %s74_s12 }
  0xb8   :  { %p5387_p3 = scmp.ne.s32.totalorder %s74_s12, %s5386_s24  ;;  %p5392_p5 = scmp.lt.s32.totalorder %s5386_s24, %s5386_s24 }
  0xba   :  { %p5393_p6 = por %p5392_p5, %p5391_p4 }
  0xbc   :  { %p5394_p7 = pnand %p5393_p6, %p5387_p3 }
  0xbe   :  { %5397 = shalt.err (!%p5394_p7)
}
  0xbf   :  { %79 = dma.hbm_to_vmem [thread:$0]  %s6953_s8, 32, %s74_s12, [#allocation6], %s5663_s6, %s5663_s6, %s5664_s11  }
  0xc0   :  { %s6954_s28 = sld [smem:[#allocation49_spill]] }
  0xc6   :  { %s5398_s3 = scalar_lea.hbm %s6954_s28, 32 }
  0xc7   :  { %p5399_p8 = scmp.ne.s32.totalorder %s6954_s28, %s5398_s3  ;;  %p5402_p9 = scmp.lt.u32.totalorder %s5398_s3, %s6954_s28 }
  0xc9   :  { %p5404_p10 = pnand %p5402_p9, %p5399_p8 }
  0xcb   :  { %5407 = shalt.err (!%p5404_p10)
}
  0xcc   :  { %s5408_s25 = scalar_lea.vmem %s102_s4, 32  ;;  %p5413_p12 = scmp.lt.s32.totalorder %s102_s4, %s102_s4 }
  0xcd   :  { %p5409_p11 = scmp.ne.s32.totalorder %s102_s4, %s5408_s25  ;;  %p5414_p13 = scmp.lt.s32.totalorder %s5408_s25, %s5408_s25 }
  0xcf   :  { %p5415_p0 = por %p5414_p13, %p5413_p12 }
  0xd1   :  { %p5416_p1 = pnand %p5415_p0, %p5409_p11 }
  0xd3   :  { %5419 = shalt.err (!%p5416_p1)
}
  0xd4   :  { %107 = dma.hbm_to_vmem [thread:$0]  %s6954_s28, 32, %s102_s4, [#allocation9], %s5663_s6, %s5663_s6, %s5664_s11  }
  0xd5   :  { %s5675_s22 = smov [#allocation13]   ;;  %s5676_s5 = smov [#allocation16]  }
  0xd6   :  { %s127_s24 = sshll.u32 %s5675_s22, 4  ;;  %s151_s15 = sshll.u32 %s5676_s5, 4  ;;  %s128_s24 = int_to_ptr.vmem [resolvable:$true] %s127_s24  ;;  %s152_s15 = int_to_ptr.vmem [resolvable:$true] %s151_s15 }
  0xd7   :  { %s6955_s3 = sld [smem:[#allocation52_spill]] }
  0xdd   :  { %s5420_s0 = scalar_lea.hbm %s6955_s3, 1024 }
  0xde   :  { %p5421_p2 = scmp.ne.s32.totalorder %s6955_s3, %s5420_s0  ;;  %p5424_p3 = scmp.lt.u32.totalorder %s5420_s0, %s6955_s3 }
  0xe0   :  { %p5426_p4 = pnand %p5424_p3, %p5421_p2 }
  0xe2   :  { %5429 = shalt.err (!%p5426_p4)
}
  0xe3   :  { %s5430_s4 = scalar_lea.vmem %s128_s24, 1024  ;;  %p5435_p6 = scmp.lt.s32.totalorder %s128_s24, %s128_s24 }
  0xe4   :  { %p5431_p5 = scmp.ne.s32.totalorder %s128_s24, %s5430_s4  ;;  %p5436_p7 = scmp.lt.s32.totalorder %s5430_s4, %s5430_s4 }
  0xe6   :  { %p5437_p8 = por %p5436_p7, %p5435_p6 }
  0xe8   :  { %p5438_p9 = pnand %p5437_p8, %p5431_p5 }
  0xea   :  { %5441 = shalt.err (!%p5438_p9)
}
  0xeb   :  { %133 = dma.hbm_to_vmem [thread:$0]  %s6955_s3, 1024, %s128_s24, [#allocation12], %s5671_s2, %s5671_s2, %s5672_s30  }
  0xec   :  { %s6956_s5 = sld [smem:[#allocation54_spill]] }
  0xf2   :  { %s5442_s29 = scalar_lea.hbm %s6956_s5, 32 }
  0xf3   :  { %p5443_p10 = scmp.ne.s32.totalorder %s6956_s5, %s5442_s29  ;;  %p5446_p11 = scmp.lt.u32.totalorder %s5442_s29, %s6956_s5 }
  0xf5   :  { %p5448_p12 = pnand %p5446_p11, %p5443_p10 }
  0xf7   :  { %5451 = shalt.err (!%p5448_p12)
}
  0xf8   :  { %s5452_s9 = scalar_lea.vmem %s152_s15, 32  ;;  %p5457_p0 = scmp.lt.s32.totalorder %s152_s15, %s152_s15 }
  0xf9   :  { %p5453_p13 = scmp.ne.s32.totalorder %s152_s15, %s5452_s9  ;;  %p5458_p1 = scmp.lt.s32.totalorder %s5452_s9, %s5452_s9 }
  0xfb   :  { %p5459_p2 = por %p5458_p1, %p5457_p0 }
  0xfd   :  { %p5460_p3 = pnand %p5459_p2, %p5453_p13 }
  0xff   :  { %5463 = shalt.err (!%p5460_p3)
}
 0x100   :  { %157 = dma.hbm_to_vmem [thread:$0]  %s6956_s5, 32, %s152_s15, [#allocation15], %s5663_s6, %s5663_s6, %s5664_s11  }
 0x101   :  { %s5677_s25 = smov [#allocation19]   ;;  %s5678_s28 = smov [#allocation22]  }
 0x102   :  { %s177_s4 = sshll.u32 %s5677_s25, 4  ;;  %s201_s12 = sshll.u32 %s5678_s28, 4  ;;  %s178_s4 = int_to_ptr.vmem [resolvable:$true] %s177_s4  ;;  %s202_s12 = int_to_ptr.vmem [resolvable:$true] %s201_s12 }
 0x103   :  { %s5464_s29 = scalar_lea.hbm %s6905_s14, 32 }
 0x104   :  { %p5465_p4 = scmp.ne.s32.totalorder %s6905_s14, %s5464_s29  ;;  %p5468_p5 = scmp.lt.u32.totalorder %s5464_s29, %s6905_s14 }
 0x106   :  { %p5470_p6 = pnand %p5468_p5, %p5465_p4 }
 0x108   :  { %5473 = shalt.err (!%p5470_p6)
}
 0x109   :  { %s5474_s15 = scalar_lea.vmem %s178_s4, 32  ;;  %p5479_p8 = scmp.lt.s32.totalorder %s178_s4, %s178_s4 }
 0x10a   :  { %p5475_p7 = scmp.ne.s32.totalorder %s178_s4, %s5474_s15  ;;  %p5480_p9 = scmp.lt.s32.totalorder %s5474_s15, %s5474_s15 }
 0x10c   :  { %p5481_p10 = por %p5480_p9, %p5479_p8 }
 0x10e   :  { %p5482_p11 = pnand %p5481_p10, %p5475_p7 }
 0x110   :  { %5485 = shalt.err (!%p5482_p11)
}
 0x111   :  { %183 = dma.hbm_to_vmem [thread:$0]  %s6905_s14, 32, %s178_s4, [#allocation18], %s5663_s6, %s5663_s6, %s5664_s11  }
 0x112   :  { %s5486_s25 = scalar_lea.hbm %s6907_s16, 32 }
 0x113   :  { %p5487_p12 = scmp.ne.s32.totalorder %s6907_s16, %s5486_s25  ;;  %p5490_p13 = scmp.lt.u32.totalorder %s5486_s25, %s6907_s16 }
 0x115   :  { %p5492_p0 = pnand %p5490_p13, %p5487_p12 }
 0x117   :  { %5495 = shalt.err (!%p5492_p0)
}
 0x118   :  { %s5496_s7 = scalar_lea.vmem %s202_s12, 32  ;;  %p5501_p2 = scmp.lt.s32.totalorder %s202_s12, %s202_s12 }
 0x119   :  { %p5497_p1 = scmp.ne.s32.totalorder %s202_s12, %s5496_s7  ;;  %p5502_p3 = scmp.lt.s32.totalorder %s5496_s7, %s5496_s7 }
 0x11b   :  { %p5503_p4 = por %p5502_p3, %p5501_p2 }
 0x11d   :  { %p5504_p5 = pnand %p5503_p4, %p5497_p1 }
 0x11f   :  { %5507 = shalt.err (!%p5504_p5)
}
 0x120   :  { %207 = dma.hbm_to_vmem [thread:$0]  %s6907_s16, 32, %s202_s12, [#allocation21], %s5663_s6, %s5663_s6, %s5664_s11  }
 0x121   :  { %s5679_s0 = smov [#allocation23]   ;;  %s5508_s5 = scalar_lea.hbm %s6909_s18, 64 }
 0x122   :  { %s215_s10 = sshll.u32 %s5679_s0, 4  ;;  %p5509_p6 = scmp.ne.s32.totalorder %s6909_s18, %s5508_s5  ;;  %s216_s10 = int_to_ptr.vmem [resolvable:$true] %s215_s10 }
 0x123   :  { %p5512_p7 = scmp.lt.u32.totalorder %s5508_s5, %s6909_s18 }
 0x125   :  { %p5514_p8 = pnand %p5512_p7, %p5509_p6 }
 0x127   :  { %5517 = shalt.err (!%p5514_p8)
}
 0x128   :  { %s5518_s28 = scalar_lea.vmem %s216_s10, 64  ;;  %p5523_p10 = scmp.lt.s32.totalorder %s216_s10, %s216_s10 }
 0x129   :  { %p5519_p9 = scmp.ne.s32.totalorder %s216_s10, %s5518_s28  ;;  %p5524_p11 = scmp.lt.s32.totalorder %s5518_s28, %s5518_s28 }
 0x12b   :  { %p5525_p12 = por %p5524_p11, %p5523_p10 }
 0x12d   :  { %p5526_p13 = pnand %p5525_p12, %p5519_p9 }
 0x12f   :  { %5529 = shalt.err (!%p5526_p13)
}
 0x130   :  { %s5680_s16 = smov 32   ;;  %s5681_s12 = smov 2  }
 0x131   :  { %221 = dma.hbm_to_vmem [thread:$0]  %s6909_s18, 64, %s216_s10, [#allocation24], %s5680_s16, %s5680_s16, %s5681_s12  }
 0x132   :  { %5640 = dma.done.wait [#allocation3], 256  }
 0x133   :  { %5641 = vsyncadd [#allocation3], 4294967040 }
 0x134   :  { %5642 = dma.done.wait [#allocation6], 64  }
 0x135   :  { %5643 = vsyncadd [#allocation6], 4294967232 }
 0x136   :  { %5644 = dma.done.wait [#allocation9], 64  }
 0x137   :  { %5645 = vsyncadd [#allocation9], 4294967232 }
 0x138   :  { %5646 = dma.done.wait [#allocation12], 1056  }
 0x139   :  { %5647 = vsyncadd [#allocation12], 4294966240 }
 0x13a   :  { %5648 = dma.done.wait [#allocation15], 64  }
 0x13b   :  { %5649 = vsyncadd [#allocation15], 4294967232 }
 0x13c   :  { %5650 = dma.done.wait [#allocation18], 64  }
 0x13d   :  { %5651 = vsyncadd [#allocation18], 4294967232 }
 0x13e   :  { %5652 = dma.done.wait [#allocation21], 1056  }
 0x13f   :  { %5653 = vsyncadd [#allocation21], 4294966240 }
 0x140   :  { %5654 = dma.done.wait [#allocation24], 64  }
 0x141   :  { %5655 = vsyncadd [#allocation24], 4294967232  ;;  %vm321_vm0 = vcmask 261120   ;;  %v6039_v0 = vld [vmem:[#allocation2] sm:$0xff]  ;;  %v6041_v1 = vld [vmem:[#allocation2 + $0x8] sm:$0xff]  ;;  %s6957_s7 = sld [smem:[#allocation46_spill]]  ;;  %v274_v48 = vlaneseq }
 0x142   :  { %v322_v2 = vsel %vm321_vm0, %v6039_v0, 0.0  ;;  %v325_v3 = vsel %vm321_vm0, %v6041_v1, 0.0  ;;  %s6958_s1 = sld [smem:[#allocation48_spill]]  ;;  %s6959_s14 = sld [smem:[#allocation50_spill]]  ;;  %v4165_v36 = vld [vmem:[#allocation5] ss:$0 sm:$0xff]  ;;  %vm6112_vm8 = vmpackc.low %vm321_vm0, %vm321_vm0 }
 0x143   :  { %323 = vadd.xlane.f32.xlu0 %v322_v2  ;;  %v4166_v38 = vld [vmem:[#allocation7] ss:$0 sm:$0xff]  ;;  %v6094_v49 = vand.u32 127, %v274_v48  ;;  %v4170_v50 = vld [vmem:[#allocation10] ss:$0 sm:$0xff]  ;;  %v5682_v54 = vmov 0.0  }
 0x144   :  { %v4167_v51 = vld [vmem:[#allocation8] ss:$0 sm:$0xff]  ;;  %vm720_vm14 = vcmask 130048   ;;  %vm1635_vm15 = vcmask 15360  }
 0x145   :  { %vm281_vm1 = vcmp.ge.s32.totalorder %v6094_v49, 8  ;;  %vm282_vm2 = vcmp.lt.s32.totalorder %v6094_v49, 16  ;;  %vm277_vm3 = vcmp.lt.s32.totalorder %v6094_v49, 8  ;;  %vm286_vm5 = vcmp.ge.s32.totalorder %v6094_v49, 16 }
 0x146   :  { %vm283_vm4 = vmand %vm281_vm1, %vm282_vm2  ;;  %v6100_v55 = vsel %vm277_vm3, 1.0, %v5682_v54  ;;  %vm287_vm6 = vcmp.lt.s32.totalorder %v6094_v49, 24  ;;  %vm291_vm7 = vcmp.ge.s32.totalorder %v6094_v49, 24  ;;  %vm292_vm9 = vcmp.lt.s32.totalorder %v6094_v49, 32 }
 0x147   :  { %326 = vadd.xlane.f32.xlu0 %v325_v3  ;;  %v365_v14 = vld [vmem:[%s6957_s7] sm:$0xff]  ;;  %v366_v15 = vld [vmem:[%s6957_s7 + $0x8] sm:$0xff]  ;;  %v367_v19 = vld [vmem:[%s6957_s7 + $0x10] sm:$0xff]  ;;  %v6103_v56 = vsel %vm283_vm4, 1.0, %v5682_v54 }
 0x148   :  { %v457_v16 = vld [vmem:[%s6958_s1] sm:$0xff]  ;;  %v4813_v17 = vpack.c.bf16 %v366_v15, %v365_v14  ;;  %v458_v18 = vld [vmem:[%s6958_s1 + $0x8] sm:$0xff]  ;;  %v368_v20 = vld [vmem:[%s6957_s7 + $0x18] sm:$0xff] }
 0x149   :  { %v4821_v21 = vpack.c.bf16 %v458_v18, %v457_v16  ;;  %v4817_v22 = vpack.c.bf16 %v368_v20, %v367_v19  ;;  %v459_v23 = vld [vmem:[%s6958_s1 + $0x10] sm:$0xff]  ;;  %v460_v24 = vld [vmem:[%s6958_s1 + $0x18] sm:$0xff]  ;;  %v543_v26 = vld [vmem:[%s6959_s14] sm:$0xff] }
 0x14a   :  { %4814 = vmatprep.subr.bf16.mxu0 %v4813_v17  ;;  %v4825_v25 = vpack.c.bf16 %v460_v24, %v459_v23  ;;  %v544_v27 = vld [vmem:[%s6959_s14 + $0x8] sm:$0xff]  ;;  %v545_v43 = vld [vmem:[%s6959_s14 + $0x10] sm:$0xff]  ;;  %v546_v44 = vld [vmem:[%s6959_s14 + $0x18] sm:$0xff] }
 0x14b   :  { %4816 = vmatpush3.bf16.msra.mxu0 %v4813_v17  ;;  %4822 = vmatprep.subr.bf16.mxu1 %v4821_v21  ;;  %v4829_v28 = vpack.c.bf16 %v544_v27, %v543_v26  ;;  %v4833_v47 = vpack.c.bf16 %v546_v44, %v545_v43  ;;  %vm288_vm10 = vmand %vm286_vm5, %vm287_vm6  ;;  %vm1831_vm5 = vcmask 1041408  }
 0x14c   :  { %4824 = vmatpush3.bf16.msra.mxu1 %v4821_v21  ;;  %4818 = vmatprep.subr.bf16.mxu0 %v4817_v22  ;;  %vm293_vm11 = vmand %vm291_vm7, %vm292_vm9 }
 0x14d   :  { %4826 = vmatprep.subr.bf16.mxu1 %v4825_v25 }
 0x14f   :  { %4820 = vmatpush3.bf16.msra.mxu0 %v4817_v22 }
 0x150   :  { %4828 = vmatpush3.bf16.msra.mxu1 %v4825_v25  ;;  %4830 = vmatprep.subr.bf16.mxu0 %v4829_v28 }
 0x1d0   :  { %v324_v4 = vpop.xlane.xlu0 %323 }
 0x1d1   :  { %v329_v5 = vmul.f32 0.03125, %v324_v4  ;;  %v4173_v4 = vld [vmem:[#allocation11] ss:$0 sm:$0xff] }
 0x1d3   :  { %v331_v6 = vsub.f32 %v6039_v0, %v329_v5 }
 0x1d4   :  { %v327_v7 = vpop.xlane.xlu0 %326 }
 0x1d5   :  { %v330_v8 = vmul.f32 0.03125, %v327_v7  ;;  %v333_v9 = vmul.f32 %v331_v6, %v331_v6 }
 0x1d7   :  { %v332_v10 = vsub.f32 %v6041_v1, %v330_v8  ;;  %v335_v11 = vsel %vm321_vm0, %v333_v9, 0.0  ;;  %v6143_v9 = vsel %vm288_vm10, 1.0, %v5682_v54 }
 0x1d8   :  { %336 = vadd.xlane.f32.xlu1 %v335_v11 }
 0x1d9   :  { %v334_v12 = vmul.f32 %v332_v10, %v332_v10 }
 0x1db   :  { %v338_v13 = vsel %vm321_vm0, %v334_v12, 0.0 }
 0x1dc   :  { %339 = vadd.xlane.f32.xlu1 %v338_v13 }
 0x265   :  { %v337_v29 = vpop.xlane.xlu1 %336 }
 0x266   :  { %v341_v30 = vmul.f32 0.03125, %v337_v29 }
 0x268   :  { %v343_v31 = vadd.f32 1e-05, %v341_v30 }
 0x269   :  { %v340_v32 = vpop.xlane.xlu1 %339 }
 0x26a   :  { %5122 = vrsqrt.f32 %v343_v31  ;;  %v342_v33 = vmul.f32 0.03125, %v340_v32  ;;  %v301_v31 = vcvt.s32.f32 %v6094_v49 }
 0x26c   :  { %v344_v34 = vadd.f32 1e-05, %v342_v33 }
 0x26e   :  { %5124 = vrsqrt.f32 %v344_v34  ;;  %v311_v34 = vmul.f32 0.5, %v301_v31 }
 0x274   :  { %v5123_v35 = vpop.eup %5122 }
 0x275   :  { %v347_v37 = vmul.f32 %v5123_v35, %v331_v6 }
 0x277   :  { %v355_v39 = vmul.f32 %v4165_v36, %v347_v37  ;;  %v312_v37 = vfloor.f32 %v311_v34 }
 0x278   :  { %v5125_v40 = vpop.eup %5124 }
 0x279   :  { %v348_v41 = vmul.f32 %v5125_v40, %v332_v10  ;;  %v363_v42 = vadd.f32 %v4166_v38, %v355_v39  ;;  %v6146_v10 = vsel %vm293_vm11, 1.0, %v5682_v54  ;;  %v313_v40 = vmul.f32 2.0, %v312_v37 }
 0x27b   :  { %v356_v45 = vmul.f32 %v4165_v36, %v348_v41  ;;  %4497 = vmatprep.mubr.msk.f32.mxu0 %vm321_vm0, %v363_v42  ;;  %4508 = vmatprep.mubr.msk.f32.mxu1 %vm321_vm0, %v363_v42  ;;  %v314_v43 = vsub.f32 %v301_v31, %v313_v40 }
 0x27d   :  { %v364_v46 = vadd.f32 %v4166_v38, %v356_v45  ;;  %v5683_v45 = vmov -1e+30  }
 0x27f   :  { %4498 = vmatmul.mubr.msk.f32.vlgmr.msra.gmra.mrb[0].mxu0 %vm321_vm0, %v364_v46  ;;  %4509 = vmatmul.mubr.msk.f32.vlgmr.msra.gmra.mrb[0].mxu1 %vm321_vm0, %v364_v46 }
 0x280   :  { %4832 = vmatpush3.bf16.msra.mxu0 %v4829_v28  ;;  %4519 = vmatprep.mubr.msk.f32.mxu0 %vm321_vm0, %v363_v42  ;;  %v6181_v28 = vshrl.u32 %v274_v48, 7 }
 0x281   :  { %4834 = vmatprep.subr.bf16.mxu0 %v4833_v47 }
 0x282   :  { %v298_v29 = vadd.s32 8, %v6181_v28  ;;  %v299_v32 = vcvt.s32.f32 %v6181_v28 }
 0x284   :  { %4836 = vmatpush3.bf16.msra.mxu0 %v4833_v47  ;;  %v300_v30 = vcvt.s32.f32 %v298_v29  ;;  %v303_v35 = vmul.f32 0.5, %v299_v32 }
 0x286   :  { %v304_v33 = vmul.f32 0.5, %v300_v30  ;;  %v305_v38 = vfloor.f32 %v303_v35 }
 0x287   :  { %4520 = vmatmul.mubr.msk.f32.vlgmr.msra.gmra.mrb[2].mxu0 %vm321_vm0, %v364_v46 }
 0x288   :  { %v306_v36 = vfloor.f32 %v304_v33  ;;  %v307_v41 = vmul.f32 2.0, %v305_v38 }
 0x28a   :  { %v308_v39 = vmul.f32 2.0, %v306_v36  ;;  %v309_v44 = vsub.f32 %v299_v32, %v307_v41 }
 0x28c   :  { %v310_v42 = vsub.f32 %v300_v30, %v308_v39  ;;  %vm315_vm13 = vcmp.eq.f32.partialorder %v309_v44, %v314_v43 }
 0x28d   :  { %v6188_v47 = vsel %vm315_vm13, 0.0, %v5683_v45 }
 0x28e   :  { %vm316_vm12 = vcmp.eq.f32.partialorder %v310_v42, %v314_v43 }
 0x28f   :  { %v6186_v46 = vsel %vm316_vm12, 0.0, %v5683_v45 }
 0x352   :  { %v4499_v52 = vpop.f32.mrb[0].mxu0  ;;  %v4510_v53 = vpop.f32.mrb[0].mxu1 }
 0x353   :  { %v540_v57 = vadd.f32 %v4510_v53, %v4170_v50  ;;  %v448_v58 = vpop.f32.mrb[1].mxu0  ;;  %v534_v59 = vpop.f32.mrb[1].mxu1  ;;  %v6137_v6 = vadd.f32 %v4499_v52, %v4167_v51 }
 0x354   :  { %v6105_v60 = vadd.f32 %v4167_v51, %v448_v58  ;;  %v535_v61 = vadd.f32 %v4170_v50, %v534_v59 }
 0x355   :  { %v632_v20 = vmul.f32 %v6100_v55, %v6137_v6  ;;  %v748_v21 = vmul.f32 %v6103_v56, %v6137_v6  ;;  %v1020_v27 = vmul.f32 %v6143_v9, %v6137_v6 }
 0x356   :  { %v6117_v63 = vpack.c.bf16 %v540_v57, %v535_v61  ;;  %v631_v2 = vmul.f32 %v6100_v55, %v6105_v60  ;;  %v747_v3 = vmul.f32 %v6103_v56, %v6105_v60  ;;  %v1019_v26 = vmul.f32 %v6143_v9, %v6105_v60 }
 0x358   :  { %4839 = vmatprep.subr.msk.bf16.mxu1 %vm6112_vm8, %v6117_v63  ;;  %4526 = vmatprep.mubr.msk.f32.mxu1 %vm321_vm0, %v631_v2 }
 0x359   :  { %4845 = vmatprep.subr.msk.bf16.mxu0 %vm6112_vm8, %v6117_v63  ;;  %4533 = vmatprep.mubr.msk.f32.mxu0 %vm321_vm0, %v747_v3 }
 0x35a   :  { %v4521_v5 = vpop.f32.mrb[2].mxu0  ;;  %4842 = vmatpush3.bf16.xpose.msk.msra.mxu1 %vm6112_vm8, %v6117_v63  ;;  %4848 = vmatpush3.bf16.xpose.msk.msra.mxu0 %vm6112_vm8, %v6117_v63 }
 0x35b   :  { %v626_v7 = vadd.f32 %v4521_v5, %v4173_v4  ;;  %v620_v8 = vpop.f32.mrb[3].mxu0  ;;  %4859 = vmatprep.subr.msk.bf16.mxu0 %vm6112_vm8, %v6117_v63 }
 0x35c   :  { %v621_v11 = vadd.f32 %v4173_v4, %v620_v8 }
 0x35d   :  { %630 = vst.msk [vmem:[#allocation29 + $0x8] sm:$0xff] %vm321_vm0, %v626_v7  ;;  %v856_v12 = vmul.f32 %v6103_v56, %v626_v7  ;;  %v746_v13 = vmul.f32 %v6100_v55, %v626_v7  ;;  %v1128_v14 = vmul.f32 %v6143_v9, %v626_v7  ;;  %v1321_v15 = vmul.f32 %v6146_v10, %v626_v7 }
 0x35e   :  { %629 = vst.msk [vmem:[#allocation29] sm:$0xff] %vm321_vm0, %v621_v11  ;;  %v855_v16 = vmul.f32 %v6103_v56, %v621_v11  ;;  %v745_v17 = vmul.f32 %v6100_v55, %v621_v11  ;;  %v1127_v18 = vmul.f32 %v6143_v9, %v621_v11  ;;  %v1320_v19 = vmul.f32 %v6146_v10, %v621_v11 }
 0x360   :  { %v4849_v22 = vpack.c.bf16 %v856_v12, %v855_v16  ;;  %v6162_v23 = vpack.c.bf16 %v746_v13, %v745_v17  ;;  %v6164_v24 = vpack.c.bf16 %v1128_v14, %v1127_v18  ;;  %v6166_v25 = vpack.c.bf16 %v1321_v15, %v1320_v19 }
 0x361   :  { %4527 = vmatmul.mubr.msk.f32.vlgmr.msra.gmra.mrb[2].mxu1 %vm321_vm0, %v632_v20  ;;  %4534 = vmatmul.mubr.msk.f32.vlgmr.msra.gmra.mrb[4].mxu0 %vm321_vm0, %v748_v21 }
 0x362   :  { %4850 = vmatprep.subr.bf16.mxu1 %v4849_v22  ;;  %4862 = vmatpush3.bf16.xpose.msk.msra.mxu0 %vm6112_vm8, %v6117_v63 }
 0x363   :  { %4554 = vmatprep.mubr.msk.f32.mxu0 %vm321_vm0, %v1019_v26  ;;  %4852 = vmatpush3.bf16.msra.mxu1 %v4849_v22 }
 0x364   :  { %4854 = vmatprep.subr.bf16.mxu1 %v6162_v23 }
 0x369   :  { %4555 = vmatmul.mubr.msk.f32.vlgmr.msra.gmra.mrb[6].mxu0 %vm321_vm0, %v1020_v27 }
 0x434   :  { %v4528_v48 = vpop.f32.mrb[2].mxu1  ;;  %v4535_v50 = vpop.f32.mrb[4].mxu0 }
 0x435   :  { %v827_v51 = vadd.f32 %v4535_v50, %v6186_v46  ;;  %v711_v52 = vpop.f32.mrb[3].mxu1  ;;  %v821_v53 = vpop.f32.mrb[5].mxu0  ;;  %v717_v58 = vadd.f32 %v4528_v48, %v6186_v46 }
 0x436   :  { %v822_v57 = vadd.f32 %v821_v53, %v6188_v47  ;;  %v712_v61 = vadd.f32 %v711_v52, %v6188_v47 }
 0x437   :  { %v833_v59 = vsel %vm720_vm14, %v827_v51, -inf  ;;  %v724_v3 = vsel %vm720_vm14, %v717_v58, -inf }
 0x438   :  { %834 = vmax.xlane.f32.xlu1 %v833_v59  ;;  %v830_v2 = vsel %vm720_vm14, %v822_v57, -inf  ;;  %v721_v5 = vsel %vm720_vm14, %v712_v61, -inf }
 0x439   :  { %831 = vmax.xlane.f32.xlu0 %v830_v2 }
 0x43c   :  { %v4556_v4 = vpop.f32.mrb[6].mxu0  ;;  %725 = vmax.xlane.f32.xlu1 %v724_v3 }
 0x43d   :  { %v1099_v7 = vadd.f32 %v4556_v4, %v6186_v46  ;;  %v1093_v8 = vpop.f32.mrb[7].mxu0  ;;  %722 = vmax.xlane.f32.xlu0 %v721_v5 }
 0x43e   :  { %v1094_v11 = vadd.f32 %v1093_v8, %v6188_v47 }
 0x43f   :  { %v1105_v12 = vsel %vm720_vm14, %v1099_v7, -inf }
 0x440   :  { %1106 = vmax.xlane.f32.xlu1 %v1105_v12  ;;  %v1102_v13 = vsel %vm720_vm14, %v1094_v11, -inf }
 0x441   :  { %1103 = vmax.xlane.f32.xlu0 %v1102_v13 }
 0x4c5   :  { %v835_v14 = vpop.xlane.xlu1 %834 }
 0x4c6   :  { %v837_v15 = vsub.f32 %v827_v51, %v835_v14  ;;  %v832_v16 = vpop.xlane.xlu0 %831 }
 0x4c7   :  { %v836_v17 = vsub.f32 %v822_v57, %v832_v16 }
 0x4c8   :  { %v840_v18 = vmul.f32 1.442695, %v837_v15 }
 0x4c9   :  { %v838_v19 = vmul.f32 1.442695, %v836_v17  ;;  %v726_v20 = vpop.xlane.xlu1 %725 }
 0x4ca   :  { %5126 = vpow2.f32 %v840_v18  ;;  %v728_v21 = vsub.f32 %v717_v58, %v726_v20  ;;  %v723_v22 = vpop.xlane.xlu0 %722 }
 0x4cb   :  { %5128 = vpow2.f32 %v838_v19  ;;  %v727_v26 = vsub.f32 %v712_v61, %v723_v22 }
 0x4cc   :  { %v731_v27 = vmul.f32 1.442695, %v728_v21 }
 0x4cd   :  { %v729_v29 = vmul.f32 1.442695, %v727_v26  ;;  %v1107_v30 = vpop.xlane.xlu1 %1106 }
 0x4ce   :  { %5130 = vpow2.f32 %v731_v27  ;;  %v1109_v31 = vsub.f32 %v1099_v7, %v1107_v30  ;;  %v1104_v32 = vpop.xlane.xlu0 %1103 }
 0x4cf   :  { %5132 = vpow2.f32 %v729_v29  ;;  %v1108_v33 = vsub.f32 %v1094_v11, %v1104_v32  ;;  %v1405_v32 = vld [vmem:[#allocation13] sm:$0xff] }
 0x4d0   :  { %v1112_v34 = vmul.f32 1.442695, %v1109_v31 }
 0x4d1   :  { %v1110_v35 = vmul.f32 1.442695, %v1108_v33  ;;  %v1406_v33 = vld [vmem:[#allocation13 + $0x8] sm:$0xff] }
 0x4d2   :  { %5134 = vpow2.f32 %v1112_v34  ;;  %v1407_v34 = vld [vmem:[#allocation13 + $0x10] sm:$0xff] }
 0x4d3   :  { %5136 = vpow2.f32 %v1110_v35  ;;  %v4877_v35 = vpack.c.bf16 %v1406_v33, %v1405_v32 }
 0x4d4   :  { %v5127_v36 = vpop.eup %5126 }
 0x4d5   :  { %v5129_v37 = vpop.eup %5128  ;;  %v845_v38 = vsel %vm720_vm14, %v5127_v36, 0.0  ;;  %4878 = vmatprep.subr.bf16.mxu0 %v4877_v35 }
 0x4d6   :  { %846 = vadd.xlane.f32.xlu1 %v845_v38  ;;  %v842_v39 = vsel %vm720_vm14, %v5129_v37, 0.0  ;;  %4880 = vmatpush3.bf16.msra.mxu0 %v4877_v35 }
 0x4d7   :  { %843 = vadd.xlane.f32.xlu0 %v842_v39 }
 0x4d8   :  { %v5131_v40 = vpop.eup %5130 }
 0x4d9   :  { %v5133_v41 = vpop.eup %5132  ;;  %v736_v42 = vsel %vm720_vm14, %v5131_v40, 0.0 }
 0x4da   :  { %737 = vadd.xlane.f32.xlu1 %v736_v42  ;;  %v733_v43 = vsel %vm720_vm14, %v5133_v41, 0.0 }
 0x4db   :  { %734 = vadd.xlane.f32.xlu0 %v733_v43 }
 0x4dc   :  { %v5135_v44 = vpop.eup %5134 }
 0x4dd   :  { %v5137_v45 = vpop.eup %5136  ;;  %v1117_v48 = vsel %vm720_vm14, %v5135_v44, 0.0 }
 0x4de   :  { %1118 = vadd.xlane.f32.xlu1 %v1117_v48  ;;  %v1114_v50 = vsel %vm720_vm14, %v5137_v45, 0.0  ;;  %v4200_v48 = vld [vmem:[#allocation14] ss:$0 sm:$0xff] }
 0x4df   :  { %1115 = vadd.xlane.f32.xlu0 %v1114_v50 }
 0x563   :  { %v847_v51 = vpop.xlane.xlu1 %846 }
 0x564   :  { %5138 = vrcp.f32 %v847_v51  ;;  %v844_v52 = vpop.xlane.xlu0 %843 }
 0x565   :  { %5140 = vrcp.f32 %v844_v52 }
 0x567   :  { %v738_v53 = vpop.xlane.xlu1 %737 }
 0x568   :  { %5142 = vrcp.f32 %v738_v53  ;;  %v735_v57 = vpop.xlane.xlu0 %734 }
 0x569   :  { %5144 = vrcp.f32 %v735_v57 }
 0x56b   :  { %v1119_v58 = vpop.xlane.xlu1 %1118 }
 0x56c   :  { %5146 = vrcp.f32 %v1119_v58  ;;  %v1116_v59 = vpop.xlane.xlu0 %1115 }
 0x56d   :  { %5148 = vrcp.f32 %v1116_v59 }
 0x56e   :  { %v5139_v61 = vpop.eup %5138 }
 0x56f   :  { %v5141_v2 = vpop.eup %5140  ;;  %v851_v3 = vmul.f32 %v5139_v61, %v5127_v36  ;;  %v1408_v36 = vld [vmem:[#allocation13 + $0x18] sm:$0xff] }
 0x570   :  { %v850_v4 = vmul.f32 %v5141_v2, %v5129_v37  ;;  %v4881_v37 = vpack.c.bf16 %v1408_v36, %v1407_v34  ;;  %v4204_v34 = vld [vmem:[#allocation17] ss:$0 sm:$0xff] }
 0x571   :  { %854 = vst.msk [vmem:[#allocation28 + $0x18] sm:$0xff] %vm720_vm14, %v851_v3 }
 0x572   :  { %v5143_v5 = vpop.eup %5142  ;;  %853 = vst.msk [vmem:[#allocation28 + $0x10] sm:$0xff] %vm720_vm14, %v850_v4  ;;  %4540 = vmatprep.mubr.msk.f32.mxu1 %vm720_vm14, %v850_v4  ;;  %4882 = vmatprep.subr.bf16.mxu0 %v4881_v37 }
 0x573   :  { %v5145_v7 = vpop.eup %5144  ;;  %v742_v8 = vmul.f32 %v5143_v5, %v5131_v40  ;;  %4541 = vmatmul.mubr.msk.f32.vlgmr.msra.gmra.mrb[4].mxu1 %vm720_vm14, %v851_v3  ;;  %4884 = vmatpush3.bf16.msra.mxu0 %v4881_v37 }
 0x574   :  { %4856 = vmatpush3.bf16.msra.mxu1 %v6162_v23  ;;  %v741_v11 = vmul.f32 %v5145_v7, %v5133_v41  ;;  %v1212_v23 = vmul.f32 %v6146_v10, %v6105_v60 }
 0x575   :  { %744 = vst.msk [vmem:[#allocation28 + $0x8] sm:$0xff] %vm720_vm14, %v742_v8  ;;  %4864 = vmatprep.subr.bf16.mxu1 %v6164_v24 }
 0x576   :  { %v5147_v12 = vpop.eup %5146  ;;  %743 = vst.msk [vmem:[#allocation28] sm:$0xff] %vm720_vm14, %v741_v11  ;;  %4547 = vmatprep.mubr.msk.f32.mxu1 %vm720_vm14, %v741_v11 }
 0x577   :  { %v5149_v13 = vpop.eup %5148  ;;  %v1123_v14 = vmul.f32 %v5147_v12, %v5135_v44 }
 0x578   :  { %v1122_v15 = vmul.f32 %v5149_v13, %v5137_v45  ;;  %v1543_v13 = vld [vmem:[%s6904_s13] sm:$0xff] }
 0x579   :  { %1126 = vst.msk [vmem:[#allocation28 + $0x28] sm:$0xff] %vm720_vm14, %v1123_v14 }
 0x57a   :  { %1125 = vst.msk [vmem:[#allocation28 + $0x20] sm:$0xff] %vm720_vm14, %v1122_v15 }
 0x57b   :  { %4548 = vmatmul.mubr.msk.f32.vlgmr.msra.gmra.mrb[4].mxu1 %vm720_vm14, %v742_v8 }
 0x57c   :  { %4866 = vmatpush3.bf16.msra.mxu1 %v6164_v24  ;;  %4561 = vmatprep.mubr.msk.f32.mxu1 %vm720_vm14, %v1122_v15  ;;  %v1213_v24 = vmul.f32 %v6146_v10, %v6137_v6  ;;  %v1704_v15 = vld [vmem:[#allocation20] sm:$0xff] }
 0x57d   :  { %4869 = vmatprep.subr.msk.bf16.mxu1 %vm6112_vm8, %v6117_v63 }
 0x583   :  { %4562 = vmatmul.mubr.msk.f32.vlgmr.msra.gmra.mrb[4].mxu1 %vm720_vm14, %v1123_v14  ;;  %v1544_v14 = vld [vmem:[%s6904_s13 + $0x8] sm:$0xff] }
 0x584   :  { %4568 = vmatprep.mubr.msk.f32.mxu1 %vm321_vm0, %v1212_v23  ;;  %v4885_v23 = vpack.c.bf16 %v1544_v14, %v1543_v13 }
 0x585   :  { %4872 = vmatpush3.bf16.xpose.msk.msra.mxu1 %vm6112_vm8, %v6117_v63 }
 0x586   :  { %4874 = vmatprep.subr.bf16.mxu1 %v6166_v25  ;;  %4886 = vmatprep.subr.bf16.mxu0 %v4885_v23 }
 0x58c   :  { %4569 = vmatmul.mubr.msk.f32.vlgmr.msra.gmra.mrb[6].mxu1 %vm321_vm0, %v1213_v24  ;;  %v1705_v24 = vld [vmem:[#allocation20 + $0x8] sm:$0xff] }
 0x58d   :  { %4876 = vmatpush3.bf16.msra.mxu1 %v6166_v25 }
 0x65f   :  { %v4570_v16 = vpop.f32.mrb[6].mxu1 }
 0x660   :  { %v1292_v60 = vadd.f32 %v4570_v16, %v6186_v46  ;;  %v1286_v17 = vpop.f32.mrb[7].mxu1  ;;  %v4893_v16 = vpack.c.bf16 %v1705_v24, %v1704_v15 }
 0x661   :  { %v1287_v18 = vadd.f32 %v1286_v17, %v6188_v47  ;;  %v1546_v17 = vld [vmem:[%s6904_s13 + $0x18] sm:$0xff] }
 0x662   :  { %v1298_v19 = vsel %vm720_vm14, %v1292_v60, -inf  ;;  %4894 = vmatprep.subr.bf16.mxu1 %v4893_v16 }
 0x663   :  { %1299 = vmax.xlane.f32.xlu1 %v1298_v19  ;;  %v1295_v63 = vsel %vm720_vm14, %v1287_v18, -inf }
 0x664   :  { %1296 = vmax.xlane.f32.xlu0 %v1295_v63  ;;  %v1707_v63 = vld [vmem:[#allocation20 + $0x18] sm:$0xff] }
 0x6f0   :  { %v1300_v20 = vpop.xlane.xlu1 %1299 }
 0x6f1   :  { %v1302_v21 = vsub.f32 %v1292_v60, %v1300_v20  ;;  %v1297_v22 = vpop.xlane.xlu0 %1296  ;;  %v1545_v60 = vld [vmem:[%s6904_s13 + $0x10] sm:$0xff] }
 0x6f2   :  { %v1301_v6 = vsub.f32 %v1287_v18, %v1297_v22  ;;  %v1706_v18 = vld [vmem:[#allocation20 + $0x10] sm:$0xff]  ;;  %v4889_v19 = vpack.c.bf16 %v1546_v17, %v1545_v60 }
 0x6f3   :  { %v1305_v26 = vmul.f32 1.442695, %v1302_v21  ;;  %v4897_v20 = vpack.c.bf16 %v1707_v63, %v1706_v18 }
 0x6f4   :  { %v1303_v27 = vmul.f32 1.442695, %v1301_v6 }
 0x6f5   :  { %5150 = vpow2.f32 %v1305_v26 }
 0x6f6   :  { %5152 = vpow2.f32 %v1303_v27 }
 0x6ff   :  { %v5151_v25 = vpop.eup %5150 }
 0x700   :  { %v5153_v29 = vpop.eup %5152  ;;  %v1310_v30 = vsel %vm720_vm14, %v5151_v25, 0.0 }
 0x701   :  { %1311 = vadd.xlane.f32.xlu1 %v1310_v30  ;;  %v1307_v31 = vsel %vm720_vm14, %v5153_v29, 0.0  ;;  %v4203_v30 = vld [vmem:[#allocation16] ss:$0 sm:$0xff] }
 0x702   :  { %1308 = vadd.xlane.f32.xlu0 %v1307_v31 }
 0x78e   :  { %v1312_v38 = vpop.xlane.xlu1 %1311 }
 0x78f   :  { %5154 = vrcp.f32 %v1312_v38  ;;  %v1309_v39 = vpop.xlane.xlu0 %1308 }
 0x790   :  { %5156 = vrcp.f32 %v1309_v39  ;;  %v4205_v39 = vld [vmem:[#allocation19] ss:$0 sm:$0xff] }
 0x799   :  { %v5155_v40 = vpop.eup %5154 }
 0x79a   :  { %v5157_v41 = vpop.eup %5156  ;;  %v1316_v42 = vmul.f32 %v5155_v40, %v5151_v25 }
 0x79b   :  { %v1315_v43 = vmul.f32 %v5157_v41, %v5153_v29 }
 0x79c   :  { %1319 = vst.msk [vmem:[#allocation28 + $0x38] sm:$0xff] %vm720_vm14, %v1316_v42 }
 0x79d   :  { %1318 = vst.msk [vmem:[#allocation28 + $0x30] sm:$0xff] %vm720_vm14, %v1315_v43  ;;  %4575 = vmatprep.mubr.msk.f32.mxu1 %vm720_vm14, %v1315_v43 }
 0x79e   :  { %4576 = vmatmul.mubr.msk.f32.vlgmr.msra.gmra.mrb[4].mxu1 %vm720_vm14, %v1316_v42 }
 0x79f   :  { %4896 = vmatpush3.bf16.msra.mxu1 %v4893_v16 }
 0x7a0   :  { %4898 = vmatprep.subr.bf16.mxu1 %v4897_v20 }
 0x7a3   :  { %4900 = vmatpush3.bf16.msra.mxu1 %v4897_v20 }
 0x871   :  { %v4577_v44 = vpop.f32.mrb[4].mxu1 }
 0x872   :  { %v1394_v45 = vpop.f32.mrb[5].mxu1 }
 0x873   :  { %4586 = vmatprep.mubr.msk.f32.mxu0 %vm321_vm0, %v1394_v45 }
 0x874   :  { %4587 = vmatmul.mubr.msk.f32.vlgmr.msra.gmra.mrb[8].mxu0 %vm321_vm0, %v4577_v44 }
 0x875   :  { %4888 = vmatpush3.bf16.msra.mxu0 %v4885_v23 }
 0x876   :  { %4890 = vmatprep.subr.bf16.mxu0 %v4889_v19 }
 0x879   :  { %4892 = vmatpush3.bf16.msra.mxu0 %v4889_v19 }
 0x947   :  { %v4588_v50 = vpop.f32.mrb[8].mxu0 }
 0x948   :  { %v1494_v51 = vadd.f32 %v4588_v50, %v4200_v48  ;;  %v1488_v52 = vpop.f32.mrb[9].mxu0 }
 0x949   :  { %v1489_v53 = vadd.f32 %v4200_v48, %v1488_v52 }
 0x94a   :  { %v6250_v57 = vadd.f32 %v1494_v51, %v6041_v1 }
 0x94b   :  { %v6253_v58 = vadd.f32 %v1489_v53, %v6039_v0 }
 0x94c   :  { %v1504_v59 = vsel %vm321_vm0, %v6250_v57, 0.0 }
 0x94d   :  { %1505 = vadd.xlane.f32.xlu1 %v1504_v59  ;;  %v1501_v61 = vsel %vm321_vm0, %v6253_v58, 0.0 }
 0x94e   :  { %1502 = vadd.xlane.f32.xlu0 %v1501_v61 }
 0x9da   :  { %v1506_v2 = vpop.xlane.xlu1 %1505 }
 0x9db   :  { %v1508_v3 = vmul.f32 0.03125, %v1506_v2  ;;  %v1503_v4 = vpop.xlane.xlu0 %1502 }
 0x9dc   :  { %v1507_v5 = vmul.f32 0.03125, %v1503_v4 }
 0x9dd   :  { %v1510_v7 = vsub.f32 %v6250_v57, %v1508_v3 }
 0x9de   :  { %v1509_v1 = vsub.f32 %v6253_v58, %v1507_v5 }
 0x9df   :  { %v1512_v8 = vmul.f32 %v1510_v7, %v1510_v7 }
 0x9e0   :  { %v1511_v11 = vmul.f32 %v1509_v1, %v1509_v1 }
 0x9e1   :  { %v1516_v0 = vsel %vm321_vm0, %v1512_v8, 0.0 }
 0x9e2   :  { %1517 = vadd.xlane.f32.xlu1 %v1516_v0  ;;  %v1513_v12 = vsel %vm321_vm0, %v1511_v11, 0.0 }
 0x9e3   :  { %1514 = vadd.xlane.f32.xlu0 %v1513_v12 }
 0xa6f   :  { %v1518_v21 = vpop.xlane.xlu1 %1517 }
 0xa70   :  { %v1520_v22 = vmul.f32 0.03125, %v1518_v21  ;;  %v1515_v6 = vpop.xlane.xlu0 %1514 }
 0xa71   :  { %v1519_v26 = vmul.f32 0.03125, %v1515_v6 }
 0xa72   :  { %v1522_v27 = vadd.f32 1e-05, %v1520_v22 }
 0xa73   :  { %v1521_v25 = vadd.f32 1e-05, %v1519_v26 }
 0xa74   :  { %5158 = vrsqrt.f32 %v1522_v27 }
 0xa75   :  { %5160 = vrsqrt.f32 %v1521_v25 }
 0xa7e   :  { %v5159_v29 = vpop.eup %5158 }
 0xa7f   :  { %v5161_v31 = vpop.eup %5160  ;;  %v1526_v32 = vmul.f32 %v5159_v29, %v1510_v7 }
 0xa80   :  { %v1525_v33 = vmul.f32 %v5161_v31, %v1509_v1 }
 0xa81   :  { %v1534_v35 = vmul.f32 %v4203_v30, %v1526_v32  ;;  %v1824_v32 = vld [vmem:[#allocation23] sm:$0x3] }
 0xa82   :  { %v1533_v36 = vmul.f32 %v4203_v30, %v1525_v33  ;;  %v1808_v33 = vld [vmem:[%s6908_s17] sm:$0xff]  ;;  %4611 = vmatprep.subr.msk.mxu0 %vm1831_vm5, %v1824_v32 }
 0xa83   :  { %v1542_v38 = vadd.f32 %v4204_v34, %v1534_v35 }
 0xa84   :  { %v1541_v37 = vadd.f32 %v4204_v34, %v1533_v36  ;;  %v1809_v34 = vld [vmem:[%s6908_s17 + $0x8] sm:$0xff] }
 0xa85   :  { %v4901_v35 = vpack.c.bf16 %v1809_v34, %v1808_v33 }
 0xa86   :  { %4597 = vmatprep.mubr.msk.f32.mxu0 %vm321_vm0, %v1541_v37  ;;  %4608 = vmatprep.mubr.msk.f32.mxu1 %vm321_vm0, %v1541_v37 }
 0xa87   :  { %4598 = vmatmul.mubr.msk.f32.vlgmr.msra.gmra.mrb[10].mxu0 %vm321_vm0, %v1542_v38  ;;  %4609 = vmatmul.mubr.msk.f32.vlgmr.msra.gmra.mrb[8].mxu1 %vm321_vm0, %v1542_v38 }
 0xa88   :  { %4612 = vmatpush3.msk.msra.mxu0 %vm1831_vm5, %v1824_v32  ;;  %v1823_v32 = vld [vmem:[%s6908_s17 + $0x78] sm:$0xff] }
 0xa89   :  { %4902 = vmatprep.subr.bf16.mxu0 %v4901_v35 }
 0xb5a   :  { %v4599_v40 = vpop.f32.mrb[10].mxu0  ;;  %v6279_v41 = vpop.f32.mrb[8].mxu1 }
 0xb5b   :  { %v1632_v42 = vadd.f32 %v4599_v40, %v4205_v39  ;;  %v1626_v43 = vpop.f32.mrb[11].mxu0  ;;  %v6281_v44 = vpop.f32.mrb[9].mxu1 }
 0xb5c   :  { %v1627_v45 = vadd.f32 %v4205_v39, %v1626_v43 }
 0xb5d   :  { %v1639_v48 = vsel %vm1635_vm15, %v1632_v42, -inf }
 0xb5e   :  { %1640 = vmax.xlane.f32.xlu1 %v1639_v48  ;;  %v1636_v50 = vsel %vm1635_vm15, %v1627_v45, -inf }
 0xb5f   :  { %1637 = vmax.xlane.f32.xlu0 %v1636_v50  ;;  %v4210_v50 = vld [vmem:[#allocation22] ss:$0 sm:$0xff] }
 0xb60   :  { %v1787_v34 = vadd.f32 %v6279_v41, %v4210_v50 }
 0xbeb   :  { %v1641_v51 = vpop.xlane.xlu1 %1640 }
 0xbec   :  { %v1643_v52 = vsub.f32 %v1632_v42, %v1641_v51  ;;  %v1638_v53 = vpop.xlane.xlu0 %1637 }
 0xbed   :  { %v1642_v59 = vsub.f32 %v1627_v45, %v1638_v53  ;;  %v1811_v53 = vld [vmem:[%s6908_s17 + $0x18] sm:$0xff] }
 0xbee   :  { %v1646_v61 = vmul.f32 1.442695, %v1643_v52  ;;  %v1810_v52 = vld [vmem:[%s6908_s17 + $0x10] sm:$0xff] }
 0xbef   :  { %v1644_v2 = vmul.f32 1.442695, %v1642_v59 }
 0xbf0   :  { %5162 = vpow2.f32 %v1646_v61 }
 0xbf1   :  { %5164 = vpow2.f32 %v1644_v2  ;;  %v1782_v2 = vadd.f32 %v4210_v50, %v6281_v44 }
 0xbf3   :  { %v1790_v44 = vmax.f32 %v1782_v2, 0.0  ;;  %v4220_v2 = vld [vmem:[%s6957_s7 + $0x20] sm:$0xff] }
 0xbfa   :  { %v5163_v3 = vpop.eup %5162 }
 0xbfb   :  { %v5165_v4 = vpop.eup %5164  ;;  %v1651_v5 = vsel %vm1635_vm15, %v5163_v3, 0.0 }
 0xbfc   :  { %1652 = vadd.xlane.f32.xlu1 %v1651_v5  ;;  %v1648_v7 = vsel %vm1635_vm15, %v5165_v4, 0.0  ;;  %v4905_v5 = vpack.c.bf16 %v1811_v53, %v1810_v52 }
 0xbfd   :  { %1649 = vadd.xlane.f32.xlu0 %v1648_v7 }
 0xc89   :  { %v1653_v1 = vpop.xlane.xlu1 %1652 }
 0xc8a   :  { %5166 = vrcp.f32 %v1653_v1  ;;  %v1650_v8 = vpop.xlane.xlu0 %1649 }
 0xc8b   :  { %5168 = vrcp.f32 %v1650_v8  ;;  %v1812_v8 = vld [vmem:[%s6908_s17 + $0x20] sm:$0xff] }
 0xc94   :  { %v5167_v11 = vpop.eup %5166 }
 0xc95   :  { %v5169_v0 = vpop.eup %5168  ;;  %v6287_v12 = vmul.f32 %v5167_v11, %v5163_v3  ;;  %v1813_v11 = vld [vmem:[%s6908_s17 + $0x28] sm:$0xff] }
 0xc96   :  { %v6289_v13 = vmul.f32 %v5169_v0, %v5165_v4 }
 0xc97   :  { %v1661_v14 = vsel %vm1635_vm15, %v6287_v12, -inf }
 0xc98   :  { %1662 = vmax.xlane.f32.xlu1 %v1661_v14  ;;  %v1658_v15 = vsel %vm1635_vm15, %v6289_v13, -inf  ;;  %v4909_v14 = vpack.c.bf16 %v1813_v11, %v1812_v8  ;;  %v4227_v8 = vld [vmem:[%s6958_s1 + $0x20] sm:$0xff]  ;;  %v4228_v11 = vld [vmem:[%s6958_s1 + $0x28] sm:$0xff] }
 0xc99   :  { %1659 = vmax.xlane.f32.xlu0 %v1658_v15 }
 0xd25   :  { %v6295_v23 = vpop.xlane.xlu1 %1662 }
 0xd26   :  { %vm1665_vm1 = vcmp.ge.f32.partialorder %v6287_v12, %v6295_v23  ;;  %v6299_v24 = vpop.xlane.xlu0 %1659 }
 0xd27   :  { %v1667_v16 = vsel %vm1665_vm1, %v6094_v49, 2  ;;  %vm1664_vm2 = vcmp.ge.f32.partialorder %v6289_v13, %v6299_v24 }
 0xd28   :  { %v1666_v60 = vsel %vm1664_vm2, %v6094_v49, 2  ;;  %v1683_v17 = vsel %vm1635_vm15, %v1667_v16, 2147483647  ;;  %v1814_v16 = vld [vmem:[%s6908_s17 + $0x30] sm:$0xff] }
 0xd29   :  { %v1685_v18 = vshra.s32 %v1683_v17, 16  ;;  %v1668_v19 = vsel %vm1635_vm15, %v1666_v60, 2147483647  ;;  %v1684_v22 = vand.u32 65535, %v1683_v17  ;;  %v1815_v60 = vld [vmem:[%s6908_s17 + $0x38] sm:$0xff] }
 0xd2a   :  { %v1670_v63 = vshra.s32 %v1668_v19, 16  ;;  %v1669_v6 = vand.u32 65535, %v1668_v19  ;;  %v1816_v19 = vld [vmem:[%s6908_s17 + $0x40] sm:$0xff] }
 0xd2b   :  { %v1687_v20 = vcvt.s32.f32 %v1685_v18  ;;  %v1686_v27 = vcvt.s32.f32 %v1684_v22  ;;  %v4913_v18 = vpack.c.bf16 %v1815_v60, %v1814_v16  ;;  %v1819_v22 = vld [vmem:[%s6908_s17 + $0x58] sm:$0xff] }
 0xd2c   :  { %v1672_v21 = vcvt.s32.f32 %v1670_v63  ;;  %v1671_v29 = vcvt.s32.f32 %v1669_v6  ;;  %v1817_v63 = vld [vmem:[%s6908_s17 + $0x48] sm:$0xff] }
 0xd2d   :  { %1688 = vmin.xlane.f32.xlu1 %v1687_v20 }
 0xd2e   :  { %1673 = vmin.xlane.f32.xlu0 %v1672_v21 }
 0xdba   :  { %v1689_v26 = vpop.xlane.xlu1 %1688 }
 0xdbb   :  { %v1674_v25 = vpop.xlane.xlu0 %1673  ;;  %vm1690_vm3 = vcmp.eq.f32.partialorder %v1687_v20, %v1689_v26  ;;  %v1695_v36 = vcvt.f32.s32 %v1689_v26  ;;  %v4917_v20 = vpack.c.bf16 %v1817_v63, %v1816_v19  ;;  %v4218_v63 = vld [vmem:[#allocation5 + $0x1] ss:$0 sm:$0xff] }
 0xdbc   :  { %v1691_v30 = vsel %vm1690_vm3, %v1686_v27, inf  ;;  %vm1675_vm4 = vcmp.eq.f32.partialorder %v1672_v21, %v1674_v25  ;;  %v1680_v37 = vcvt.f32.s32 %v1674_v25  ;;  %v1818_v21 = vld [vmem:[%s6908_s17 + $0x50] sm:$0xff]  ;;  %v1820_v27 = vld [vmem:[%s6908_s17 + $0x60] sm:$0xff]  ;;  %v1821_v25 = vld [vmem:[%s6908_s17 + $0x68] sm:$0xff] }
 0xdbd   :  { %1692 = vmin.xlane.f32.xlu1 %v1691_v30  ;;  %v1676_v31 = vsel %vm1675_vm4, %v1671_v29, inf  ;;  %v1696_v39 = vshll.u32 %v1695_v36, 16  ;;  %v4921_v26 = vpack.c.bf16 %v1819_v22, %v1818_v21  ;;  %v4925_v30 = vpack.c.bf16 %v1821_v25, %v1820_v27  ;;  %v4229_v25 = vld [vmem:[%s6958_s1 + $0x30] sm:$0xff] }
 0xdbe   :  { %1677 = vmin.xlane.f32.xlu0 %v1676_v31  ;;  %v1681_v43 = vshll.u32 %v1680_v37, 16  ;;  %v1822_v31 = vld [vmem:[%s6908_s17 + $0x70] sm:$0xff]  ;;  %v1791_v36 = vmax.f32 %v1787_v34, 0.0  ;;  %v4235_v34 = vld [vmem:[%s6959_s14 + $0x28] sm:$0xff] }
 0xdbf   :  { %v4929_v33 = vpack.c.bf16 %v1823_v32, %v1822_v31 }
 0xe4a   :  { %v1693_v38 = vpop.xlane.xlu1 %1692 }
 0xe4b   :  { %v1694_v40 = vcvt.f32.s32 %v1693_v38  ;;  %v1678_v42 = vpop.xlane.xlu0 %1677 }
 0xe4c   :  { %v1679_v45 = vcvt.f32.s32 %v1678_v42 }
 0xe4d   :  { %v1697_v48 = vadd.s32 %v1696_v39, %v1694_v40 }
 0xe4e   :  { %v1682_v51 = vadd.s32 %v1681_v43, %v1679_v45 }
 0xe4f   :  { %vm1699_vm6 = vcmp.eq.s32.totalorder %v6094_v49, %v1697_v48  ;;  %v1793_v6 = vmul.u32 64, %v1697_v48 }
 0xe50   :  { %v4209_v59 = vsel %vm1699_vm6, 1.0, %v5682_v54  ;;  %v1792_v61 = vmul.u32 64, %v1682_v51  ;;  %vm1698_vm7 = vcmp.eq.s32.totalorder %v6094_v49, %v1682_v51 }
 0xe51   :  { %v4208_v3 = vsel %vm1698_vm7, 1.0, %v5682_v54  ;;  %v1990_v4 = vsel %vm1635_vm15, %v4209_v59, 0.0  ;;  %v1797_v29 = vadd.s32 64, %v1793_v6  ;;  %vm1795_vm13 = vcmp.ge.s32.totalorder %v6094_v49, %v1793_v6  ;;  %v4219_v6 = vld [vmem:[#allocation7 + $0x1] ss:$0 sm:$0xff] }
 0xe52   :  { %v1796_v7 = vadd.s32 64, %v1792_v61  ;;  %4613 = vmatprep.mubr.msk.f32.mxu0 %vm1635_vm15, %v4208_v3  ;;  %v1989_v1 = vsel %vm1635_vm15, %v4208_v3, 0.0  ;;  %vm1794_vm9 = vcmp.ge.s32.totalorder %v6094_v49, %v1792_v61  ;;  %v4221_v3 = vld [vmem:[%s6957_s7 + $0x28] sm:$0xff] }
 0xe53   :  { %v6335_v0 = vadd.f32 %v1990_v4, %v1989_v1  ;;  %4614 = vmatmul.mubr.msk.f32.vlgmr.msra.gmra.mrb[12].mxu0 %vm1635_vm15, %v4209_v59  ;;  %vm1799_vm12 = vcmp.lt.s32.totalorder %v6094_v49, %v1797_v29  ;;  %v4933_v4 = vpack.c.bf16 %v4221_v3, %v4220_v2  ;;  %v4230_v29 = vld [vmem:[%s6958_s1 + $0x38] sm:$0xff] }
 0xe54   :  { %4904 = vmatpush3.bf16.msra.mxu0 %v4901_v35  ;;  %vm1798_vm10 = vcmp.lt.s32.totalorder %v6094_v49, %v1796_v7  ;;  %vm1801_vm1 = vmand %vm1795_vm13, %vm1799_vm12  ;;  %v4223_v7 = vld [vmem:[%s6957_s7 + $0x38] sm:$0xff]  ;;  %v4945_v32 = vpack.c.bf16 %v4230_v29, %v4229_v25  ;;  %vm2012_vm13 = vcmask 24576  }
 0xe55   :  { %4906 = vmatprep.subr.bf16.mxu0 %v4905_v5  ;;  %vm1800_vm11 = vmand %vm1794_vm9, %vm1798_vm10  ;;  %v4214_v35 = vsel %vm1801_vm1, 1.0, %v5682_v54  ;;  %4934 = vmatprep.subr.bf16.mxu1 %v4933_v4 }
 0xe56   :  { %v4213_v15 = vsel %vm1800_vm11, 1.0, %v5682_v54  ;;  %v1807_v37 = vmul.f32 %v4214_v35, %v1791_v36  ;;  %4936 = vmatpush3.bf16.msra.mxu1 %v4933_v4  ;;  %v4236_v36 = vld [vmem:[%s6959_s14 + $0x30] sm:$0xff] }
 0xe57   :  { %v1806_v17 = vmul.f32 %v4213_v15, %v1790_v44  ;;  %v4941_v44 = vpack.c.bf16 %v4228_v11, %v4227_v8 }
 0xe58   :  { %4908 = vmatpush3.bf16.msra.mxu0 %v4905_v5  ;;  %v4222_v5 = vld [vmem:[%s6957_s7 + $0x30] sm:$0xff] }
 0xe59   :  { %4648 = vmatprep.mubr.f32.mxu0 %v1806_v17  ;;  %4910 = vmatprep.subr.bf16.mxu0 %v4909_v14  ;;  %v4937_v1 = vpack.c.bf16 %v4223_v7, %v4222_v5 }
 0xe5b   :  { %4938 = vmatprep.subr.bf16.mxu1 %v4937_v1 }
 0xe5c   :  { %4912 = vmatpush3.bf16.msra.mxu0 %v4909_v14  ;;  %4940 = vmatpush3.bf16.msra.mxu1 %v4937_v1 }
 0xe5d   :  { %4914 = vmatprep.subr.bf16.mxu0 %v4913_v18  ;;  %4942 = vmatprep.subr.bf16.mxu1 %v4941_v44 }
 0xe60   :  { %4916 = vmatpush3.bf16.msra.mxu0 %v4913_v18 }
 0xe61   :  { %4918 = vmatprep.subr.bf16.mxu0 %v4917_v20 }
 0xe64   :  { %4920 = vmatpush3.bf16.msra.mxu0 %v4917_v20 }
 0xe65   :  { %4922 = vmatprep.subr.bf16.mxu0 %v4921_v26 }
 0xe68   :  { %4924 = vmatpush3.bf16.msra.mxu0 %v4921_v26 }
 0xe69   :  { %4926 = vmatprep.subr.bf16.mxu0 %v4925_v30 }
 0xe6c   :  { %4928 = vmatpush3.bf16.msra.mxu0 %v4925_v30 }
 0xe6d   :  { %4930 = vmatprep.subr.bf16.mxu0 %v4929_v33 }
 0xe70   :  { %4932 = vmatpush3.bf16.msra.mxu0 %v4929_v33  ;;  %v4234_v33 = vld [vmem:[%s6959_s14 + $0x20] sm:$0xff] }
 0xe71   :  { %v4949_v35 = vpack.c.bf16 %v4235_v34, %v4234_v33 }
 0xe73   :  { %4649 = vmatmul.mubr.f32.vlgmr.msra.gmra.mrb[12].mxu0 %v1807_v37  ;;  %v4237_v37 = vld [vmem:[%s6959_s14 + $0x38] sm:$0xff] }
 0xf46   :  { %v4650_v38 = vpop.f32.mrb[12].mxu0 }
 0xf47   :  { %v1986_v39 = vmul.f32 %v4650_v38, %v6295_v23  ;;  %v1976_v40 = vpop.f32.mrb[13].mxu0  ;;  %v4953_v38 = vpack.c.bf16 %v4237_v37, %v4236_v36 }
 0xf48   :  { %v1985_v42 = vmul.f32 %v1976_v40, %v6299_v24 }
 0xf49   :  { %v6378_v43 = vadd.f32 %v1986_v39, %v6250_v57  ;;  %v4224_v39 = vld [vmem:[#allocation8 + $0x1] ss:$0 sm:$0xff] }
 0xf4a   :  { %v6381_v41 = vadd.f32 %v1985_v42, %v6253_v58 }
 0xf4b   :  { %v2021_v45 = vsel %vm321_vm0, %v6378_v43, 0.0 }
 0xf4c   :  { %2022 = vadd.xlane.f32.xlu1 %v2021_v45  ;;  %v2018_v48 = vsel %vm321_vm0, %v6381_v41, 0.0 }
 0xf4d   :  { %2019 = vadd.xlane.f32.xlu0 %v2018_v48 }
 0xfd9   :  { %v2023_v50 = vpop.xlane.xlu1 %2022 }
 0xfda   :  { %v2025_v51 = vmul.f32 0.03125, %v2023_v50  ;;  %v2020_v23 = vpop.xlane.xlu0 %2019  ;;  %v4231_v50 = vld [vmem:[#allocation10 + $0x1] ss:$0 sm:$0xff] }
 0xfdb   :  { %v2024_v52 = vmul.f32 0.03125, %v2020_v23 }
 0xfdc   :  { %v2027_v24 = vsub.f32 %v6378_v43, %v2025_v51 }
 0xfdd   :  { %v2026_v57 = vsub.f32 %v6381_v41, %v2024_v52 }
 0xfde   :  { %v2029_v53 = vmul.f32 %v2027_v24, %v2027_v24 }
 0xfdf   :  { %v2028_v59 = vmul.f32 %v2026_v57, %v2026_v57 }
 0xfe0   :  { %v2033_v58 = vsel %vm321_vm0, %v2029_v53, 0.0 }
 0xfe1   :  { %2034 = vadd.xlane.f32.xlu1 %v2033_v58  ;;  %v2030_v61 = vsel %vm321_vm0, %v2028_v59, 0.0  ;;  %v4238_v59 = vld [vmem:[#allocation11 + $0x1] ss:$0 sm:$0xff] }
 0xfe2   :  { %2031 = vadd.xlane.f32.xlu0 %v2030_v61 }
0x106e   :  { %v2035_v14 = vpop.xlane.xlu1 %2034 }
0x106f   :  { %v2037_v15 = vmul.f32 0.03125, %v2035_v14  ;;  %v2032_v16 = vpop.xlane.xlu0 %2031 }
0x1070   :  { %v2036_v60 = vmul.f32 0.03125, %v2032_v16 }
0x1071   :  { %v2039_v17 = vadd.f32 1e-05, %v2037_v15 }
0x1072   :  { %v2038_v18 = vadd.f32 1e-05, %v2036_v60 }
0x1073   :  { %5170 = vrsqrt.f32 %v2039_v17 }
0x1074   :  { %5172 = vrsqrt.f32 %v2038_v18 }
0x107d   :  { %v5171_v19 = vpop.eup %5170 }
0x107e   :  { %v5173_v20 = vpop.eup %5172  ;;  %v2043_v21 = vmul.f32 %v5171_v19, %v2027_v24 }
0x107f   :  { %v2042_v22 = vmul.f32 %v5173_v20, %v2026_v57 }
0x1080   :  { %v2051_v26 = vmul.f32 %v4218_v63, %v2043_v21 }
0x1081   :  { %v2050_v27 = vmul.f32 %v4218_v63, %v2042_v22 }
0x1082   :  { %v2059_v31 = vadd.f32 %v4219_v6, %v2051_v26 }
0x1083   :  { %v2058_v30 = vadd.f32 %v4219_v6, %v2050_v27 }
0x1085   :  { %4659 = vmatprep.mubr.msk.f32.mxu1 %vm321_vm0, %v2058_v30 }
0x1086   :  { %4660 = vmatmul.mubr.msk.f32.vlgmr.msra.gmra.mrb[10].mxu1 %vm321_vm0, %v2059_v31 }
0x1087   :  { %4944 = vmatpush3.bf16.msra.mxu1 %v4941_v44  ;;  %4670 = vmatprep.mubr.msk.f32.mxu1 %vm321_vm0, %v2058_v30 }
0x1088   :  { %4946 = vmatprep.subr.bf16.mxu1 %v4945_v32 }
0x108b   :  { %4948 = vmatpush3.bf16.msra.mxu1 %v4945_v32 }
0x108c   :  { %4950 = vmatprep.subr.bf16.mxu1 %v4949_v35 }
0x108e   :  { %4671 = vmatmul.mubr.msk.f32.vlgmr.msra.gmra.mrb[12].mxu1 %vm321_vm0, %v2059_v31 }
0x108f   :  { %4952 = vmatpush3.bf16.msra.mxu1 %v4949_v35  ;;  %4681 = vmatprep.mubr.msk.f32.mxu1 %vm321_vm0, %v2058_v30 }
0x1090   :  { %4954 = vmatprep.subr.bf16.mxu1 %v4953_v38 }
0x1093   :  { %4956 = vmatpush3.bf16.msra.mxu1 %v4953_v38 }
0x1096   :  { %4682 = vmatmul.mubr.msk.f32.vlgmr.msra.gmra.mrb[14].mxu1 %vm321_vm0, %v2059_v31 }
0x1159   :  { %v4661_v40 = vpop.f32.mrb[10].mxu1 }
0x115a   :  { %v2145_v42 = vpop.f32.mrb[11].mxu1  ;;  %v6440_v53 = vadd.f32 %v4661_v40, %v4224_v39 }
0x115b   :  { %v6433_v45 = vadd.f32 %v4224_v39, %v2145_v42 }
0x115c   :  { %v2334_v3 = vmul.f32 %v6100_v55, %v6440_v53  ;;  %v2722_v20 = vmul.f32 %v6143_v9, %v6440_v53 }
0x115d   :  { %v2333_v48 = vmul.f32 %v6100_v55, %v6433_v45  ;;  %v2449_v16 = vmul.f32 %v6103_v56, %v6433_v45  ;;  %v2721_v63 = vmul.f32 %v6143_v9, %v6433_v45 }
0x115f   :  { %4688 = vmatprep.mubr.msk.f32.mxu1 %vm321_vm0, %v2333_v48 }
0x1161   :  { %v4672_v51 = vpop.f32.mrb[12].mxu1 }
0x1162   :  { %v2239_v23 = vadd.f32 %v4672_v51, %v4231_v50  ;;  %v2233_v52 = vpop.f32.mrb[13].mxu1 }
0x1163   :  { %v2234_v24 = vadd.f32 %v4231_v50, %v2233_v52 }
0x1165   :  { %v6438_v57 = vpack.c.bf16 %v2239_v23, %v2234_v24 }
0x1167   :  { %4959 = vmatprep.subr.msk.bf16.mxu1 %vm6112_vm8, %v6438_v57 }
0x1168   :  { %4962 = vmatpush3.bf16.xpose.msk.msra.mxu1 %vm6112_vm8, %v6438_v57 }
0x1169   :  { %v4683_v58 = vpop.f32.mrb[14].mxu1  ;;  %4965 = vmatprep.subr.msk.bf16.mxu1 %vm6112_vm8, %v6438_v57 }
0x116a   :  { %v2327_v61 = vadd.f32 %v4683_v58, %v4238_v59  ;;  %v2321_v2 = vpop.f32.mrb[15].mxu1 }
0x116b   :  { %v2322_v4 = vadd.f32 %v4238_v59, %v2321_v2 }
0x116c   :  { %2332 = vst.msk [vmem:[#allocation29 + $0x18] sm:$0xff] %vm321_vm0, %v2327_v61  ;;  %v2558_v5 = vmul.f32 %v6103_v56, %v2327_v61  ;;  %v2448_v7 = vmul.f32 %v6100_v55, %v2327_v61  ;;  %v2830_v1 = vmul.f32 %v6143_v9, %v2327_v61  ;;  %v3023_v8 = vmul.f32 %v6146_v10, %v2327_v61 }
0x116d   :  { %2331 = vst.msk [vmem:[#allocation29 + $0x10] sm:$0xff] %vm321_vm0, %v2322_v4  ;;  %v2557_v11 = vmul.f32 %v6103_v56, %v2322_v4  ;;  %v2447_v44 = vmul.f32 %v6100_v55, %v2322_v4  ;;  %v2829_v14 = vmul.f32 %v6143_v9, %v2322_v4  ;;  %v3022_v15 = vmul.f32 %v6146_v10, %v2322_v4 }
0x116e   :  { %v2450_v55 = vmul.f32 %v6103_v56, %v6440_v53 }
0x116f   :  { %4689 = vmatmul.mubr.msk.f32.vlgmr.msra.gmra.mrb[16].mxu1 %vm321_vm0, %v2334_v3  ;;  %v4969_v60 = vpack.c.bf16 %v2558_v5, %v2557_v11  ;;  %v6466_v17 = vpack.c.bf16 %v2448_v7, %v2447_v44  ;;  %v6468_v18 = vpack.c.bf16 %v2830_v1, %v2829_v14  ;;  %v6470_v19 = vpack.c.bf16 %v3023_v8, %v3022_v15 }
0x1170   :  { %4968 = vmatpush3.bf16.xpose.msk.msra.mxu1 %vm6112_vm8, %v6438_v57  ;;  %4695 = vmatprep.mubr.msk.f32.mxu1 %vm321_vm0, %v2449_v16 }
0x1171   :  { %4970 = vmatprep.subr.bf16.mxu0 %v4969_v60  ;;  %4979 = vmatprep.subr.msk.bf16.mxu1 %vm6112_vm8, %v6438_v57 }
0x1172   :  { %4972 = vmatpush3.bf16.msra.mxu0 %v4969_v60 }
0x1173   :  { %4974 = vmatprep.subr.bf16.mxu0 %v6466_v17 }
0x1177   :  { %4696 = vmatmul.mubr.msk.f32.vlgmr.msra.gmra.mrb[18].mxu1 %vm321_vm0, %v2450_v55 }
0x1178   :  { %4982 = vmatpush3.bf16.xpose.msk.msra.mxu1 %vm6112_vm8, %v6438_v57  ;;  %4716 = vmatprep.mubr.msk.f32.mxu1 %vm321_vm0, %v2721_v63 }
0x117f   :  { %4717 = vmatmul.mubr.msk.f32.vlgmr.msra.gmra.mrb[20].mxu1 %vm321_vm0, %v2722_v20 }
0x1242   :  { %v4690_v21 = vpop.f32.mrb[16].mxu1 }
0x1243   :  { %v2413_v22 = vpop.f32.mrb[17].mxu1  ;;  %v2419_v25 = vadd.f32 %v4690_v21, %v6186_v46 }
0x1244   :  { %v2414_v30 = vadd.f32 %v2413_v22, %v6188_v47 }
0x1245   :  { %v2425_v9 = vsel %vm720_vm14, %v2419_v25, -inf }
0x1246   :  { %v2422_v33 = vsel %vm720_vm14, %v2414_v30, -inf }
0x124a   :  { %v4697_v6 = vpop.f32.mrb[18].mxu1 }
0x124b   :  { %v2529_v56 = vadd.f32 %v4697_v6, %v6186_v46  ;;  %v2523_v26 = vpop.f32.mrb[19].mxu1 }
0x124c   :  { %v2524_v27 = vadd.f32 %v2523_v26, %v6188_v47 }
0x124d   :  { %v2535_v29 = vsel %vm720_vm14, %v2529_v56, -inf }
0x124e   :  { %2536 = vmax.xlane.f32.xlu1 %v2535_v29  ;;  %v2532_v31 = vsel %vm720_vm14, %v2524_v27, -inf }
0x124f   :  { %2533 = vmax.xlane.f32.xlu0 %v2532_v31 }
0x1252   :  { %2426 = vmax.xlane.f32.xlu1 %v2425_v9  ;;  %v4718_v32 = vpop.f32.mrb[20].mxu1 }
0x1253   :  { %v2801_v34 = vadd.f32 %v4718_v32, %v6186_v46  ;;  %v2795_v35 = vpop.f32.mrb[21].mxu1  ;;  %2423 = vmax.xlane.f32.xlu0 %v2422_v33 }
0x1254   :  { %v2796_v36 = vadd.f32 %v2795_v35, %v6188_v47 }
0x1255   :  { %v2807_v37 = vsel %vm720_vm14, %v2801_v34, -inf }
0x1256   :  { %2808 = vmax.xlane.f32.xlu1 %v2807_v37  ;;  %v2804_v38 = vsel %vm720_vm14, %v2796_v36, -inf }
0x1257   :  { %2805 = vmax.xlane.f32.xlu0 %v2804_v38 }
0x12db   :  { %v2537_v39 = vpop.xlane.xlu1 %2536 }
0x12dc   :  { %v2539_v40 = vsub.f32 %v2529_v56, %v2537_v39  ;;  %v2534_v42 = vpop.xlane.xlu0 %2533 }
0x12dd   :  { %v2538_v48 = vsub.f32 %v2524_v27, %v2534_v42 }
0x12de   :  { %v2542_v50 = vmul.f32 1.442695, %v2539_v40 }
0x12df   :  { %v2540_v51 = vmul.f32 1.442695, %v2538_v48  ;;  %v2427_v23 = vpop.xlane.xlu1 %2426 }
0x12e0   :  { %5174 = vpow2.f32 %v2542_v50  ;;  %v2429_v52 = vsub.f32 %v2419_v25, %v2427_v23  ;;  %v2424_v24 = vpop.xlane.xlu0 %2423 }
0x12e1   :  { %5176 = vpow2.f32 %v2540_v51  ;;  %v2428_v59 = vsub.f32 %v2414_v30, %v2424_v24 }
0x12e2   :  { %v2432_v58 = vmul.f32 1.442695, %v2429_v52 }
0x12e3   :  { %v2430_v61 = vmul.f32 1.442695, %v2428_v59  ;;  %v2809_v2 = vpop.xlane.xlu1 %2808 }
0x12e4   :  { %5178 = vpow2.f32 %v2432_v58  ;;  %v2811_v3 = vsub.f32 %v2801_v34, %v2809_v2  ;;  %v2806_v4 = vpop.xlane.xlu0 %2805  ;;  %v3108_v58 = vld [vmem:[#allocation13 + $0x20] sm:$0xff]  ;;  %v3110_v2 = vld [vmem:[#allocation13 + $0x30] sm:$0xff] }
0x12e5   :  { %5180 = vpow2.f32 %v2430_v61  ;;  %v2810_v5 = vsub.f32 %v2796_v36, %v2806_v4  ;;  %v3109_v61 = vld [vmem:[#allocation13 + $0x28] sm:$0xff]  ;;  %v3111_v4 = vld [vmem:[#allocation13 + $0x38] sm:$0xff] }
0x12e6   :  { %v2814_v7 = vmul.f32 1.442695, %v2811_v3  ;;  %v4997_v3 = vpack.c.bf16 %v3109_v61, %v3108_v58 }
0x12e7   :  { %v2812_v1 = vmul.f32 1.442695, %v2810_v5  ;;  %v5001_v5 = vpack.c.bf16 %v3111_v4, %v3110_v2 }
0x12e8   :  { %5182 = vpow2.f32 %v2814_v7  ;;  %4998 = vmatprep.subr.bf16.mxu1 %v4997_v3 }
0x12e9   :  { %5184 = vpow2.f32 %v2812_v1  ;;  %5000 = vmatpush3.bf16.msra.mxu1 %v4997_v3  ;;  %v4274_v3 = vld [vmem:[#allocation19 + $0x1] ss:$0 sm:$0xff] }
0x12ea   :  { %v5175_v8 = vpop.eup %5174  ;;  %5002 = vmatprep.subr.bf16.mxu1 %v5001_v5 }
0x12eb   :  { %v5177_v11 = vpop.eup %5176  ;;  %v2547_v44 = vsel %vm720_vm14, %v5175_v8, 0.0 }
0x12ec   :  { %2548 = vadd.xlane.f32.xlu1 %v2547_v44  ;;  %v2544_v14 = vsel %vm720_vm14, %v5177_v11, 0.0 }
0x12ed   :  { %2545 = vadd.xlane.f32.xlu0 %v2544_v14  ;;  %5004 = vmatpush3.bf16.msra.mxu1 %v5001_v5 }
0x12ee   :  { %v5179_v15 = vpop.eup %5178 }
0x12ef   :  { %v5181_v16 = vpop.eup %5180  ;;  %v2437_v60 = vsel %vm720_vm14, %v5179_v15, 0.0 }
0x12f0   :  { %2438 = vadd.xlane.f32.xlu1 %v2437_v60  ;;  %v2434_v55 = vsel %vm720_vm14, %v5181_v16, 0.0  ;;  %v4265_v60 = vld [vmem:[#allocation14 + $0x1] ss:$0 sm:$0xff] }
0x12f1   :  { %2435 = vadd.xlane.f32.xlu0 %v2434_v55 }
0x12f2   :  { %v5183_v63 = vpop.eup %5182 }
0x12f3   :  { %v5185_v20 = vpop.eup %5184  ;;  %v2819_v21 = vsel %vm720_vm14, %v5183_v63, 0.0 }
0x12f4   :  { %2820 = vadd.xlane.f32.xlu1 %v2819_v21  ;;  %v2816_v22 = vsel %vm720_vm14, %v5185_v20, 0.0 }
0x12f5   :  { %2817 = vadd.xlane.f32.xlu0 %v2816_v22 }
0x1379   :  { %v2549_v6 = vpop.xlane.xlu1 %2548 }
0x137a   :  { %5186 = vrcp.f32 %v2549_v6  ;;  %v2546_v56 = vpop.xlane.xlu0 %2545 }
0x137b   :  { %5188 = vrcp.f32 %v2546_v56 }
0x137d   :  { %v2439_v26 = vpop.xlane.xlu1 %2438 }
0x137e   :  { %5190 = vrcp.f32 %v2439_v26  ;;  %v2436_v27 = vpop.xlane.xlu0 %2435 }
0x137f   :  { %5192 = vrcp.f32 %v2436_v27 }
0x1381   :  { %v2821_v25 = vpop.xlane.xlu1 %2820 }
0x1382   :  { %5194 = vrcp.f32 %v2821_v25  ;;  %v2818_v29 = vpop.xlane.xlu0 %2817 }
0x1383   :  { %5196 = vrcp.f32 %v2818_v29 }
0x1384   :  { %v5187_v30 = vpop.eup %5186 }
0x1385   :  { %v5189_v31 = vpop.eup %5188  ;;  %v2553_v9 = vmul.f32 %v5187_v30, %v5175_v8 }
0x1386   :  { %v2552_v32 = vmul.f32 %v5189_v31, %v5177_v11 }
0x1387   :  { %2556 = vst.msk [vmem:[#allocation28 + $0x58] sm:$0xff] %vm720_vm14, %v2553_v9 }
0x1388   :  { %v5191_v33 = vpop.eup %5190  ;;  %2555 = vst.msk [vmem:[#allocation28 + $0x50] sm:$0xff] %vm720_vm14, %v2552_v32  ;;  %4702 = vmatprep.mubr.msk.f32.mxu0 %vm720_vm14, %v2552_v32 }
0x1389   :  { %v5193_v34 = vpop.eup %5192  ;;  %v2443_v35 = vmul.f32 %v5191_v33, %v5179_v15  ;;  %4703 = vmatmul.mubr.msk.f32.vlgmr.msra.gmra.mrb[14].mxu0 %vm720_vm14, %v2553_v9 }
0x138a   :  { %4976 = vmatpush3.bf16.msra.mxu0 %v6466_v17  ;;  %v2442_v36 = vmul.f32 %v5193_v34, %v5181_v16  ;;  %v2914_v17 = vmul.f32 %v6146_v10, %v6433_v45  ;;  %v4270_v34 = vld [vmem:[%s6904_s13 + $0x20] sm:$0xff] }
0x138b   :  { %2446 = vst.msk [vmem:[#allocation28 + $0x48] sm:$0xff] %vm720_vm14, %v2443_v35  ;;  %4984 = vmatprep.subr.bf16.mxu0 %v6468_v18 }
0x138c   :  { %v5195_v37 = vpop.eup %5194  ;;  %2445 = vst.msk [vmem:[#allocation28 + $0x40] sm:$0xff] %vm720_vm14, %v2442_v36  ;;  %4709 = vmatprep.mubr.msk.f32.mxu0 %vm720_vm14, %v2442_v36  ;;  %v3412_v36 = vld [vmem:[#allocation20 + $0x20] sm:$0xff] }
0x138d   :  { %v5197_v38 = vpop.eup %5196  ;;  %v2825_v39 = vmul.f32 %v5195_v37, %v5183_v63 }
0x138e   :  { %v2824_v40 = vmul.f32 %v5197_v38, %v5185_v20  ;;  %v3413_v38 = vld [vmem:[#allocation20 + $0x28] sm:$0xff] }
0x138f   :  { %2828 = vst.msk [vmem:[#allocation28 + $0x68] sm:$0xff] %vm720_vm14, %v2825_v39 }
0x1390   :  { %2827 = vst.msk [vmem:[#allocation28 + $0x60] sm:$0xff] %vm720_vm14, %v2824_v40 }
0x1391   :  { %4710 = vmatmul.mubr.msk.f32.vlgmr.msra.gmra.mrb[14].mxu0 %vm720_vm14, %v2443_v35  ;;  %v4271_v35 = vld [vmem:[%s6904_s13 + $0x28] sm:$0xff] }
0x1392   :  { %4986 = vmatpush3.bf16.msra.mxu0 %v6468_v18  ;;  %4723 = vmatprep.mubr.msk.f32.mxu0 %vm720_vm14, %v2824_v40  ;;  %v2915_v18 = vmul.f32 %v6146_v10, %v6440_v53  ;;  %v5005_v37 = vpack.c.bf16 %v4271_v35, %v4270_v34  ;;  %v4272_v40 = vld [vmem:[%s6904_s13 + $0x30] sm:$0xff] }
0x1393   :  { %4989 = vmatprep.subr.msk.bf16.mxu0 %vm6112_vm8, %v6438_v57 }
0x1394   :  { %5006 = vmatprep.subr.bf16.mxu1 %v5005_v37 }
0x1399   :  { %4724 = vmatmul.mubr.msk.f32.vlgmr.msra.gmra.mrb[14].mxu0 %vm720_vm14, %v2825_v39  ;;  %v5013_v39 = vpack.c.bf16 %v3413_v38, %v3412_v36 }
0x139a   :  { %4730 = vmatprep.mubr.msk.f32.mxu0 %vm321_vm0, %v2914_v17  ;;  %v4273_v17 = vld [vmem:[%s6904_s13 + $0x38] sm:$0xff] }
0x139b   :  { %4992 = vmatpush3.bf16.xpose.msk.msra.mxu0 %vm6112_vm8, %v6438_v57 }
0x139c   :  { %4994 = vmatprep.subr.bf16.mxu0 %v6470_v19 }
0x13a2   :  { %4731 = vmatmul.mubr.msk.f32.vlgmr.msra.gmra.mrb[16].mxu0 %vm321_vm0, %v2915_v18  ;;  %v3414_v18 = vld [vmem:[#allocation20 + $0x30] sm:$0xff] }
0x13a3   :  { %4996 = vmatpush3.bf16.msra.mxu0 %v6470_v19 }
0x13a4   :  { %5014 = vmatprep.subr.bf16.mxu0 %v5013_v39 }
0x1475   :  { %v4732_v42 = vpop.f32.mrb[16].mxu0 }
0x1476   :  { %v2994_v45 = vadd.f32 %v4732_v42, %v6186_v46  ;;  %v2988_v48 = vpop.f32.mrb[17].mxu0  ;;  %v5009_v42 = vpack.c.bf16 %v4273_v17, %v4272_v40 }
0x1477   :  { %v2989_v50 = vadd.f32 %v2988_v48, %v6188_v47 }
0x1478   :  { %v3000_v51 = vsel %vm720_vm14, %v2994_v45, -inf }
0x1479   :  { %3001 = vmax.xlane.f32.xlu1 %v3000_v51  ;;  %v2997_v62 = vsel %vm720_vm14, %v2989_v50, -inf }
0x147a   :  { %2998 = vmax.xlane.f32.xlu0 %v2997_v62 }
0x1506   :  { %v3002_v57 = vpop.xlane.xlu1 %3001 }
0x1507   :  { %v3004_v23 = vsub.f32 %v2994_v45, %v3002_v57  ;;  %v2999_v52 = vpop.xlane.xlu0 %2998  ;;  %v3415_v45 = vld [vmem:[#allocation20 + $0x38] sm:$0xff] }
0x1508   :  { %v3003_v10 = vsub.f32 %v2989_v50, %v2999_v52  ;;  %v5017_v48 = vpack.c.bf16 %v3415_v45, %v3414_v18 }
0x1509   :  { %v3007_v53 = vmul.f32 1.442695, %v3004_v23 }
0x150a   :  { %v3005_v24 = vmul.f32 1.442695, %v3003_v10 }
0x150b   :  { %5198 = vpow2.f32 %v3007_v53  ;;  %v4268_v53 = vld [vmem:[#allocation16 + $0x1] ss:$0 sm:$0xff] }
0x150c   :  { %5200 = vpow2.f32 %v3005_v24 }
0x1515   :  { %v5199_v19 = vpop.eup %5198 }
0x1516   :  { %v5201_v59 = vpop.eup %5200  ;;  %v3012_v46 = vsel %vm720_vm14, %v5199_v19, 0.0 }
0x1517   :  { %3013 = vadd.xlane.f32.xlu1 %v3012_v46  ;;  %v3009_v47 = vsel %vm720_vm14, %v5201_v59, 0.0  ;;  %v4269_v46 = vld [vmem:[#allocation17 + $0x1] ss:$0 sm:$0xff] }
0x1518   :  { %3010 = vadd.xlane.f32.xlu0 %v3009_v47 }
0x15a4   :  { %v3014_v7 = vpop.xlane.xlu1 %3013 }
0x15a5   :  { %5202 = vrcp.f32 %v3014_v7  ;;  %v3011_v1 = vpop.xlane.xlu0 %3010 }
0x15a6   :  { %5204 = vrcp.f32 %v3011_v1 }
0x15af   :  { %v5203_v8 = vpop.eup %5202 }
0x15b0   :  { %v5205_v11 = vpop.eup %5204  ;;  %v3018_v44 = vmul.f32 %v5203_v8, %v5199_v19 }
0x15b1   :  { %v3017_v14 = vmul.f32 %v5205_v11, %v5201_v59 }
0x15b2   :  { %3021 = vst.msk [vmem:[#allocation28 + $0x78] sm:$0xff] %vm720_vm14, %v3018_v44 }
0x15b3   :  { %3020 = vst.msk [vmem:[#allocation28 + $0x70] sm:$0xff] %vm720_vm14, %v3017_v14  ;;  %4737 = vmatprep.mubr.msk.f32.mxu0 %vm720_vm14, %v3017_v14 }
0x15b4   :  { %4738 = vmatmul.mubr.msk.f32.vlgmr.msra.gmra.mrb[14].mxu0 %vm720_vm14, %v3018_v44 }
0x15b5   :  { %5016 = vmatpush3.bf16.msra.mxu0 %v5013_v39 }
0x15b6   :  { %5018 = vmatprep.subr.bf16.mxu0 %v5017_v48 }
0x15b9   :  { %5020 = vmatpush3.bf16.msra.mxu0 %v5017_v48 }
0x1687   :  { %v4739_v15 = vpop.f32.mrb[14].mxu0 }
0x1688   :  { %v3096_v16 = vpop.f32.mrb[15].mxu0 }
0x1689   :  { %4748 = vmatprep.mubr.msk.f32.mxu1 %vm321_vm0, %v3096_v16 }
0x168a   :  { %4749 = vmatmul.mubr.msk.f32.vlgmr.msra.gmra.mrb[22].mxu1 %vm321_vm0, %v4739_v15 }
0x168b   :  { %5008 = vmatpush3.bf16.msra.mxu1 %v5005_v37 }
0x168c   :  { %5010 = vmatprep.subr.bf16.mxu1 %v5009_v42 }
0x168f   :  { %5012 = vmatpush3.bf16.msra.mxu1 %v5009_v42 }
0x175d   :  { %v4750_v55 = vpop.f32.mrb[22].mxu1 }
0x175e   :  { %v3198_v63 = vadd.f32 %v4750_v55, %v4265_v60  ;;  %v3192_v20 = vpop.f32.mrb[23].mxu1 }
0x175f   :  { %v3193_v21 = vadd.f32 %v4265_v60, %v3192_v20 }
0x1760   :  { %v6552_v22 = vadd.f32 %v3198_v63, %v6378_v43 }
0x1761   :  { %v6555_v6 = vadd.f32 %v3193_v21, %v6381_v41 }
0x1762   :  { %v3210_v56 = vsel %vm321_vm0, %v6552_v22, 0.0 }
0x1763   :  { %3211 = vadd.xlane.f32.xlu1 %v3210_v56  ;;  %v3207_v26 = vsel %vm321_vm0, %v6555_v6, 0.0 }
0x1764   :  { %3208 = vadd.xlane.f32.xlu0 %v3207_v26 }
0x17f0   :  { %v3212_v27 = vpop.xlane.xlu1 %3211 }
0x17f1   :  { %v3214_v25 = vmul.f32 0.03125, %v3212_v27  ;;  %v3209_v29 = vpop.xlane.xlu0 %3208 }
0x17f2   :  { %v3213_v30 = vmul.f32 0.03125, %v3209_v29 }
0x17f3   :  { %v3216_v31 = vsub.f32 %v6552_v22, %v3214_v25 }
0x17f4   :  { %v3215_v43 = vsub.f32 %v6555_v6, %v3213_v30 }
0x17f5   :  { %v3218_v9 = vmul.f32 %v3216_v31, %v3216_v31 }
0x17f6   :  { %v3217_v32 = vmul.f32 %v3215_v43, %v3215_v43 }
0x17f7   :  { %v3222_v41 = vsel %vm321_vm0, %v3218_v9, 0.0 }
0x17f8   :  { %3223 = vadd.xlane.f32.xlu1 %v3222_v41  ;;  %v3219_v33 = vsel %vm321_vm0, %v3217_v32, 0.0 }
0x17f9   :  { %3220 = vadd.xlane.f32.xlu0 %v3219_v33 }
0x1885   :  { %v3224_v50 = vpop.xlane.xlu1 %3223 }
0x1886   :  { %v3226_v51 = vmul.f32 0.03125, %v3224_v50  ;;  %v3221_v62 = vpop.xlane.xlu0 %3220 }
0x1887   :  { %v3225_v57 = vmul.f32 0.03125, %v3221_v62 }
0x1888   :  { %v3228_v23 = vadd.f32 1e-05, %v3226_v51 }
0x1889   :  { %v3227_v52 = vadd.f32 1e-05, %v3225_v57 }
0x188a   :  { %5206 = vrsqrt.f32 %v3228_v23 }
0x188b   :  { %5208 = vrsqrt.f32 %v3227_v52  ;;  %v3535_v52 = vld [vmem:[#allocation23 + $0x2] sm:$0x3] }
0x188c   :  { %4773 = vmatprep.subr.msk.mxu1 %vm1831_vm5, %v3535_v52 }
0x1894   :  { %v5207_v10 = vpop.eup %5206 }
0x1895   :  { %v5209_v24 = vpop.eup %5208  ;;  %v3232_v19 = vmul.f32 %v5207_v10, %v3216_v31  ;;  %v4284_v10 = vld [vmem:[%s6908_s17 + $0x80] sm:$0xff] }
0x1896   :  { %v3231_v59 = vmul.f32 %v5209_v24, %v3215_v43 }
0x1897   :  { %v3240_v47 = vmul.f32 %v4268_v53, %v3232_v19 }
0x1898   :  { %v3239_v58 = vmul.f32 %v4268_v53, %v3231_v59  ;;  %v4285_v53 = vld [vmem:[%s6908_s17 + $0x88] sm:$0xff] }
0x1899   :  { %v3248_v2 = vadd.f32 %v4269_v46, %v3240_v47  ;;  %v5021_v24 = vpack.c.bf16 %v4285_v53, %v4284_v10 }
0x189a   :  { %v3247_v61 = vadd.f32 %v4269_v46, %v3239_v58 }
0x189c   :  { %4759 = vmatprep.mubr.msk.f32.mxu1 %vm321_vm0, %v3247_v61  ;;  %4770 = vmatprep.mubr.msk.f32.mxu0 %vm321_vm0, %v3247_v61 }
0x189d   :  { %4760 = vmatmul.mubr.msk.f32.vlgmr.msra.gmra.mrb[24].mxu1 %vm321_vm0, %v3248_v2  ;;  %4771 = vmatmul.mubr.msk.f32.vlgmr.msra.gmra.mrb[18].mxu0 %vm321_vm0, %v3248_v2 }
0x189e   :  { %3896 = vmatprep.mubr.f32.mxu0 %v5682_v54  ;;  %4774 = vmatpush3.msk.msra.mxu1 %vm1831_vm5, %v3535_v52 }
0x189f   :  { %5022 = vmatprep.subr.bf16.mxu1 %v5021_v24 }
0x1970   :  { %v4761_v4 = vpop.f32.mrb[24].mxu1  ;;  %v6582_v5 = vpop.f32.mrb[18].mxu0 }
0x1971   :  { %v3340_v7 = vadd.f32 %v4761_v4, %v4274_v3  ;;  %v3334_v1 = vpop.f32.mrb[25].mxu1  ;;  %v6584_v8 = vpop.f32.mrb[19].mxu0 }
0x1972   :  { %v3335_v11 = vadd.f32 %v4274_v3, %v3334_v1 }
0x1973   :  { %v3346_v44 = vsel %vm1635_vm15, %v3340_v7, -inf }
0x1974   :  { %3347 = vmax.xlane.f32.xlu1 %v3346_v44  ;;  %v3343_v14 = vsel %vm1635_vm15, %v3335_v11, -inf  ;;  %v4287_v44 = vld [vmem:[%s6908_s17 + $0x98] sm:$0xff] }
0x1975   :  { %3344 = vmax.xlane.f32.xlu0 %v3343_v14 }
0x1a01   :  { %v3348_v15 = vpop.xlane.xlu1 %3347 }
0x1a02   :  { %v3350_v16 = vsub.f32 %v3340_v7, %v3348_v15  ;;  %v3345_v60 = vpop.xlane.xlu0 %3344  ;;  %v4279_v7 = vld [vmem:[#allocation22 + $0x1] ss:$0 sm:$0xff] }
0x1a03   :  { %v3349_v55 = vsub.f32 %v3335_v11, %v3345_v60  ;;  %v4286_v11 = vld [vmem:[%s6908_s17 + $0x90] sm:$0xff] }
0x1a04   :  { %v3353_v63 = vmul.f32 1.442695, %v3350_v16  ;;  %v3491_v16 = vadd.f32 %v4279_v7, %v6584_v8 }
0x1a05   :  { %v3351_v20 = vmul.f32 1.442695, %v3349_v55 }
0x1a06   :  { %5210 = vpow2.f32 %v3353_v63  ;;  %v5025_v63 = vpack.c.bf16 %v4287_v44, %v4286_v11  ;;  %v3499_v8 = vmax.f32 %v3491_v16, 0.0 }
0x1a07   :  { %5212 = vpow2.f32 %v3351_v20 }
0x1a10   :  { %v5211_v21 = vpop.eup %5210 }
0x1a11   :  { %v5213_v56 = vpop.eup %5212  ;;  %v3358_v26 = vsel %vm1635_vm15, %v5211_v21, 0.0 }
0x1a12   :  { %3359 = vadd.xlane.f32.xlu1 %v3358_v26  ;;  %v3355_v27 = vsel %vm1635_vm15, %v5213_v56, 0.0  ;;  %v4289_v26 = vld [vmem:[%s6908_s17 + $0xa8] sm:$0xff] }
0x1a13   :  { %3356 = vadd.xlane.f32.xlu0 %v3355_v27 }
0x1a9f   :  { %v3360_v25 = vpop.xlane.xlu1 %3359 }
0x1aa0   :  { %5214 = vrcp.f32 %v3360_v25  ;;  %v3357_v29 = vpop.xlane.xlu0 %3356 }
0x1aa1   :  { %5216 = vrcp.f32 %v3357_v29 }
0x1aaa   :  { %v5215_v30 = vpop.eup %5214 }
0x1aab   :  { %v5217_v31 = vpop.eup %5216  ;;  %v6590_v43 = vmul.f32 %v5215_v30, %v5211_v21  ;;  %v4290_v30 = vld [vmem:[%s6908_s17 + $0xb0] sm:$0xff] }
0x1aac   :  { %v6592_v9 = vmul.f32 %v5217_v31, %v5213_v56  ;;  %v4288_v56 = vld [vmem:[%s6908_s17 + $0xa0] sm:$0xff]  ;;  %v4291_v31 = vld [vmem:[%s6908_s17 + $0xb8] sm:$0xff] }
0x1aad   :  { %v3368_v32 = vsel %vm1635_vm15, %v6590_v43, -inf  ;;  %v5029_v25 = vpack.c.bf16 %v4289_v26, %v4288_v56 }
0x1aae   :  { %3369 = vmax.xlane.f32.xlu1 %v3368_v32  ;;  %v3365_v41 = vsel %vm1635_vm15, %v6592_v9, -inf }
0x1aaf   :  { %3366 = vmax.xlane.f32.xlu0 %v3365_v41  ;;  %v5033_v41 = vpack.c.bf16 %v4291_v31, %v4290_v30  ;;  %v3770_v31 = vld [vmem:[%s6912_s21] sm:$0xff] }
0x1b3b   :  { %v6598_v33 = vpop.xlane.xlu1 %3369 }
0x1b3c   :  { %vm3372_vm8 = vcmp.ge.f32.partialorder %v6590_v43, %v6598_v33  ;;  %v6602_v34 = vpop.xlane.xlu0 %3366 }
0x1b3d   :  { %v3374_v35 = vsel %vm3372_vm8, %v6094_v49, 2  ;;  %vm3371_vm14 = vcmp.ge.f32.partialorder %v6592_v9, %v6602_v34 }
0x1b3e   :  { %v3373_v36 = vsel %vm3371_vm14, %v6094_v49, 2  ;;  %v3390_v37 = vsel %vm1635_vm15, %v3374_v35, 2147483647  ;;  %v4292_v35 = vld [vmem:[%s6908_s17 + $0xc0] sm:$0xff] }
0x1b3f   :  { %v3392_v38 = vshra.s32 %v3390_v37, 16  ;;  %v3375_v39 = vsel %vm1635_vm15, %v3373_v36, 2147483647  ;;  %v3391_v42 = vand.u32 65535, %v3390_v37  ;;  %v4293_v36 = vld [vmem:[%s6908_s17 + $0xc8] sm:$0xff] }
0x1b40   :  { %v3377_v40 = vshra.s32 %v3375_v39, 16  ;;  %v3376_v45 = vand.u32 65535, %v3375_v39  ;;  %v5037_v37 = vpack.c.bf16 %v4293_v36, %v4292_v35  ;;  %v4295_v39 = vld [vmem:[%s6908_s17 + $0xd8] sm:$0xff]  ;;  %v3783_v35 = vld [vmem:[%s6912_s21 + $0x68] sm:$0xff] }
0x1b41   :  { %v3394_v17 = vcvt.s32.f32 %v3392_v38  ;;  %v3393_v50 = vcvt.s32.f32 %v3391_v42  ;;  %v4294_v38 = vld [vmem:[%s6908_s17 + $0xd0] sm:$0xff]  ;;  %v4297_v42 = vld [vmem:[%s6908_s17 + $0xe8] sm:$0xff]  ;;  %v3789_v36 = vld [vmem:[%s6912_s21 + $0x98] sm:$0xff] }
0x1b42   :  { %v3379_v18 = vcvt.s32.f32 %v3377_v40  ;;  %v3378_v62 = vcvt.s32.f32 %v3376_v45 }
0x1b43   :  { %3395 = vmin.xlane.f32.xlu1 %v3394_v17 }
0x1b44   :  { %3380 = vmin.xlane.f32.xlu0 %v3379_v18 }
0x1bd0   :  { %v3396_v48 = vpop.xlane.xlu1 %3395 }
0x1bd1   :  { %v3381_v51 = vpop.xlane.xlu0 %3380  ;;  %vm3397_vm2 = vcmp.eq.f32.partialorder %v3394_v17, %v3396_v48  ;;  %v3402_v19 = vcvt.f32.s32 %v3396_v48  ;;  %v5041_v17 = vpack.c.bf16 %v4295_v39, %v4294_v38  ;;  %v3782_v38 = vld [vmem:[%s6912_s21 + $0x60] sm:$0xff]  ;;  %v3788_v39 = vld [vmem:[%s6912_s21 + $0x90] sm:$0xff] }
0x1bd2   :  { %v3398_v57 = vsel %vm3397_vm2, %v3393_v50, inf  ;;  %vm3382_vm3 = vcmp.eq.f32.partialorder %v3379_v18, %v3381_v51  ;;  %v3387_v59 = vcvt.f32.s32 %v3381_v51  ;;  %v4296_v18 = vld [vmem:[%s6908_s17 + $0xe0] sm:$0xff]  ;;  %v4298_v50 = vld [vmem:[%s6908_s17 + $0xf0] sm:$0xff]  ;;  %v4299_v51 = vld [vmem:[%s6908_s17 + $0xf8] sm:$0xff] }
0x1bd3   :  { %3399 = vmin.xlane.f32.xlu1 %v3398_v57  ;;  %v3383_v23 = vsel %vm3382_vm3, %v3378_v62, inf  ;;  %v3403_v47 = vshll.u32 %v3402_v19, 16  ;;  %v5045_v48 = vpack.c.bf16 %v4297_v42, %v4296_v18  ;;  %v5049_v62 = vpack.c.bf16 %v4299_v51, %v4298_v50  ;;  %v3779_v18 = vld [vmem:[%s6912_s21 + $0x48] sm:$0xff] }
0x1bd4   :  { %3384 = vmin.xlane.f32.xlu0 %v3383_v23  ;;  %v3388_v2 = vshll.u32 %v3387_v59, 16  ;;  %v3496_v57 = vadd.f32 %v6582_v5, %v4279_v7 }
0x1bd6   :  { %v3500_v52 = vmax.f32 %v3496_v57, 0.0 }
0x1c60   :  { %v3400_v46 = vpop.xlane.xlu1 %3399 }
0x1c61   :  { %v3401_v58 = vcvt.f32.s32 %v3400_v46  ;;  %v3385_v61 = vpop.xlane.xlu0 %3384 }
0x1c62   :  { %v3386_v3 = vcvt.f32.s32 %v3385_v61  ;;  %v3709_v61 = vsel %vm1635_vm15, %v6590_v43, 0.0 }
0x1c63   :  { %v3404_v4 = vadd.s32 %v3403_v47, %v3401_v58  ;;  %v3708_v58 = vsel %vm1635_vm15, %v6592_v9, 0.0 }
0x1c64   :  { %v3389_v1 = vadd.s32 %v3388_v2, %v3386_v3 }
0x1c65   :  { %vm3406_vm4 = vcmp.eq.s32.totalorder %v6094_v49, %v3404_v4  ;;  %v3502_v40 = vmul.u32 64, %v3404_v4 }
0x1c66   :  { %v4278_v14 = vsel %vm3406_vm4, 1.0, %v5682_v54  ;;  %v3501_v15 = vmul.u32 64, %v3389_v1  ;;  %vm3405_vm5 = vcmp.eq.s32.totalorder %v6094_v49, %v3389_v1 }
0x1c67   :  { %v4277_v60 = vsel %vm3405_vm5, 1.0, %v5682_v54  ;;  %v3700_v55 = vsel %vm1635_vm15, %v4278_v14, 0.0  ;;  %v3506_v45 = vadd.s32 64, %v3502_v40  ;;  %vm3504_vm11 = vcmp.ge.s32.totalorder %v6094_v49, %v3502_v40  ;;  %v3773_v40 = vld [vmem:[%s6912_s21 + $0x18] sm:$0xff] }
0x1c68   :  { %v3505_v20 = vadd.s32 64, %v3501_v15  ;;  %4775 = vmatprep.mubr.msk.f32.mxu1 %vm1635_vm15, %v4277_v60  ;;  %v3699_v21 = vsel %vm1635_vm15, %v4277_v60, 0.0  ;;  %vm3503_vm6 = vcmp.ge.s32.totalorder %v6094_v49, %v3501_v15  ;;  %v5061_v42 = vpack.c.bf16 %v3779_v18, %v3773_v40 }
0x1c69   :  { %v6638_v27 = vadd.f32 %v3700_v55, %v3699_v21  ;;  %4776 = vmatmul.mubr.msk.f32.vlgmr.msra.gmra.mrb[26].mxu1 %vm1635_vm15, %v4278_v14  ;;  %vm3508_vm10 = vcmp.lt.s32.totalorder %v6094_v49, %v3506_v45 }
0x1c6a   :  { %5024 = vmatpush3.bf16.msra.mxu1 %v5021_v24  ;;  %vm3507_vm7 = vcmp.lt.s32.totalorder %v6094_v49, %v3505_v20  ;;  %vm3510_vm12 = vmand %vm3504_vm11, %vm3508_vm10 }
0x1c6b   :  { %5026 = vmatprep.subr.bf16.mxu1 %v5025_v63  ;;  %vm3509_vm9 = vmand %vm3503_vm6, %vm3507_vm7  ;;  %v4283_v23 = vsel %vm3510_vm12, 1.0, %v5682_v54  ;;  %v3702_v45 = vrot.slane %v6638_v27, 4 }
0x1c6c   :  { %v4282_v29 = vsel %vm3509_vm9, 1.0, %v5682_v54  ;;  %v3516_v10 = vmul.f32 %v4283_v23, %v3500_v52 }
0x1c6d   :  { %v3515_v32 = vmul.f32 %v4282_v29, %v3499_v8  ;;  %v3777_v29 = vld [vmem:[%s6912_s21 + $0x38] sm:$0xff]  ;;  %v3703_v50 = vadd.f32 %v3702_v45, %v6638_v27 }
0x1c6e   :  { %5028 = vmatpush3.bf16.msra.mxu1 %v5025_v63 }
0x1c6f   :  { %4810 = vmatprep.mubr.f32.mxu1 %v3515_v32  ;;  %5030 = vmatprep.subr.bf16.mxu1 %v5029_v25  ;;  %v3776_v32 = vld [vmem:[%s6912_s21 + $0x30] sm:$0xff] }
0x1c72   :  { %5032 = vmatpush3.bf16.msra.mxu1 %v5029_v25  ;;  %v3771_v25 = vld [vmem:[%s6912_s21 + $0x8] sm:$0xff] }
0x1c73   :  { %5034 = vmatprep.subr.bf16.mxu1 %v5033_v41  ;;  %v5053_v30 = vpack.c.bf16 %v3777_v29, %v3771_v25  ;;  %v3793_v25 = vld [vmem:[%s6912_s21 + $0xb8] sm:$0xff] }
0x1c75   :  { %5054 = vmatprep.subr.bf16.mxu0 %v5053_v30 }
0x1c76   :  { %5036 = vmatpush3.bf16.msra.mxu1 %v5033_v41  ;;  %v5055_v41 = vpack.c.bf16 %v3776_v32, %v3770_v31  ;;  %v3786_v31 = vld [vmem:[%s6912_s21 + $0x80] sm:$0xff]  ;;  %v3792_v32 = vld [vmem:[%s6912_s21 + $0xb0] sm:$0xff] }
0x1c77   :  { %5038 = vmatprep.subr.bf16.mxu1 %v5037_v37 }
0x1c78   :  { %5056 = vmatpush1.bf16.msra.mxu0 %v5055_v41  ;;  %v5075_v41 = vpack.c.bf16 %v3792_v32, %v3786_v31 }
0x1c7a   :  { %5040 = vmatpush3.bf16.msra.mxu1 %v5037_v37  ;;  %v5057_v37 = vpack.c.bf16 %v3789_v36, %v3783_v35 }
0x1c7b   :  { %5042 = vmatprep.subr.bf16.mxu1 %v5041_v17 }
0x1c7c   :  { %5058 = vmatprep.subr.bf16.mxu0 %v5057_v37 }
0x1c7e   :  { %5044 = vmatpush3.bf16.msra.mxu1 %v5041_v17  ;;  %v5059_v17 = vpack.c.bf16 %v3788_v39, %v3782_v38 }
0x1c7f   :  { %5046 = vmatprep.subr.bf16.mxu1 %v5045_v48 }
0x1c80   :  { %5060 = vmatpush1.bf16.msra.mxu0 %v5059_v17 }
0x1c81   :  { %5062 = vmatprep.subr.bf16.mxu0 %v5061_v42 }
0x1c82   :  { %5048 = vmatpush3.bf16.msra.mxu1 %v5045_v48  ;;  %v1992_v48 = vrot.slane %v6335_v0, 4 }
0x1c83   :  { %5050 = vmatprep.subr.bf16.mxu1 %v5049_v62 }
0x1c84   :  { %v1993_v51 = vadd.f32 %v1992_v48, %v6335_v0 }
0x1c86   :  { %5052 = vmatpush3.bf16.msra.mxu1 %v5049_v62  ;;  %v3704_v62 = vrot.slane %v3703_v50, 2  ;;  %v1994_v57 = vrot.slane %v1993_v51, 2 }
0x1c88   :  { %v3705_v23 = vadd.f32 %v3704_v62, %v3703_v50  ;;  %v1995_v52 = vadd.f32 %v1994_v57, %v1993_v51 }
0x1c89   :  { %4811 = vmatmul.mubr.f32.vlgmr.msra.gmra.mrb[26].mxu1 %v3516_v10 }
0x1c8a   :  { %v3706_v10 = vrot.slane %v3705_v23, 1 }
0x1d5c   :  { %v4812_v53 = vpop.f32.mrb[26].mxu1 }
0x1d5d   :  { %v3696_v24 = vmul.f32 %v4812_v53, %v6598_v33  ;;  %v3686_v19 = vpop.f32.mrb[27].mxu1  ;;  %v3710_v33 = vadd.f32 %v3709_v61, %v3708_v58 }
0x1d5e   :  { %v3695_v59 = vmul.f32 %v3686_v19, %v6602_v34 }
0x1d5f   :  { %v3698_v46 = vadd.f32 %v3696_v24, %v6552_v22  ;;  %v1998_v22 = vsel %vm1635_vm15, %v6289_v13, 0.0  ;;  %v3711_v1 = vrot.slane %v3710_v33, 4  ;;  %v1996_v24 = vrot.slane %v1995_v52, 1 }
0x1d60   :  { %v3697_v49 = vadd.f32 %v3695_v59, %v6555_v6  ;;  %v1999_v6 = vsel %vm1635_vm15, %v6287_v12, 0.0 }
0x1d61   :  { %v3729_v5 = vsel %vm321_vm0, %v3698_v46, 0.0  ;;  %v2000_v43 = vadd.f32 %v1999_v6, %v1998_v22  ;;  %v3712_v15 = vadd.f32 %v3711_v1, %v3710_v33  ;;  %v1997_v61 = vadd.f32 %v1996_v24, %v1995_v52  ;;  %v4304_v6 = vld [vmem:[%s6911_s20] ss:$0 sm:$0xff]  ;;  %v3772_v1 = vld [vmem:[%s6912_s21 + $0x10] sm:$0xff] }
0x1d62   :  { %3730 = vadd.xlane.f32.xlu1 %v3729_v5  ;;  %v3726_v47 = vsel %vm321_vm0, %v3697_v49, 0.0  ;;  %v3707_v5 = vadd.f32 %v3706_v10, %v3705_v23 }
0x1d63   :  { %3727 = vadd.xlane.f32.xlu0 %v3726_v47  ;;  %v2001_v12 = vrot.slane %v2000_v43, 4  ;;  %v3713_v16 = vrot.slane %v3712_v15, 2 }
0x1d65   :  { %v2002_v60 = vadd.f32 %v2001_v12, %v2000_v43  ;;  %v3714_v55 = vadd.f32 %v3713_v16, %v3712_v15  ;;  %v3785_v43 = vld [vmem:[%s6912_s21 + $0x78] sm:$0xff]  ;;  %v3784_v16 = vld [vmem:[%s6912_s21 + $0x70] sm:$0xff] }
0x1d67   :  { %v2003_v63 = vrot.slane %v2002_v60, 2  ;;  %v3715_v20 = vrot.slane %v3714_v55, 1 }
0x1d69   :  { %v2004_v21 = vadd.f32 %v2003_v63, %v2002_v60  ;;  %v3716_v56 = vadd.f32 %v3715_v20, %v3714_v55  ;;  %v3790_v60 = vld [vmem:[%s6912_s21 + $0xa0] sm:$0xff]  ;;  %v3775_v55 = vld [vmem:[%s6912_s21 + $0x28] sm:$0xff]  ;;  %v3781_v63 = vld [vmem:[%s6912_s21 + $0x58] sm:$0xff] }
0x1d6a   :  { %v5067_v20 = vpack.c.bf16 %v3790_v60, %v3784_v16 }
0x1d6b   :  { %v2005_v26 = vrot.slane %v2004_v21, 1 }
0x1d6d   :  { %v2006_v8 = vadd.f32 %v2005_v26, %v2004_v21  ;;  %v5069_v21 = vpack.c.bf16 %v3781_v63, %v3775_v55  ;;  %v3780_v26 = vld [vmem:[%s6912_s21 + $0x50] sm:$0xff] }
0x1def   :  { %v3731_v2 = vpop.xlane.xlu1 %3730 }
0x1df0   :  { %v3733_v3 = vmul.f32 0.03125, %v3731_v2  ;;  %v3728_v34 = vpop.xlane.xlu0 %3727 }
0x1df1   :  { %v3732_v4 = vmul.f32 0.03125, %v3728_v34 }
0x1df2   :  { %v6692_v7 = vsub.f32 %v3698_v46, %v3733_v3  ;;  %v4303_v3 = vld [vmem:[%s6910_s19] ss:$0 sm:$0xff] }
0x1df3   :  { %v6694_v11 = vsub.f32 %v3697_v49, %v3732_v4 }
0x1df4   :  { %v3737_v9 = vmul.f32 %v6692_v7, %v6692_v7 }
0x1df5   :  { %v3736_v44 = vmul.f32 %v6694_v11, %v6694_v11 }
0x1df6   :  { %v3741_v14 = vsel %vm321_vm0, %v3737_v9, 0.0  ;;  %v3778_v9 = vld [vmem:[%s6912_s21 + $0x40] sm:$0xff] }
0x1df7   :  { %3742 = vadd.xlane.f32.xlu1 %v3741_v14  ;;  %v3738_v13 = vsel %vm321_vm0, %v3736_v44, 0.0  ;;  %v5063_v14 = vpack.c.bf16 %v3778_v9, %v3772_v1 }
0x1df8   :  { %3739 = vadd.xlane.f32.xlu0 %v3738_v13 }
0x1e08   :  { %3718 = vrot.lane.b32.xlu1 %v3716_v56, %s5681_s12  ;;  %v3774_v56 = vld [vmem:[%s6912_s21 + $0x20] sm:$0xff] }
0x1e09   :  { %v5071_v29 = vpack.c.bf16 %v3780_v26, %v3774_v56 }
0x1e0e   :  { %2008 = vrot.lane.b32.xlu0 %v2006_v8, %s5681_s12  ;;  %v3787_v8 = vld [vmem:[%s6912_s21 + $0x88] sm:$0xff]  ;;  %s5684_s12 = smov [#allocation29]  }
0x1e0f   :  { %v5073_v30 = vpack.c.bf16 %v3793_v25, %v3787_v8 }
0x1e84   :  { %v3743_v53 = vpop.xlane.xlu1 %3742 }
0x1e85   :  { %v3745_v19 = vmul.f32 0.03125, %v3743_v53  ;;  %v3740_v59 = vpop.xlane.xlu0 %3739 }
0x1e86   :  { %v3744_v46 = vmul.f32 0.03125, %v3740_v59 }
0x1e87   :  { %v3747_v49 = vadd.f32 1e-05, %v3745_v19 }
0x1e88   :  { %v3746_v47 = vadd.f32 1e-05, %v3744_v46  ;;  %v3719_v58 = vpop.permute.xlu1 %3718 }
0x1e89   :  { %5218 = vrsqrt.f32 %v3747_v49  ;;  %v3721_v27 = vsel %vm1635_vm15, %v3707_v5, %v3719_v58  ;;  %v2009_v0 = vpop.permute.xlu0 %2008 }
0x1e8a   :  { %5220 = vrsqrt.f32 %v3746_v47  ;;  %3723 = vst.msk [vmem:[#allocation31 + $0x1] sm:$0x1] %vm2012_vm13, %v3721_v27  ;;  %v2011_v33 = vsel %vm1635_vm15, %v1997_v61, %v2009_v0 }
0x1e8b   :  { %2013 = vst.msk [vmem:[#allocation31] sm:$0x1] %vm2012_vm13, %v2011_v33 }
0x1e93   :  { %v5219_v2 = vpop.eup %5218 }
0x1e94   :  { %v5221_v34 = vpop.eup %5220  ;;  %v3751_v4 = vmul.f32 %v5219_v2, %v6692_v7  ;;  %v3791_v7 = vld [vmem:[%s6912_s21 + $0xa8] sm:$0xff]  ;;  %s4116_s21 = sshll.u32 %s5684_s12, 4  ;;  %s4117_s21 = int_to_ptr.vmem [resolvable:$true] %s4116_s21 }
0x1e95   :  { %v3750_v22 = vmul.f32 %v5221_v34, %v6694_v11  ;;  %v5065_v12 = vpack.c.bf16 %v3791_v7, %v3785_v43  ;;  %s5530_s19 = scalar_lea.vmem %s4117_s21, 512  ;;  %p5535_p1 = scmp.lt.s32.totalorder %s4117_s21, %s4117_s21 }
0x1e96   :  { %v3759_v11 = vmul.f32 %v4303_v3, %v3751_v4  ;;  %p5531_p0 = scmp.ne.s32.totalorder %s4117_s21, %s5530_s19  ;;  %p5536_p2 = scmp.lt.s32.totalorder %s5530_s19, %s5530_s19 }
0x1e97   :  { %v3758_v44 = vmul.f32 %v4303_v3, %v3750_v22 }
0x1e98   :  { %v3767_v15 = vadd.f32 %v4304_v6, %v3759_v11  ;;  %p5537_p3 = por %p5536_p2, %p5535_p1 }
0x1e99   :  { %v3766_v13 = vadd.f32 %v4304_v6, %v3758_v44 }
0x1e9a   :  { %3769 = vst.msk [vmem:[#allocation25 + $0x8] sm:$0xff] %vm321_vm0, %v3767_v15  ;;  %p5538_p4 = pnand %p5537_p3, %p5531_p0 }
0x1e9b   :  { %4305 = vmatmul.mubr.msk.f32.vlgmr.msra.gmra.mrb[20].mxu0 %vm321_vm0, %v3766_v13  ;;  %3768 = vst.msk [vmem:[#allocation25] sm:$0xff] %vm321_vm0, %v3766_v13 }
0x1e9c   :  { %5064 = vmatpush1.bf16.msra.mxu0 %v5063_v14  ;;  %3902 = vmatprep.mubr.f32.mxu0 %v5682_v54 }
0x1e9d   :  { %5066 = vmatprep.subr.bf16.mxu0 %v5065_v12 }
0x1e9f   :  { %4306 = vmatmul.mubr.msk.f32.gmra.mrb[22].mxu0 %vm321_vm0, %v3767_v15 }
0x1ea0   :  { %5068 = vmatpush1.bf16.msra.mxu0 %v5067_v20  ;;  %3973 = vmatprep.mubr.f32.mxu0 %v5682_v54 }
0x1ea1   :  { %5070 = vmatprep.subr.bf16.mxu0 %v5069_v21 }
0x1ea3   :  { %4307 = vmatmul.mubr.msk.f32.vlgmr.msra.gmra.mrb[24].mxu0 %vm321_vm0, %v3766_v13 }
0x1ea4   :  { %5072 = vmatpush1.bf16.msra.mxu0 %v5071_v29  ;;  %3979 = vmatprep.mubr.f32.mxu0 %v5682_v54 }
0x1ea5   :  { %5074 = vmatprep.subr.bf16.mxu0 %v5073_v30 }
0x1ea7   :  { %4308 = vmatmul.mubr.msk.f32.gmra.mrb[26].mxu0 %vm321_vm0, %v3767_v15 }
0x1ea8   :  { %5076 = vmatpush1.bf16.msra.mxu0 %v5075_v41  ;;  %4050 = vmatprep.mubr.f32.mxu0 %v5682_v54 }
0x1eab   :  { %4309 = vmatmul.mubr.msk.f32.vlgmr.msra.gmra.mrb[28].mxu0 %vm321_vm0, %v3766_v13 }
0x1eac   :  { %4056 = vmatprep.mubr.f32.mxu0 %v5682_v54 }
0x1eaf   :  { %4310 = vmatmul.mubr.msk.f32.gmra.mrb[30].mxu0 %vm321_vm0, %v3767_v15 }
0x1eb0   :  { %5541 = shalt.err (!%p5538_p4)
}
0x1eb1   :  { %s5542_s4 = scalar_lea.hbm %s6917_s26, 512 }
0x1eb2   :  { %p5543_p5 = scmp.ne.s32.totalorder %s6917_s26, %s5542_s4  ;;  %p5546_p6 = scmp.lt.u32.totalorder %s5542_s4, %s6917_s26 }
0x1eb4   :  { %p5548_p7 = pnand %p5546_p6, %p5543_p5 }
0x1eb6   :  { %5551 = shalt.err (!%p5548_p7)
}
0x1eb7   :  { %4122 = dma.vmem_to_hbm [thread:$0]  %s4117_s21, 512, %s6917_s26, [#allocation30], %s5671_s2, %s5671_s2, %s5672_s30  }
0x1eb8   :  { %s5685_s24 = smov [#allocation25]  }
0x1eb9   :  { %s4080_s3 = sshll.u32 %s5685_s24, 4  ;;  %s4081_s3 = int_to_ptr.vmem [resolvable:$true] %s4080_s3 }
0x1eba   :  { %s5552_s14 = scalar_lea.vmem %s4081_s3, 256  ;;  %p5557_p9 = scmp.lt.s32.totalorder %s4081_s3, %s4081_s3 }
0x1ebb   :  { %p5553_p8 = scmp.ne.s32.totalorder %s4081_s3, %s5552_s14  ;;  %p5558_p10 = scmp.lt.s32.totalorder %s5552_s14, %s5552_s14 }
0x1ebd   :  { %p5559_p11 = por %p5558_p10, %p5557_p9 }
0x1ebf   :  { %p5560_p12 = pnand %p5559_p11, %p5553_p8 }
0x1ec1   :  { %5563 = shalt.err (!%p5560_p12)
}
0x1ec2   :  { %s5564_s28 = scalar_lea.hbm %s6914_s23, 256 }
0x1ec3   :  { %p5565_p13 = scmp.ne.s32.totalorder %s6914_s23, %s5564_s28  ;;  %p5568_p0 = scmp.lt.u32.totalorder %s5564_s28, %s6914_s23 }
0x1ec5   :  { %p5570_p1 = pnand %p5568_p0, %p5565_p13 }
0x1ec7   :  { %5573 = shalt.err (!%p5570_p1)
}
0x1ec8   :  { %4086 = dma.vmem_to_hbm [thread:$0]  %s4081_s3, 256, %s6914_s23, [#allocation4], %s5671_s2, %s5671_s2, %s5672_s30  }
0x1ec9   :  { %s5686_s13 = smov [#allocation31]  }
0x1eca   :  { %s4128_s12 = sshll.u32 %s5686_s13, 4  ;;  %s4129_s12 = int_to_ptr.vmem [resolvable:$true] %s4128_s12 }
0x1ecb   :  { %s5574_s21 = scalar_lea.vmem %s4129_s12, 32  ;;  %p5579_p3 = scmp.lt.s32.totalorder %s4129_s12, %s4129_s12 }
0x1ecc   :  { %p5575_p2 = scmp.ne.s32.totalorder %s4129_s12, %s5574_s21  ;;  %p5580_p4 = scmp.lt.s32.totalorder %s5574_s21, %s5574_s21 }
0x1ece   :  { %p5581_p5 = por %p5580_p4, %p5579_p3 }
0x1ed0   :  { %p5582_p6 = pnand %p5581_p5, %p5575_p2 }
0x1ed2   :  { %5585 = shalt.err (!%p5582_p6)
}
0x1ed3   :  { %s5586_s20 = scalar_lea.hbm %s6918_s27, 32 }
0x1ed4   :  { %p5587_p7 = scmp.ne.s32.totalorder %s6918_s27, %s5586_s20  ;;  %p5590_p8 = scmp.lt.u32.totalorder %s5586_s20, %s6918_s27 }
0x1ed6   :  { %p5592_p9 = pnand %p5590_p8, %p5587_p7 }
0x1ed8   :  { %5595 = shalt.err (!%p5592_p9)
}
0x1ed9   :  { %4134 = dma.vmem_to_hbm [thread:$0]  %s4129_s12, 32, %s6918_s27, [#allocation30], %s5663_s6, %s5663_s6, %s5664_s11   ;;  %v3798_v54 = vsub.s32 0, %v6181_v28  ;;  %v3802_v36 = vsub.s32 1, %v6181_v28  ;;  %v3806_v18 = vsub.s32 2, %v6181_v28  ;;  %v3810_v45 = vsub.s32 3, %v6181_v28 }
0x1eda   :  { %s6962_s24 = sld [smem:[#allocation55_spill]]  ;;  %v3814_v24 = vsub.s32 4, %v6181_v28  ;;  %v3818_v59 = vsub.s32 5, %v6181_v28  ;;  %s5687_s27 = smov [#allocation26]  }
0x1edb   :  { %s4092_s6 = sshll.u32 %s5687_s27, 4  ;;  %s5688_s11 = smov [#allocation28]   ;;  %s4093_s6 = int_to_ptr.vmem [resolvable:$true] %s4092_s6 }
0x1edc   :  { %s4104_s3 = sshll.u32 %s5688_s11, 4  ;;  %s5596_s14 = scalar_lea.vmem %s4093_s6, 1536  ;;  %s6857_s3 = int_to_ptr.vmem [resolvable:$true] %s4104_s3 }
0x1edd   :  { %p5597_p10 = scmp.ne.s32.totalorder %s4093_s6, %s5596_s14  ;;  %p5601_p11 = scmp.lt.s32.totalorder %s4093_s6, %s4093_s6 }
0x1ede   :  { %p5602_p12 = scmp.lt.s32.totalorder %s5596_s14, %s5596_s14 }
0x1ee0   :  { %v3794_v35 = vld [vmem:[%s6962_s24] sm:$0x3f]  ;;  %p5603_p13 = por %p5602_p12, %p5601_p11 }
0x1ee1   :  { %v3799_v37 = vrot.slane %v3794_v35, %v3798_v54  ;;  %v3803_v38 = vrot.slane %v3794_v35, %v3802_v36  ;;  %v3807_v62 = vrot.slane %v3794_v35, %v3806_v18  ;;  %v3811_v23 = vrot.slane %v3794_v35, %v3810_v45 }
0x1ee2   :  { %v3815_v47 = vrot.slane %v3794_v35, %v3814_v24  ;;  %v3819_v61 = vrot.slane %v3794_v35, %v3818_v59  ;;  %p5604_p0 = pnand %p5603_p13, %p5597_p10 }
0x1f6e   :  { %v3898_v39 = vpop.f32.mrb[20].mxu0 }
0x1f6f   :  { %v3899_v40 = vadd.f32 %v3898_v39, %v3799_v37  ;;  %v3900_v17 = vpop.f32.mrb[21].mxu0 }
0x1f70   :  { %v3901_v42 = vadd.f32 %v3900_v17, %v3803_v38 }
0x1f71   :  { %4063 = vst [vmem:[#allocation26] sm:$0xff] %v3899_v40 }
0x1f72   :  { %4064 = vst [vmem:[#allocation26 + $0x8] sm:$0xff] %v3901_v42  ;;  %v3904_v48 = vpop.f32.mrb[22].mxu0 }
0x1f73   :  { %v3905_v50 = vadd.f32 %v3904_v48, %v3799_v37  ;;  %v3906_v51 = vpop.f32.mrb[23].mxu0 }
0x1f74   :  { %v3907_v57 = vadd.f32 %v3906_v51, %v3803_v38 }
0x1f75   :  { %4069 = vst [vmem:[#allocation26 + $0x30] sm:$0xff] %v3905_v50 }
0x1f76   :  { %4070 = vst [vmem:[#allocation26 + $0x38] sm:$0xff] %v3907_v57  ;;  %v3975_v52 = vpop.f32.mrb[24].mxu0 }
0x1f77   :  { %v3976_v10 = vadd.f32 %v3975_v52, %v3807_v62  ;;  %v3977_v53 = vpop.f32.mrb[25].mxu0 }
0x1f78   :  { %v3978_v19 = vadd.f32 %v3977_v53, %v3811_v23 }
0x1f79   :  { %4065 = vst [vmem:[#allocation26 + $0x10] sm:$0xff] %v3976_v10 }
0x1f7a   :  { %4066 = vst [vmem:[#allocation26 + $0x18] sm:$0xff] %v3978_v19  ;;  %v3981_v46 = vpop.f32.mrb[26].mxu0 }
0x1f7b   :  { %v3982_v49 = vadd.f32 %v3981_v46, %v3807_v62  ;;  %v3983_v5 = vpop.f32.mrb[27].mxu0 }
0x1f7c   :  { %v3984_v58 = vadd.f32 %v3983_v5, %v3811_v23 }
0x1f7d   :  { %4071 = vst [vmem:[#allocation26 + $0x40] sm:$0xff] %v3982_v49 }
0x1f7e   :  { %4072 = vst [vmem:[#allocation26 + $0x48] sm:$0xff] %v3984_v58  ;;  %v4052_v27 = vpop.f32.mrb[28].mxu0 }
0x1f7f   :  { %v4053_v0 = vadd.f32 %v4052_v27, %v3815_v47  ;;  %v4054_v33 = vpop.f32.mrb[29].mxu0 }
0x1f80   :  { %v4055_v2 = vadd.f32 %v4054_v33, %v3819_v61 }
0x1f81   :  { %4067 = vst [vmem:[#allocation26 + $0x20] sm:$0xff] %v4053_v0 }
0x1f82   :  { %4068 = vst [vmem:[#allocation26 + $0x28] sm:$0xff] %v4055_v2  ;;  %v4058_v3 = vpop.f32.mrb[30].mxu0 }
0x1f83   :  { %v4059_v28 = vadd.f32 %v4058_v3, %v3815_v47  ;;  %v4060_v34 = vpop.f32.mrb[31].mxu0 }
0x1f84   :  { %v4061_v4 = vadd.f32 %v4060_v34, %v3819_v61 }
0x1f85   :  { %4073 = vst [vmem:[#allocation26 + $0x50] sm:$0xff] %v4059_v28 }
0x1f86   :  { %4074 = vst [vmem:[#allocation26 + $0x58] sm:$0xff] %v4061_v4 }
0x1f87   :  { %5607 = shalt.err (!%p5604_p0)
}
0x1f88   :  { %s6963_s28 = sld [smem:[#allocation56_spill]] }
0x1f8e   :  { %s5608_s16 = scalar_lea.hbm %s6963_s28, 1536 }
0x1f8f   :  { %p5609_p1 = scmp.ne.s32.totalorder %s6963_s28, %s5608_s16  ;;  %p5612_p2 = scmp.lt.u32.totalorder %s5608_s16, %s6963_s28 }
0x1f91   :  { %p5614_p3 = pnand %p5612_p2, %p5609_p1 }
0x1f93   :  { %5617 = shalt.err (!%p5614_p3)
}
0x1f94   :  { %s5689_s18 = smov 768   ;;  %s5690_s13 = smov 48  }
0x1f95   :  { %4098 = dma.vmem_to_hbm [thread:$0]  %s4093_s6, 1536, %s6963_s28, [#allocation27], %s5689_s18, %s5689_s18, %s5690_s13  }
0x1f96   :  { %s5618_s19 = scalar_lea.vmem %s6857_s3, 2048  ;;  %p5623_p5 = scmp.lt.s32.totalorder %s6857_s3, %s6857_s3 }
0x1f97   :  { %p5619_p4 = scmp.ne.s32.totalorder %s6857_s3, %s5618_s19  ;;  %p5624_p6 = scmp.lt.s32.totalorder %s5618_s19, %s5618_s19 }
0x1f99   :  { %p5625_p7 = por %p5624_p6, %p5623_p5 }
0x1f9b   :  { %p5626_p8 = pnand %p5625_p7, %p5619_p4 }
0x1f9d   :  { %5629 = shalt.err (!%p5626_p8)
}
0x1f9e   :  { %s6964_s4 = sld [smem:[#allocation57_spill]] }
0x1fa4   :  { %s5630_s0 = scalar_lea.hbm %s6964_s4, 2048 }
0x1fa5   :  { %p5631_p9 = scmp.ne.s32.totalorder %s6964_s4, %s5630_s0  ;;  %p5634_p10 = scmp.lt.u32.totalorder %s5630_s0, %s6964_s4 }
0x1fa7   :  { %p5636_p11 = pnand %p5634_p10, %p5631_p9 }
0x1fa9   :  { %5639 = shalt.err (!%p5636_p11)
}
0x1faa   :  { %4110 = dma.vmem_to_hbm [thread:$0]  %s6857_s3, 2048, %s6964_s4, [#allocation27], %s5671_s2, %s5671_s2, %s5672_s30  }
0x1fab   :  { %5656 = dma.done.wait [#allocation4], 256  }
0x1fac   :  { %5657 = vsyncadd [#allocation4], 4294967040 }
0x1fad   :  { %5658 = dma.done.wait [#allocation27], 3584  }
0x1fae   :  { %5659 = vsyncadd [#allocation27], 4294963712 }
0x1faf   :  { %5660 = dma.done.wait [#allocation30], 544  }
0x1fb0   :  { %5661 = vsyncadd [#allocation30], 4294966752 }
0x1fb1   :  { %4150 = vsyncpa [#allocation3], 1 }
0x1fb2   :  { %4151 = vsyncpa [#allocation6], 1 }
0x1fb3   :  { %4152 = vsyncpa [#allocation9], 1 }
0x1fb4   :  { %4153 = vsyncpa [#allocation12], 1 }
0x1fb5   :  { %4154 = vsyncpa [#allocation15], 1 }
0x1fb6   :  { %4155 = vsyncpa [#allocation18], 1 }
0x1fb7   :  { %4156 = vsyncpa [#allocation21], 1 }
0x1fb8   :  { %4157 = vsyncpa [#allocation24], 1 }
0x1fb9   :  { %4158 = vsyncpa [#allocation4], 1 }
0x1fba   :  { %4159 = vsyncpa [#allocation27], 1 }
0x1fbb   :  { %4160 = vsyncpa [#allocation30], 1 }

</bundles_post_ra>
